<compile_context>
chip_gen: v6e
topology: v6e:2x2x1
jax: 0.10.0
libtpu: 0.0.40
codegen_flags: <defaults>
</compile_context>

<pallas_src>
import functools

import jax
import jax.numpy as jnp
from jax.experimental import pallas as pl
from jax.experimental.pallas import tpu as pltpu

VMEM_SPEC = pl.BlockSpec(memory_space=pltpu.MemorySpace.VMEM)
SMEM_SPEC = pl.BlockSpec(memory_space=pltpu.MemorySpace.SMEM)

BN_EPS = 1e-5          # nn.BatchNorm1d default
NORM_EPS_SQ = 1e-24    # F.normalize eps=1e-12 applied to the squared norm


# ---------------------------------------------------------------------------
# Fused kernel: per-view [backbone stand-in -> projection -> prediction] -> loss
# ---------------------------------------------------------------------------
def simsiam_fused_kernel(
    x1_ref, x2_ref,                  # (B*HW, C) f32 — unpadded inputs, one per view
    wb_ref, bb_ref,                  # backbone 1x1 conv: (C, F) f32, (1, F) f32
    w1_ref, g1_ref, be1_ref,         # proj layer 1 (Linear no-bias -> BN -> ReLU)
    w2_ref, g2_ref, be2_ref,         # proj layer 2
    w3_ref, g3_ref, be3_ref,         # proj layer 3 (no ReLU)
    w4_ref, g4_ref, be4_ref,         # pred layer 1
    w5_ref, b5_ref,                  # pred layer 2 (Linear with bias)
    loss_ref,                        # (1, 1) f32 in SMEM
    *, batch, hw, in_chans,
):
    f32 = jnp.float32
    feat = wb_ref.shape[1]

    def mm(a, w_ref):
        # bf16 MXU operands, f32 accumulation.
        return jnp.dot(a.astype(jnp.bfloat16), w_ref[...], preferred_element_type=f32)

    def linear_bn(h, w_ref, g_ref, be_ref, relu):
        # Linear (bias dropped: cancelled by BN mean subtraction) -> BatchNorm1d
        # (per-view batch stats, biased variance, single-pass) -> optional ReLU.
        y = mm(h, w_ref)
        mean = jnp.mean(y, axis=0, keepdims=True)
        var = jnp.maximum(jnp.mean(y * y, axis=0, keepdims=True) - mean * mean, 0.0)
        out = (y - mean) * jax.lax.rsqrt(var + BN_EPS) * g_ref[...] + be_ref[...]
        return jnp.maximum(out, 0.0) if relu else out

    def encode(x_ref):
        # --- stand-in backbone: 1x1 conv (VPU broadcast-FMA over C=3 channels,
        # no padded input / no degenerate K=3 MXU pass) + ReLU + global avg pool ---
        xv = x_ref[...].astype(f32)                                    # (B*HW, C)
        acc = xv[:, 0:1] * wb_ref[0:1, :]
        for c in range(1, in_chans):
            acc = acc + xv[:, c:c + 1] * wb_ref[c:c + 1, :]
        h = jnp.maximum(acc + bb_ref[...], 0.0)                        # (B*HW, F)
        feats = jnp.mean(h.reshape(batch, hw, feat), axis=1)           # (B, F)

        # --- projection MLP (BN stats over this view's B rows, as in PyTorch) ---
        h1 = linear_bn(feats, w1_ref, g1_ref, be1_ref, relu=True)
        h2 = linear_bn(h1, w2_ref, g2_ref, be2_ref, relu=True)
        z = linear_bn(h2, w3_ref, g3_ref, be3_ref, relu=False)         # (B, Pz)

        # --- prediction MLP ---
        h3 = linear_bn(z, w4_ref, g4_ref, be4_ref, relu=True)
        p = mm(h3, w5_ref) + b5_ref[...]                               # (B, Pp)
        return z, p

    z1, p1 = encode(x1_ref)
    z2, p2 = encode(x2_ref)

    # --- negative-cosine loss: D(p1, z2)/2 + D(p2, z1)/2 ---
    def neg_cos(p, z):
        p_hat = p * jax.lax.rsqrt(
            jnp.maximum(jnp.sum(p * p, axis=1, keepdims=True), NORM_EPS_SQ))
        z_hat = z * jax.lax.rsqrt(
            jnp.maximum(jnp.sum(z * z, axis=1, keepdims=True), NORM_EPS_SQ))
        return -jnp.sum(p_hat * z_hat) * (1.0 / p.shape[0])

    loss_ref[0, 0] = 0.5 * neg_cos(p1, z2) + 0.5 * neg_cos(p2, z1)


# ---------------------------------------------------------------------------
# Wrapper: layout plumbing + one pallas_call for the whole forward (jitted)
# ---------------------------------------------------------------------------
def simsiam_forward(x1, x2, params):
    B, C, H, W = x1.shape
    HW = H * W

    # NCHW -> (B*HW, C): channel/feature dim on the lane axis, NOT padded in HBM.
    def to_rows(x):
        return jnp.transpose(x, (0, 2, 3, 1)).reshape(B * HW, C)

    x1r = to_rows(x1)
    x2r = to_rows(x2)

    wb, bb = params["backbone"]
    w1, g1, be1 = params["proj1"]
    w2, g2, be2 = params["proj2"]
    w3, g3, be3 = params["proj3"]
    w4, g4, be4 = params["pred1"]
    w5, b5 = params["pred2"]

    bf = lambda a: a.astype(jnp.bfloat16)
    args = (
        x1r, x2r,
        wb, bb,
        bf(w1), g1, be1,
        bf(w2), g2, be2,
        bf(w3), g3, be3,
        bf(w4), g4, be4,
        bf(w5), b5,
    )

    # Advisory cost estimate for XLA's scheduler around the custom call.
    F_ = wb.shape[1]
    PZ = w3.shape[1]
    PH = w4.shape[1]
    PO = w5.shape[1]
    mlp_flops_per_view = 2 * B * (F_ * w1.shape[1] + w1.shape[1] * w2.shape[1]
                                  + w2.shape[1] * PZ + PZ * PH + PH * PO)
    flops = int(2 * (2 * B * HW * C * F_ + mlp_flops_per_view))
    transcendentals = int(2 * (w1.shape[1] + w2.shape[1] + PZ + PH + 2 * B))
    bytes_accessed = int(sum(int(a.size) * a.dtype.itemsize for a in args) + 4)

    kernel = functools.partial(simsiam_fused_kernel, batch=B, hw=HW, in_chans=C)

    loss = pl.pallas_call(
        kernel,
        out_shape=jax.ShapeDtypeStruct((1, 1), jnp.float32),
        in_specs=[VMEM_SPEC] * len(args),
        out_specs=SMEM_SPEC,
        compiler_params=pltpu.CompilerParams(vmem_limit_bytes=32 * 1024 * 1024),
        cost_estimate=pl.CostEstimate(flops=flops,
                                      transcendentals=transcendentals,
                                      bytes_accessed=bytes_accessed),
    )(*args)
    return loss[0, 0]


simsiam_loss = jax.jit(simsiam_forward)


# ---------------------------------------------------------------------------
# Parameter construction (deterministic; shapes mirror SimSiam.__init__ but scaled
# down to lane-dense 128-wide features)
# ---------------------------------------------------------------------------
def make_params(key, in_chans, feat_dim, proj_out, pred_hid, pred_out):
    def dense(k, din, dout, bias=True):
        w = jax.random.normal(k, (din, dout), jnp.float32) * (1.0 / jnp.sqrt(din))
        if bias:
            return (w, jnp.zeros((1, dout), jnp.float32))
        return (w,)

    def bn(dout):
        return jnp.ones((1, dout), jnp.float32), jnp.zeros((1, dout), jnp.float32)

    keys = jax.random.split(key, 6)
    params = {}

    wb = jax.random.normal(keys[0], (in_chans, feat_dim), jnp.float32) * (1.0 / jnp.sqrt(in_chans))
    params["backbone"] = (wb, jnp.zeros((1, feat_dim), jnp.float32))

    # projection: Linear-BN-ReLU, Linear-BN-ReLU, Linear-BN  (Linear biases dropped:
    # mathematically cancelled by the following BatchNorm in training mode)
    params["proj1"] = dense(keys[1], feat_dim, feat_dim, bias=False) + bn(feat_dim)
    params["proj2"] = dense(keys[2], feat_dim, feat_dim, bias=False) + bn(feat_dim)
    params["proj3"] = dense(keys[3], feat_dim, proj_out, bias=False) + bn(proj_out)
    # prediction: Linear-BN-ReLU, Linear(+bias)
    params["pred1"] = dense(keys[4], proj_out, pred_hid, bias=False) + bn(pred_hid)
    params["pred2"] = dense(keys[5], pred_hid, pred_out, bias=True)
    return params


# ---------------------------------------------------------------------------
if __name__ == "__main__":
    key = jax.random.PRNGKey(0)
    kx1, kx2, kp = jax.random.split(key, 3)

    # Small but lane/sublane-friendly shapes: batch=4 per view, in_chans=3, 8x8 spatial,
    # all MLP feature dims = 128 (stand-ins for 2048 / 2048 / 512 / 2048 in real SimSiam).
    B, C, H, W = 4, 3, 8, 8
    FEAT, PROJ_OUT, PRED_HID, PRED_OUT = 128, 128, 128, 128

    x1 = jax.random.normal(kx1, (B, C, H, W), jnp.float32)
    x2 = jax.random.normal(kx2, (B, C, H, W), jnp.float32)
    params = make_params(kp, C, FEAT, PROJ_OUT, PRED_HID, PRED_OUT)

    loss = simsiam_loss(x1, x2, params)
    loss = jax.block_until_ready(loss)
    assert loss.shape == () and bool(jnp.isfinite(loss))
    print("KERNEL_OK")
</pallas_src>

<mosaic_0001>
module attributes {stable_mosaic.version = 11 : i64} {
  func.func @simsiam_fused_kernel(%arg0: memref<256x3xf32, #tpu.memory_space<vmem>>, %arg1: memref<256x3xf32, #tpu.memory_space<vmem>>, %arg2: memref<3x128xf32, #tpu.memory_space<vmem>>, %arg3: memref<1x128xf32, #tpu.memory_space<vmem>>, %arg4: memref<128x128xbf16, #tpu.memory_space<vmem>>, %arg5: memref<1x128xf32, #tpu.memory_space<vmem>>, %arg6: memref<1x128xf32, #tpu.memory_space<vmem>>, %arg7: memref<128x128xbf16, #tpu.memory_space<vmem>>, %arg8: memref<1x128xf32, #tpu.memory_space<vmem>>, %arg9: memref<1x128xf32, #tpu.memory_space<vmem>>, %arg10: memref<128x128xbf16, #tpu.memory_space<vmem>>, %arg11: memref<1x128xf32, #tpu.memory_space<vmem>>, %arg12: memref<1x128xf32, #tpu.memory_space<vmem>>, %arg13: memref<128x128xbf16, #tpu.memory_space<vmem>>, %arg14: memref<1x128xf32, #tpu.memory_space<vmem>>, %arg15: memref<1x128xf32, #tpu.memory_space<vmem>>, %arg16: memref<128x128xbf16, #tpu.memory_space<vmem>>, %arg17: memref<1x128xf32, #tpu.memory_space<vmem>>, %arg18: memref<1x1xf32, #tpu.memory_space<smem>>) attributes {dimension_semantics = [], scalar_prefetch = 0 : i64, scratch_operands = 0 : i64, tpu.core_type = #tpu.core_type<tc>} {
    %c0 = arith.constant 0 : index
    %c0_0 = arith.constant 0 : index
    %0 = vector.load %arg0[%c0, %c0_0] : memref<256x3xf32, #tpu.memory_space<vmem>>, vector<256x3xf32>
    %1 = vector.extract_strided_slice %0 {offsets = [0, 0], sizes = [256, 1], strides = [1, 1]} : vector<256x3xf32> to vector<256x1xf32>
    %c0_1 = arith.constant 0 : index
    %c0_2 = arith.constant 0 : index
    %2 = vector.load %arg2[%c0_1, %c0_2] : memref<3x128xf32, #tpu.memory_space<vmem>>, vector<1x128xf32>
    %3 = vector.broadcast %1 : vector<256x1xf32> to vector<256x128xf32>
    %4 = vector.broadcast %2 : vector<1x128xf32> to vector<256x128xf32>
    %5 = arith.mulf %3, %4 : vector<256x128xf32>
    %6 = vector.extract_strided_slice %0 {offsets = [0, 1], sizes = [256, 1], strides = [1, 1]} : vector<256x3xf32> to vector<256x1xf32>
    %c1 = arith.constant 1 : index
    %c0_3 = arith.constant 0 : index
    %7 = vector.load %arg2[%c1, %c0_3] : memref<3x128xf32, #tpu.memory_space<vmem>>, vector<1x128xf32>
    %8 = vector.broadcast %6 : vector<256x1xf32> to vector<256x128xf32>
    %9 = vector.broadcast %7 : vector<1x128xf32> to vector<256x128xf32>
    %10 = arith.mulf %8, %9 : vector<256x128xf32>
    %11 = arith.addf %5, %10 : vector<256x128xf32>
    %12 = vector.extract_strided_slice %0 {offsets = [0, 2], sizes = [256, 1], strides = [1, 1]} : vector<256x3xf32> to vector<256x1xf32>
    %c2 = arith.constant 2 : index
    %c0_4 = arith.constant 0 : index
    %13 = vector.load %arg2[%c2, %c0_4] : memref<3x128xf32, #tpu.memory_space<vmem>>, vector<1x128xf32>
    %14 = vector.broadcast %12 : vector<256x1xf32> to vector<256x128xf32>
    %15 = vector.broadcast %13 : vector<1x128xf32> to vector<256x128xf32>
    %16 = arith.mulf %14, %15 : vector<256x128xf32>
    %17 = arith.addf %11, %16 : vector<256x128xf32>
    %c0_5 = arith.constant 0 : index
    %c0_6 = arith.constant 0 : index
    %18 = vector.load %arg3[%c0_5, %c0_6] : memref<1x128xf32, #tpu.memory_space<vmem>>, vector<1x128xf32>
    %19 = vector.broadcast %18 : vector<1x128xf32> to vector<256x128xf32>
    %20 = arith.addf %17, %19 : vector<256x128xf32>
    %cst = arith.constant 0.000000e+00 : f32
    %21 = vector.broadcast %cst : f32 to vector<256x128xf32>
    %22 = arith.maximumf %20, %21 : vector<256x128xf32>
    %23 = vector.shape_cast %22 : vector<256x128xf32> to vector<4x64x128xf32>
    %cst_7 = arith.constant dense<0.000000e+00> : vector<4x128xf32>
    %24 = vector.multi_reduction <add>, %23, %cst_7 [1] : vector<4x64x128xf32> to vector<4x128xf32>
    %cst_8 = arith.constant 6.400000e+01 : f32
    %25 = vector.broadcast %cst_8 : f32 to vector<4x128xf32>
    %26 = arith.divf %24, %25 : vector<4x128xf32>
    %27 = arith.truncf %26 : vector<4x128xf32> to vector<4x128xbf16>
    %c0_9 = arith.constant 0 : index
    %c0_10 = arith.constant 0 : index
    %28 = vector.load %arg4[%c0_9, %c0_10] : memref<128x128xbf16, #tpu.memory_space<vmem>>, vector<128x128xbf16>
    %cst_11 = arith.constant dense<0.000000e+00> : vector<4x128xf32>
    %29 = tpu.matmul %27, %28, %cst_11 {dimension_numbers = #tpu.dot_dimension_numbers<[1], [0], [0], [1], [0, 0, 1, 1], [], []>} : vector<4x128xbf16>, vector<128x128xbf16>, vector<4x128xf32> -> vector<4x128xf32>
    %cst_12 = arith.constant dense<0.000000e+00> : vector<128xf32>
    %30 = vector.multi_reduction <add>, %29, %cst_12 [0] : vector<4x128xf32> to vector<128xf32>
    %31 = vector.shape_cast %30 : vector<128xf32> to vector<1x128xf32>
    %cst_13 = arith.constant 4.000000e+00 : f32
    %32 = vector.broadcast %cst_13 : f32 to vector<1x128xf32>
    %33 = arith.divf %31, %32 : vector<1x128xf32>
    %34 = arith.mulf %29, %29 : vector<4x128xf32>
    %cst_14 = arith.constant dense<0.000000e+00> : vector<128xf32>
    %35 = vector.multi_reduction <add>, %34, %cst_14 [0] : vector<4x128xf32> to vector<128xf32>
    %36 = vector.shape_cast %35 : vector<128xf32> to vector<1x128xf32>
    %cst_15 = arith.constant 4.000000e+00 : f32
    %37 = vector.broadcast %cst_15 : f32 to vector<1x128xf32>
    %38 = arith.divf %36, %37 : vector<1x128xf32>
    %39 = arith.mulf %33, %33 : vector<1x128xf32>
    %40 = arith.subf %38, %39 : vector<1x128xf32>
    %cst_16 = arith.constant 0.000000e+00 : f32
    %41 = vector.broadcast %cst_16 : f32 to vector<1x128xf32>
    %42 = arith.maximumf %40, %41 : vector<1x128xf32>
    %43 = vector.broadcast %33 : vector<1x128xf32> to vector<4x128xf32>
    %44 = arith.subf %29, %43 : vector<4x128xf32>
    %cst_17 = arith.constant 9.99999974E-6 : f32
    %45 = vector.broadcast %cst_17 : f32 to vector<1x128xf32>
    %46 = arith.addf %42, %45 : vector<1x128xf32>
    %47 = math.rsqrt %46 : vector<1x128xf32>
    %48 = vector.broadcast %47 : vector<1x128xf32> to vector<4x128xf32>
    %49 = arith.mulf %44, %48 : vector<4x128xf32>
    %c0_18 = arith.constant 0 : index
    %c0_19 = arith.constant 0 : index
    %50 = vector.load %arg5[%c0_18, %c0_19] : memref<1x128xf32, #tpu.memory_space<vmem>>, vector<1x128xf32>
    %51 = vector.broadcast %50 : vector<1x128xf32> to vector<4x128xf32>
    %52 = arith.mulf %49, %51 : vector<4x128xf32>
    %c0_20 = arith.constant 0 : index
    %c0_21 = arith.constant 0 : index
    %53 = vector.load %arg6[%c0_20, %c0_21] : memref<1x128xf32, #tpu.memory_space<vmem>>, vector<1x128xf32>
    %54 = vector.broadcast %53 : vector<1x128xf32> to vector<4x128xf32>
    %55 = arith.addf %52, %54 : vector<4x128xf32>
    %cst_22 = arith.constant 0.000000e+00 : f32
    %56 = vector.broadcast %cst_22 : f32 to vector<4x128xf32>
    %57 = arith.maximumf %55, %56 : vector<4x128xf32>
    %58 = arith.truncf %57 : vector<4x128xf32> to vector<4x128xbf16>
    %c0_23 = arith.constant 0 : index
    %c0_24 = arith.constant 0 : index
    %59 = vector.load %arg7[%c0_23, %c0_24] : memref<128x128xbf16, #tpu.memory_space<vmem>>, vector<128x128xbf16>
    %cst_25 = arith.constant dense<0.000000e+00> : vector<4x128xf32>
    %60 = tpu.matmul %58, %59, %cst_25 {dimension_numbers = #tpu.dot_dimension_numbers<[1], [0], [0], [1], [0, 0, 1, 1], [], []>} : vector<4x128xbf16>, vector<128x128xbf16>, vector<4x128xf32> -> vector<4x128xf32>
    %cst_26 = arith.constant dense<0.000000e+00> : vector<128xf32>
    %61 = vector.multi_reduction <add>, %60, %cst_26 [0] : vector<4x128xf32> to vector<128xf32>
    %62 = vector.shape_cast %61 : vector<128xf32> to vector<1x128xf32>
    %cst_27 = arith.constant 4.000000e+00 : f32
    %63 = vector.broadcast %cst_27 : f32 to vector<1x128xf32>
    %64 = arith.divf %62, %63 : vector<1x128xf32>
    %65 = arith.mulf %60, %60 : vector<4x128xf32>
    %cst_28 = arith.constant dense<0.000000e+00> : vector<128xf32>
    %66 = vector.multi_reduction <add>, %65, %cst_28 [0] : vector<4x128xf32> to vector<128xf32>
    %67 = vector.shape_cast %66 : vector<128xf32> to vector<1x128xf32>
    %cst_29 = arith.constant 4.000000e+00 : f32
    %68 = vector.broadcast %cst_29 : f32 to vector<1x128xf32>
    %69 = arith.divf %67, %68 : vector<1x128xf32>
    %70 = arith.mulf %64, %64 : vector<1x128xf32>
    %71 = arith.subf %69, %70 : vector<1x128xf32>
    %cst_30 = arith.constant 0.000000e+00 : f32
    %72 = vector.broadcast %cst_30 : f32 to vector<1x128xf32>
    %73 = arith.maximumf %71, %72 : vector<1x128xf32>
    %74 = vector.broadcast %64 : vector<1x128xf32> to vector<4x128xf32>
    %75 = arith.subf %60, %74 : vector<4x128xf32>
    %cst_31 = arith.constant 9.99999974E-6 : f32
    %76 = vector.broadcast %cst_31 : f32 to vector<1x128xf32>
    %77 = arith.addf %73, %76 : vector<1x128xf32>
    %78 = math.rsqrt %77 : vector<1x128xf32>
    %79 = vector.broadcast %78 : vector<1x128xf32> to vector<4x128xf32>
    %80 = arith.mulf %75, %79 : vector<4x128xf32>
    %c0_32 = arith.constant 0 : index
    %c0_33 = arith.constant 0 : index
    %81 = vector.load %arg8[%c0_32, %c0_33] : memref<1x128xf32, #tpu.memory_space<vmem>>, vector<1x128xf32>
    %82 = vector.broadcast %81 : vector<1x128xf32> to vector<4x128xf32>
    %83 = arith.mulf %80, %82 : vector<4x128xf32>
    %c0_34 = arith.constant 0 : index
    %c0_35 = arith.constant 0 : index
    %84 = vector.load %arg9[%c0_34, %c0_35] : memref<1x128xf32, #tpu.memory_space<vmem>>, vector<1x128xf32>
    %85 = vector.broadcast %84 : vector<1x128xf32> to vector<4x128xf32>
    %86 = arith.addf %83, %85 : vector<4x128xf32>
    %cst_36 = arith.constant 0.000000e+00 : f32
    %87 = vector.broadcast %cst_36 : f32 to vector<4x128xf32>
    %88 = arith.maximumf %86, %87 : vector<4x128xf32>
    %89 = arith.truncf %88 : vector<4x128xf32> to vector<4x128xbf16>
    %c0_37 = arith.constant 0 : index
    %c0_38 = arith.constant 0 : index
    %90 = vector.load %arg10[%c0_37, %c0_38] : memref<128x128xbf16, #tpu.memory_space<vmem>>, vector<128x128xbf16>
    %cst_39 = arith.constant dense<0.000000e+00> : vector<4x128xf32>
    %91 = tpu.matmul %89, %90, %cst_39 {dimension_numbers = #tpu.dot_dimension_numbers<[1], [0], [0], [1], [0, 0, 1, 1], [], []>} : vector<4x128xbf16>, vector<128x128xbf16>, vector<4x128xf32> -> vector<4x128xf32>
    %cst_40 = arith.constant dense<0.000000e+00> : vector<128xf32>
    %92 = vector.multi_reduction <add>, %91, %cst_40 [0] : vector<4x128xf32> to vector<128xf32>
    %93 = vector.shape_cast %92 : vector<128xf32> to vector<1x128xf32>
    %cst_41 = arith.constant 4.000000e+00 : f32
    %94 = vector.broadcast %cst_41 : f32 to vector<1x128xf32>
    %95 = arith.divf %93, %94 : vector<1x128xf32>
    %96 = arith.mulf %91, %91 : vector<4x128xf32>
    %cst_42 = arith.constant dense<0.000000e+00> : vector<128xf32>
    %97 = vector.multi_reduction <add>, %96, %cst_42 [0] : vector<4x128xf32> to vector<128xf32>
    %98 = vector.shape_cast %97 : vector<128xf32> to vector<1x128xf32>
    %cst_43 = arith.constant 4.000000e+00 : f32
    %99 = vector.broadcast %cst_43 : f32 to vector<1x128xf32>
    %100 = arith.divf %98, %99 : vector<1x128xf32>
    %101 = arith.mulf %95, %95 : vector<1x128xf32>
    %102 = arith.subf %100, %101 : vector<1x128xf32>
    %cst_44 = arith.constant 0.000000e+00 : f32
    %103 = vector.broadcast %cst_44 : f32 to vector<1x128xf32>
    %104 = arith.maximumf %102, %103 : vector<1x128xf32>
    %105 = vector.broadcast %95 : vector<1x128xf32> to vector<4x128xf32>
    %106 = arith.subf %91, %105 : vector<4x128xf32>
    %cst_45 = arith.constant 9.99999974E-6 : f32
    %107 = vector.broadcast %cst_45 : f32 to vector<1x128xf32>
    %108 = arith.addf %104, %107 : vector<1x128xf32>
    %109 = math.rsqrt %108 : vector<1x128xf32>
    %110 = vector.broadcast %109 : vector<1x128xf32> to vector<4x128xf32>
    %111 = arith.mulf %106, %110 : vector<4x128xf32>
    %c0_46 = arith.constant 0 : index
    %c0_47 = arith.constant 0 : index
    %112 = vector.load %arg11[%c0_46, %c0_47] : memref<1x128xf32, #tpu.memory_space<vmem>>, vector<1x128xf32>
    %113 = vector.broadcast %112 : vector<1x128xf32> to vector<4x128xf32>
    %114 = arith.mulf %111, %113 : vector<4x128xf32>
    %c0_48 = arith.constant 0 : index
    %c0_49 = arith.constant 0 : index
    %115 = vector.load %arg12[%c0_48, %c0_49] : memref<1x128xf32, #tpu.memory_space<vmem>>, vector<1x128xf32>
    %116 = vector.broadcast %115 : vector<1x128xf32> to vector<4x128xf32>
    %117 = arith.addf %114, %116 : vector<4x128xf32>
    %118 = arith.truncf %117 : vector<4x128xf32> to vector<4x128xbf16>
    %c0_50 = arith.constant 0 : index
    %c0_51 = arith.constant 0 : index
    %119 = vector.load %arg13[%c0_50, %c0_51] : memref<128x128xbf16, #tpu.memory_space<vmem>>, vector<128x128xbf16>
    %cst_52 = arith.constant dense<0.000000e+00> : vector<4x128xf32>
    %120 = tpu.matmul %118, %119, %cst_52 {dimension_numbers = #tpu.dot_dimension_numbers<[1], [0], [0], [1], [0, 0, 1, 1], [], []>} : vector<4x128xbf16>, vector<128x128xbf16>, vector<4x128xf32> -> vector<4x128xf32>
    %cst_53 = arith.constant dense<0.000000e+00> : vector<128xf32>
    %121 = vector.multi_reduction <add>, %120, %cst_53 [0] : vector<4x128xf32> to vector<128xf32>
    %122 = vector.shape_cast %121 : vector<128xf32> to vector<1x128xf32>
    %cst_54 = arith.constant 4.000000e+00 : f32
    %123 = vector.broadcast %cst_54 : f32 to vector<1x128xf32>
    %124 = arith.divf %122, %123 : vector<1x128xf32>
    %125 = arith.mulf %120, %120 : vector<4x128xf32>
    %cst_55 = arith.constant dense<0.000000e+00> : vector<128xf32>
    %126 = vector.multi_reduction <add>, %125, %cst_55 [0] : vector<4x128xf32> to vector<128xf32>
    %127 = vector.shape_cast %126 : vector<128xf32> to vector<1x128xf32>
    %cst_56 = arith.constant 4.000000e+00 : f32
    %128 = vector.broadcast %cst_56 : f32 to vector<1x128xf32>
    %129 = arith.divf %127, %128 : vector<1x128xf32>
    %130 = arith.mulf %124, %124 : vector<1x128xf32>
    %131 = arith.subf %129, %130 : vector<1x128xf32>
    %cst_57 = arith.constant 0.000000e+00 : f32
    %132 = vector.broadcast %cst_57 : f32 to vector<1x128xf32>
    %133 = arith.maximumf %131, %132 : vector<1x128xf32>
    %134 = vector.broadcast %124 : vector<1x128xf32> to vector<4x128xf32>
    %135 = arith.subf %120, %134 : vector<4x128xf32>
    %cst_58 = arith.constant 9.99999974E-6 : f32
    %136 = vector.broadcast %cst_58 : f32 to vector<1x128xf32>
    %137 = arith.addf %133, %136 : vector<1x128xf32>
    %138 = math.rsqrt %137 : vector<1x128xf32>
    %139 = vector.broadcast %138 : vector<1x128xf32> to vector<4x128xf32>
    %140 = arith.mulf %135, %139 : vector<4x128xf32>
    %c0_59 = arith.constant 0 : index
    %c0_60 = arith.constant 0 : index
    %141 = vector.load %arg14[%c0_59, %c0_60] : memref<1x128xf32, #tpu.memory_space<vmem>>, vector<1x128xf32>
    %142 = vector.broadcast %141 : vector<1x128xf32> to vector<4x128xf32>
    %143 = arith.mulf %140, %142 : vector<4x128xf32>
    %c0_61 = arith.constant 0 : index
    %c0_62 = arith.constant 0 : index
    %144 = vector.load %arg15[%c0_61, %c0_62] : memref<1x128xf32, #tpu.memory_space<vmem>>, vector<1x128xf32>
    %145 = vector.broadcast %144 : vector<1x128xf32> to vector<4x128xf32>
    %146 = arith.addf %143, %145 : vector<4x128xf32>
    %cst_63 = arith.constant 0.000000e+00 : f32
    %147 = vector.broadcast %cst_63 : f32 to vector<4x128xf32>
    %148 = arith.maximumf %146, %147 : vector<4x128xf32>
    %149 = arith.truncf %148 : vector<4x128xf32> to vector<4x128xbf16>
    %c0_64 = arith.constant 0 : index
    %c0_65 = arith.constant 0 : index
    %150 = vector.load %arg16[%c0_64, %c0_65] : memref<128x128xbf16, #tpu.memory_space<vmem>>, vector<128x128xbf16>
    %cst_66 = arith.constant dense<0.000000e+00> : vector<4x128xf32>
    %151 = tpu.matmul %149, %150, %cst_66 {dimension_numbers = #tpu.dot_dimension_numbers<[1], [0], [0], [1], [0, 0, 1, 1], [], []>} : vector<4x128xbf16>, vector<128x128xbf16>, vector<4x128xf32> -> vector<4x128xf32>
    %c0_67 = arith.constant 0 : index
    %c0_68 = arith.constant 0 : index
    %152 = vector.load %arg17[%c0_67, %c0_68] : memref<1x128xf32, #tpu.memory_space<vmem>>, vector<1x128xf32>
    %153 = vector.broadcast %152 : vector<1x128xf32> to vector<4x128xf32>
    %154 = arith.addf %151, %153 : vector<4x128xf32>
    %c0_69 = arith.constant 0 : index
    %c0_70 = arith.constant 0 : index
    %155 = vector.load %arg1[%c0_69, %c0_70] : memref<256x3xf32, #tpu.memory_space<vmem>>, vector<256x3xf32>
    %156 = vector.extract_strided_slice %155 {offsets = [0, 0], sizes = [256, 1], strides = [1, 1]} : vector<256x3xf32> to vector<256x1xf32>
    %c0_71 = arith.constant 0 : index
    %c0_72 = arith.constant 0 : index
    %157 = vector.load %arg2[%c0_71, %c0_72] : memref<3x128xf32, #tpu.memory_space<vmem>>, vector<1x128xf32>
    %158 = vector.broadcast %156 : vector<256x1xf32> to vector<256x128xf32>
    %159 = vector.broadcast %157 : vector<1x128xf32> to vector<256x128xf32>
    %160 = arith.mulf %158, %159 : vector<256x128xf32>
    %161 = vector.extract_strided_slice %155 {offsets = [0, 1], sizes = [256, 1], strides = [1, 1]} : vector<256x3xf32> to vector<256x1xf32>
    %c1_73 = arith.constant 1 : index
    %c0_74 = arith.constant 0 : index
    %162 = vector.load %arg2[%c1_73, %c0_74] : memref<3x128xf32, #tpu.memory_space<vmem>>, vector<1x128xf32>
    %163 = vector.broadcast %161 : vector<256x1xf32> to vector<256x128xf32>
    %164 = vector.broadcast %162 : vector<1x128xf32> to vector<256x128xf32>
    %165 = arith.mulf %163, %164 : vector<256x128xf32>
    %166 = arith.addf %160, %165 : vector<256x128xf32>
    %167 = vector.extract_strided_slice %155 {offsets = [0, 2], sizes = [256, 1], strides = [1, 1]} : vector<256x3xf32> to vector<256x1xf32>
    %c2_75 = arith.constant 2 : index
    %c0_76 = arith.constant 0 : index
    %168 = vector.load %arg2[%c2_75, %c0_76] : memref<3x128xf32, #tpu.memory_space<vmem>>, vector<1x128xf32>
    %169 = vector.broadcast %167 : vector<256x1xf32> to vector<256x128xf32>
    %170 = vector.broadcast %168 : vector<1x128xf32> to vector<256x128xf32>
    %171 = arith.mulf %169, %170 : vector<256x128xf32>
    %172 = arith.addf %166, %171 : vector<256x128xf32>
    %c0_77 = arith.constant 0 : index
    %c0_78 = arith.constant 0 : index
    %173 = vector.load %arg3[%c0_77, %c0_78] : memref<1x128xf32, #tpu.memory_space<vmem>>, vector<1x128xf32>
    %174 = vector.broadcast %173 : vector<1x128xf32> to vector<256x128xf32>
    %175 = arith.addf %172, %174 : vector<256x128xf32>
    %cst_79 = arith.constant 0.000000e+00 : f32
    %176 = vector.broadcast %cst_79 : f32 to vector<256x128xf32>
    %177 = arith.maximumf %175, %176 : vector<256x128xf32>
    %178 = vector.shape_cast %177 : vector<256x128xf32> to vector<4x64x128xf32>
    %cst_80 = arith.constant dense<0.000000e+00> : vector<4x128xf32>
    %179 = vector.multi_reduction <add>, %178, %cst_80 [1] : vector<4x64x128xf32> to vector<4x128xf32>
    %cst_81 = arith.constant 6.400000e+01 : f32
    %180 = vector.broadcast %cst_81 : f32 to vector<4x128xf32>
    %181 = arith.divf %179, %180 : vector<4x128xf32>
    %182 = arith.truncf %181 : vector<4x128xf32> to vector<4x128xbf16>
    %c0_82 = arith.constant 0 : index
    %c0_83 = arith.constant 0 : index
    %183 = vector.load %arg4[%c0_82, %c0_83] : memref<128x128xbf16, #tpu.memory_space<vmem>>, vector<128x128xbf16>
    %cst_84 = arith.constant dense<0.000000e+00> : vector<4x128xf32>
    %184 = tpu.matmul %182, %183, %cst_84 {dimension_numbers = #tpu.dot_dimension_numbers<[1], [0], [0], [1], [0, 0, 1, 1], [], []>} : vector<4x128xbf16>, vector<128x128xbf16>, vector<4x128xf32> -> vector<4x128xf32>
    %cst_85 = arith.constant dense<0.000000e+00> : vector<128xf32>
    %185 = vector.multi_reduction <add>, %184, %cst_85 [0] : vector<4x128xf32> to vector<128xf32>
    %186 = vector.shape_cast %185 : vector<128xf32> to vector<1x128xf32>
    %cst_86 = arith.constant 4.000000e+00 : f32
    %187 = vector.broadcast %cst_86 : f32 to vector<1x128xf32>
    %188 = arith.divf %186, %187 : vector<1x128xf32>
    %189 = arith.mulf %184, %184 : vector<4x128xf32>
    %cst_87 = arith.constant dense<0.000000e+00> : vector<128xf32>
    %190 = vector.multi_reduction <add>, %189, %cst_87 [0] : vector<4x128xf32> to vector<128xf32>
    %191 = vector.shape_cast %190 : vector<128xf32> to vector<1x128xf32>
    %cst_88 = arith.constant 4.000000e+00 : f32
    %192 = vector.broadcast %cst_88 : f32 to vector<1x128xf32>
    %193 = arith.divf %191, %192 : vector<1x128xf32>
    %194 = arith.mulf %188, %188 : vector<1x128xf32>
    %195 = arith.subf %193, %194 : vector<1x128xf32>
    %cst_89 = arith.constant 0.000000e+00 : f32
    %196 = vector.broadcast %cst_89 : f32 to vector<1x128xf32>
    %197 = arith.maximumf %195, %196 : vector<1x128xf32>
    %198 = vector.broadcast %188 : vector<1x128xf32> to vector<4x128xf32>
    %199 = arith.subf %184, %198 : vector<4x128xf32>
    %cst_90 = arith.constant 9.99999974E-6 : f32
    %200 = vector.broadcast %cst_90 : f32 to vector<1x128xf32>
    %201 = arith.addf %197, %200 : vector<1x128xf32>
    %202 = math.rsqrt %201 : vector<1x128xf32>
    %203 = vector.broadcast %202 : vector<1x128xf32> to vector<4x128xf32>
    %204 = arith.mulf %199, %203 : vector<4x128xf32>
    %c0_91 = arith.constant 0 : index
    %c0_92 = arith.constant 0 : index
    %205 = vector.load %arg5[%c0_91, %c0_92] : memref<1x128xf32, #tpu.memory_space<vmem>>, vector<1x128xf32>
    %206 = vector.broadcast %205 : vector<1x128xf32> to vector<4x128xf32>
    %207 = arith.mulf %204, %206 : vector<4x128xf32>
    %c0_93 = arith.constant 0 : index
    %c0_94 = arith.constant 0 : index
    %208 = vector.load %arg6[%c0_93, %c0_94] : memref<1x128xf32, #tpu.memory_space<vmem>>, vector<1x128xf32>
    %209 = vector.broadcast %208 : vector<1x128xf32> to vector<4x128xf32>
    %210 = arith.addf %207, %209 : vector<4x128xf32>
    %cst_95 = arith.constant 0.000000e+00 : f32
    %211 = vector.broadcast %cst_95 : f32 to vector<4x128xf32>
    %212 = arith.maximumf %210, %211 : vector<4x128xf32>
    %213 = arith.truncf %212 : vector<4x128xf32> to vector<4x128xbf16>
    %c0_96 = arith.constant 0 : index
    %c0_97 = arith.constant 0 : index
    %214 = vector.load %arg7[%c0_96, %c0_97] : memref<128x128xbf16, #tpu.memory_space<vmem>>, vector<128x128xbf16>
    %cst_98 = arith.constant dense<0.000000e+00> : vector<4x128xf32>
    %215 = tpu.matmul %213, %214, %cst_98 {dimension_numbers = #tpu.dot_dimension_numbers<[1], [0], [0], [1], [0, 0, 1, 1], [], []>} : vector<4x128xbf16>, vector<128x128xbf16>, vector<4x128xf32> -> vector<4x128xf32>
    %cst_99 = arith.constant dense<0.000000e+00> : vector<128xf32>
    %216 = vector.multi_reduction <add>, %215, %cst_99 [0] : vector<4x128xf32> to vector<128xf32>
    %217 = vector.shape_cast %216 : vector<128xf32> to vector<1x128xf32>
    %cst_100 = arith.constant 4.000000e+00 : f32
    %218 = vector.broadcast %cst_100 : f32 to vector<1x128xf32>
    %219 = arith.divf %217, %218 : vector<1x128xf32>
    %220 = arith.mulf %215, %215 : vector<4x128xf32>
    %cst_101 = arith.constant dense<0.000000e+00> : vector<128xf32>
    %221 = vector.multi_reduction <add>, %220, %cst_101 [0] : vector<4x128xf32> to vector<128xf32>
    %222 = vector.shape_cast %221 : vector<128xf32> to vector<1x128xf32>
    %cst_102 = arith.constant 4.000000e+00 : f32
    %223 = vector.broadcast %cst_102 : f32 to vector<1x128xf32>
    %224 = arith.divf %222, %223 : vector<1x128xf32>
    %225 = arith.mulf %219, %219 : vector<1x128xf32>
    %226 = arith.subf %224, %225 : vector<1x128xf32>
    %cst_103 = arith.constant 0.000000e+00 : f32
    %227 = vector.broadcast %cst_103 : f32 to vector<1x128xf32>
    %228 = arith.maximumf %226, %227 : vector<1x128xf32>
    %229 = vector.broadcast %219 : vector<1x128xf32> to vector<4x128xf32>
    %230 = arith.subf %215, %229 : vector<4x128xf32>
    %cst_104 = arith.constant 9.99999974E-6 : f32
    %231 = vector.broadcast %cst_104 : f32 to vector<1x128xf32>
    %232 = arith.addf %228, %231 : vector<1x128xf32>
    %233 = math.rsqrt %232 : vector<1x128xf32>
    %234 = vector.broadcast %233 : vector<1x128xf32> to vector<4x128xf32>
    %235 = arith.mulf %230, %234 : vector<4x128xf32>
    %c0_105 = arith.constant 0 : index
    %c0_106 = arith.constant 0 : index
    %236 = vector.load %arg8[%c0_105, %c0_106] : memref<1x128xf32, #tpu.memory_space<vmem>>, vector<1x128xf32>
    %237 = vector.broadcast %236 : vector<1x128xf32> to vector<4x128xf32>
    %238 = arith.mulf %235, %237 : vector<4x128xf32>
    %c0_107 = arith.constant 0 : index
    %c0_108 = arith.constant 0 : index
    %239 = vector.load %arg9[%c0_107, %c0_108] : memref<1x128xf32, #tpu.memory_space<vmem>>, vector<1x128xf32>
    %240 = vector.broadcast %239 : vector<1x128xf32> to vector<4x128xf32>
    %241 = arith.addf %238, %240 : vector<4x128xf32>
    %cst_109 = arith.constant 0.000000e+00 : f32
    %242 = vector.broadcast %cst_109 : f32 to vector<4x128xf32>
    %243 = arith.maximumf %241, %242 : vector<4x128xf32>
    %244 = arith.truncf %243 : vector<4x128xf32> to vector<4x128xbf16>
    %c0_110 = arith.constant 0 : index
    %c0_111 = arith.constant 0 : index
    %245 = vector.load %arg10[%c0_110, %c0_111] : memref<128x128xbf16, #tpu.memory_space<vmem>>, vector<128x128xbf16>
    %cst_112 = arith.constant dense<0.000000e+00> : vector<4x128xf32>
    %246 = tpu.matmul %244, %245, %cst_112 {dimension_numbers = #tpu.dot_dimension_numbers<[1], [0], [0], [1], [0, 0, 1, 1], [], []>} : vector<4x128xbf16>, vector<128x128xbf16>, vector<4x128xf32> -> vector<4x128xf32>
    %cst_113 = arith.constant dense<0.000000e+00> : vector<128xf32>
    %247 = vector.multi_reduction <add>, %246, %cst_113 [0] : vector<4x128xf32> to vector<128xf32>
    %248 = vector.shape_cast %247 : vector<128xf32> to vector<1x128xf32>
    %cst_114 = arith.constant 4.000000e+00 : f32
    %249 = vector.broadcast %cst_114 : f32 to vector<1x128xf32>
    %250 = arith.divf %248, %249 : vector<1x128xf32>
    %251 = arith.mulf %246, %246 : vector<4x128xf32>
    %cst_115 = arith.constant dense<0.000000e+00> : vector<128xf32>
    %252 = vector.multi_reduction <add>, %251, %cst_115 [0] : vector<4x128xf32> to vector<128xf32>
    %253 = vector.shape_cast %252 : vector<128xf32> to vector<1x128xf32>
    %cst_116 = arith.constant 4.000000e+00 : f32
    %254 = vector.broadcast %cst_116 : f32 to vector<1x128xf32>
    %255 = arith.divf %253, %254 : vector<1x128xf32>
    %256 = arith.mulf %250, %250 : vector<1x128xf32>
    %257 = arith.subf %255, %256 : vector<1x128xf32>
    %cst_117 = arith.constant 0.000000e+00 : f32
    %258 = vector.broadcast %cst_117 : f32 to vector<1x128xf32>
    %259 = arith.maximumf %257, %258 : vector<1x128xf32>
    %260 = vector.broadcast %250 : vector<1x128xf32> to vector<4x128xf32>
    %261 = arith.subf %246, %260 : vector<4x128xf32>
    %cst_118 = arith.constant 9.99999974E-6 : f32
    %262 = vector.broadcast %cst_118 : f32 to vector<1x128xf32>
    %263 = arith.addf %259, %262 : vector<1x128xf32>
    %264 = math.rsqrt %263 : vector<1x128xf32>
    %265 = vector.broadcast %264 : vector<1x128xf32> to vector<4x128xf32>
    %266 = arith.mulf %261, %265 : vector<4x128xf32>
    %c0_119 = arith.constant 0 : index
    %c0_120 = arith.constant 0 : index
    %267 = vector.load %arg11[%c0_119, %c0_120] : memref<1x128xf32, #tpu.memory_space<vmem>>, vector<1x128xf32>
    %268 = vector.broadcast %267 : vector<1x128xf32> to vector<4x128xf32>
    %269 = arith.mulf %266, %268 : vector<4x128xf32>
    %c0_121 = arith.constant 0 : index
    %c0_122 = arith.constant 0 : index
    %270 = vector.load %arg12[%c0_121, %c0_122] : memref<1x128xf32, #tpu.memory_space<vmem>>, vector<1x128xf32>
    %271 = vector.broadcast %270 : vector<1x128xf32> to vector<4x128xf32>
    %272 = arith.addf %269, %271 : vector<4x128xf32>
    %273 = arith.truncf %272 : vector<4x128xf32> to vector<4x128xbf16>
    %c0_123 = arith.constant 0 : index
    %c0_124 = arith.constant 0 : index
    %274 = vector.load %arg13[%c0_123, %c0_124] : memref<128x128xbf16, #tpu.memory_space<vmem>>, vector<128x128xbf16>
    %cst_125 = arith.constant dense<0.000000e+00> : vector<4x128xf32>
    %275 = tpu.matmul %273, %274, %cst_125 {dimension_numbers = #tpu.dot_dimension_numbers<[1], [0], [0], [1], [0, 0, 1, 1], [], []>} : vector<4x128xbf16>, vector<128x128xbf16>, vector<4x128xf32> -> vector<4x128xf32>
    %cst_126 = arith.constant dense<0.000000e+00> : vector<128xf32>
    %276 = vector.multi_reduction <add>, %275, %cst_126 [0] : vector<4x128xf32> to vector<128xf32>
    %277 = vector.shape_cast %276 : vector<128xf32> to vector<1x128xf32>
    %cst_127 = arith.constant 4.000000e+00 : f32
    %278 = vector.broadcast %cst_127 : f32 to vector<1x128xf32>
    %279 = arith.divf %277, %278 : vector<1x128xf32>
    %280 = arith.mulf %275, %275 : vector<4x128xf32>
    %cst_128 = arith.constant dense<0.000000e+00> : vector<128xf32>
    %281 = vector.multi_reduction <add>, %280, %cst_128 [0] : vector<4x128xf32> to vector<128xf32>
    %282 = vector.shape_cast %281 : vector<128xf32> to vector<1x128xf32>
    %cst_129 = arith.constant 4.000000e+00 : f32
    %283 = vector.broadcast %cst_129 : f32 to vector<1x128xf32>
    %284 = arith.divf %282, %283 : vector<1x128xf32>
    %285 = arith.mulf %279, %279 : vector<1x128xf32>
    %286 = arith.subf %284, %285 : vector<1x128xf32>
    %cst_130 = arith.constant 0.000000e+00 : f32
    %287 = vector.broadcast %cst_130 : f32 to vector<1x128xf32>
    %288 = arith.maximumf %286, %287 : vector<1x128xf32>
    %289 = vector.broadcast %279 : vector<1x128xf32> to vector<4x128xf32>
    %290 = arith.subf %275, %289 : vector<4x128xf32>
    %cst_131 = arith.constant 9.99999974E-6 : f32
    %291 = vector.broadcast %cst_131 : f32 to vector<1x128xf32>
    %292 = arith.addf %288, %291 : vector<1x128xf32>
    %293 = math.rsqrt %292 : vector<1x128xf32>
    %294 = vector.broadcast %293 : vector<1x128xf32> to vector<4x128xf32>
    %295 = arith.mulf %290, %294 : vector<4x128xf32>
    %c0_132 = arith.constant 0 : index
    %c0_133 = arith.constant 0 : index
    %296 = vector.load %arg14[%c0_132, %c0_133] : memref<1x128xf32, #tpu.memory_space<vmem>>, vector<1x128xf32>
    %297 = vector.broadcast %296 : vector<1x128xf32> to vector<4x128xf32>
    %298 = arith.mulf %295, %297 : vector<4x128xf32>
    %c0_134 = arith.constant 0 : index
    %c0_135 = arith.constant 0 : index
    %299 = vector.load %arg15[%c0_134, %c0_135] : memref<1x128xf32, #tpu.memory_space<vmem>>, vector<1x128xf32>
    %300 = vector.broadcast %299 : vector<1x128xf32> to vector<4x128xf32>
    %301 = arith.addf %298, %300 : vector<4x128xf32>
    %cst_136 = arith.constant 0.000000e+00 : f32
    %302 = vector.broadcast %cst_136 : f32 to vector<4x128xf32>
    %303 = arith.maximumf %301, %302 : vector<4x128xf32>
    %304 = arith.truncf %303 : vector<4x128xf32> to vector<4x128xbf16>
    %c0_137 = arith.constant 0 : index
    %c0_138 = arith.constant 0 : index
    %305 = vector.load %arg16[%c0_137, %c0_138] : memref<128x128xbf16, #tpu.memory_space<vmem>>, vector<128x128xbf16>
    %cst_139 = arith.constant dense<0.000000e+00> : vector<4x128xf32>
    %306 = tpu.matmul %304, %305, %cst_139 {dimension_numbers = #tpu.dot_dimension_numbers<[1], [0], [0], [1], [0, 0, 1, 1], [], []>} : vector<4x128xbf16>, vector<128x128xbf16>, vector<4x128xf32> -> vector<4x128xf32>
    %c0_140 = arith.constant 0 : index
    %c0_141 = arith.constant 0 : index
    %307 = vector.load %arg17[%c0_140, %c0_141] : memref<1x128xf32, #tpu.memory_space<vmem>>, vector<1x128xf32>
    %308 = vector.broadcast %307 : vector<1x128xf32> to vector<4x128xf32>
    %309 = arith.addf %306, %308 : vector<4x128xf32>
    %310 = arith.mulf %154, %154 : vector<4x128xf32>
    %cst_142 = arith.constant dense<0.000000e+00> : vector<4xf32>
    %311 = vector.multi_reduction <add>, %310, %cst_142 [1] : vector<4x128xf32> to vector<4xf32>
    %312 = vector.shape_cast %311 : vector<4xf32> to vector<4x1xf32>
    %cst_143 = arith.constant 1.000000e-24 : f32
    %313 = vector.broadcast %cst_143 : f32 to vector<4x1xf32>
    %314 = arith.maximumf %312, %313 : vector<4x1xf32>
    %315 = math.rsqrt %314 : vector<4x1xf32>
    %316 = vector.broadcast %315 : vector<4x1xf32> to vector<4x128xf32>
    %317 = arith.mulf %154, %316 : vector<4x128xf32>
    %318 = arith.mulf %272, %272 : vector<4x128xf32>
    %cst_144 = arith.constant dense<0.000000e+00> : vector<4xf32>
    %319 = vector.multi_reduction <add>, %318, %cst_144 [1] : vector<4x128xf32> to vector<4xf32>
    %320 = vector.shape_cast %319 : vector<4xf32> to vector<4x1xf32>
    %cst_145 = arith.constant 1.000000e-24 : f32
    %321 = vector.broadcast %cst_145 : f32 to vector<4x1xf32>
    %322 = arith.maximumf %320, %321 : vector<4x1xf32>
    %323 = math.rsqrt %322 : vector<4x1xf32>
    %324 = vector.broadcast %323 : vector<4x1xf32> to vector<4x128xf32>
    %325 = arith.mulf %272, %324 : vector<4x128xf32>
    %326 = arith.mulf %317, %325 : vector<4x128xf32>
    %327 = vector.shape_cast %326 : vector<4x128xf32> to vector<1x4x128xf32>
    %cst_146 = arith.constant dense<0.000000e+00> : vector<1xf32>
    %328 = vector.multi_reduction <add>, %327, %cst_146 [1, 2] : vector<1x4x128xf32> to vector<1xf32>
    %329 = vector.shape_cast %328 : vector<1xf32> to vector<1x1x1xf32>
    %330 = vector.extract %329[0, 0, 0] : f32 from vector<1x1x1xf32>
    %cst_147 = arith.constant 0.000000e+00 : f32
    %331 = arith.subf %cst_147, %330 : f32
    %cst_148 = arith.constant 2.500000e-01 : f32
    %332 = arith.mulf %331, %cst_148 : f32
    %cst_149 = arith.constant 5.000000e-01 : f32
    %333 = arith.mulf %cst_149, %332 : f32
    %334 = arith.mulf %309, %309 : vector<4x128xf32>
    %cst_150 = arith.constant dense<0.000000e+00> : vector<4xf32>
    %335 = vector.multi_reduction <add>, %334, %cst_150 [1] : vector<4x128xf32> to vector<4xf32>
    %336 = vector.shape_cast %335 : vector<4xf32> to vector<4x1xf32>
    %cst_151 = arith.constant 1.000000e-24 : f32
    %337 = vector.broadcast %cst_151 : f32 to vector<4x1xf32>
    %338 = arith.maximumf %336, %337 : vector<4x1xf32>
    %339 = math.rsqrt %338 : vector<4x1xf32>
    %340 = vector.broadcast %339 : vector<4x1xf32> to vector<4x128xf32>
    %341 = arith.mulf %309, %340 : vector<4x128xf32>
    %342 = arith.mulf %117, %117 : vector<4x128xf32>
    %cst_152 = arith.constant dense<0.000000e+00> : vector<4xf32>
    %343 = vector.multi_reduction <add>, %342, %cst_152 [1] : vector<4x128xf32> to vector<4xf32>
    %344 = vector.shape_cast %343 : vector<4xf32> to vector<4x1xf32>
    %cst_153 = arith.constant 1.000000e-24 : f32
    %345 = vector.broadcast %cst_153 : f32 to vector<4x1xf32>
    %346 = arith.maximumf %344, %345 : vector<4x1xf32>
    %347 = math.rsqrt %346 : vector<4x1xf32>
    %348 = vector.broadcast %347 : vector<4x1xf32> to vector<4x128xf32>
    %349 = arith.mulf %117, %348 : vector<4x128xf32>
    %350 = arith.mulf %341, %349 : vector<4x128xf32>
    %351 = vector.shape_cast %350 : vector<4x128xf32> to vector<1x4x128xf32>
    %cst_154 = arith.constant dense<0.000000e+00> : vector<1xf32>
    %352 = vector.multi_reduction <add>, %351, %cst_154 [1, 2] : vector<1x4x128xf32> to vector<1xf32>
    %353 = vector.shape_cast %352 : vector<1xf32> to vector<1x1x1xf32>
    %354 = vector.extract %353[0, 0, 0] : f32 from vector<1x1x1xf32>
    %cst_155 = arith.constant 0.000000e+00 : f32
    %355 = arith.subf %cst_155, %354 : f32
    %cst_156 = arith.constant 2.500000e-01 : f32
    %356 = arith.mulf %355, %cst_156 : f32
    %cst_157 = arith.constant 5.000000e-01 : f32
    %357 = arith.mulf %cst_157, %356 : f32
    %358 = arith.addf %333, %357 : f32
    %c0_158 = arith.constant 0 : index
    %c0_159 = arith.constant 0 : index
    %359 = memref.load %arg18[%c0_158, %c0_159] : memref<1x1xf32, #tpu.memory_space<smem>>
    memref.store %358, %arg18[%c0_158, %c0_159] : memref<1x1xf32, #tpu.memory_space<smem>>
    return
  }
}

</mosaic_0001>

<bundles_post_ra>
// kernel: simsiam_forward.1
= control target key start
LH: loop header
LB: loop body
LE: loop exit
PB: predicated region body
PF: predicated region fallthrough
CT: control target
= control target key end

     0   :  { %s5079_s0 = inlined_call_operand.vmem [shape: f32[256,3], index: 0, kind: input, shape index: {}]   ;;  %s5080_s1 = inlined_call_operand.vmem [shape: f32[256,3], index: 1, kind: input, shape index: {}]   ;;  %s5081_s2 = inlined_call_operand.vmem [shape: f32[3,128], index: 2, kind: input, shape index: {}]   ;;  %s5082_s3 = inlined_call_operand.vmem [shape: f32[1,128], index: 3, kind: input, shape index: {}]   ;;  %s5083_s4 = inlined_call_operand.vmem [shape: bf16[128,128], index: 4, kind: input, shape index: {}]   ;;  %s5084_s5 = inlined_call_operand.vmem [shape: f32[1,128], index: 5, kind: input, shape index: {}]   ;;  %s5085_s6 = inlined_call_operand.vmem [shape: f32[1,128], index: 6, kind: input, shape index: {}]   ;;  %s5086_s7 = inlined_call_operand.vmem [shape: bf16[128,128], index: 7, kind: input, shape index: {}]   ;;  %s5087_s8 = inlined_call_operand.vmem [shape: f32[1,128], index: 8, kind: input, shape index: {}]   ;;  %s5088_s9 = inlined_call_operand.vmem [shape: f32[1,128], index: 9, kind: input, shape index: {}]   ;;  %s5089_s10 = inlined_call_operand.vmem [shape: bf16[128,128], index: 10, kind: input, shape index: {}]   ;;  %s5090_s11 = inlined_call_operand.vmem [shape: f32[1,128], index: 11, kind: input, shape index: {}]   ;;  %s5091_s12 = inlined_call_operand.vmem [shape: f32[1,128], index: 12, kind: input, shape index: {}]   ;;  %s5092_s13 = inlined_call_operand.vmem [shape: bf16[128,128], index: 13, kind: input, shape index: {}]   ;;  %s5093_s14 = inlined_call_operand.vmem [shape: f32[1,128], index: 14, kind: input, shape index: {}]   ;;  %s5094_s15 = inlined_call_operand.vmem [shape: f32[1,128], index: 15, kind: input, shape index: {}]   ;;  %s5095_s16 = inlined_call_operand.vmem [shape: bf16[128,128], index: 16, kind: input, shape index: {}]   ;;  %s5096_s17 = inlined_call_operand.vmem [shape: f32[1,128], index: 17, kind: input, shape index: {}]   ;;  %s5097_s18 = inlined_call_operand.hbm [shape: f32[1,1], index: 18, kind: output, shape index: {}]  }
   0x1   :  { %5122 = sst [smem:[#allocation42_spill]] %s5079_s0 }
   0x2   :  { %5123 = sst [smem:[#allocation43_spill]] %s5080_s1 }
   0x3   :  { %5124 = sst [smem:[#allocation44_spill]] %s5081_s2 }
   0x4   :  { %s5125_s29 = sld [smem:[#allocation42_spill]]  ;;  %v5103_v2 = vmov 0   ;;  %v5105_v7 = vmov 1  }
   0x5   :  { %3010 = vset.pattern.permute.xlu1 %v5103_v2  ;;  %3009 = vset.pattern.permute.xlu0 %v5103_v2 }
   0xa   :  { %v69_v0 = vld [vmem:[%s5125_s29 + $0x40] sm:$0xff]  ;;  %v70_v3 = vld [vmem:[%s5125_s29 + $0x48] sm:$0xff]  ;;  %v3312_v6 = vld [vmem:[%s5125_s29 + $0x10] sm:$0xff] }
   0xb   :  { %v61_v1 = vld [vmem:[%s5125_s29] sm:$0xff]  ;;  %136 = vperm.xlu1 %3010, %v69_v0   ;;  %v3301_v4 = vld [vmem:[%s5125_s29 + $0x8] sm:$0xff]  ;;  %v3329_v10 = vld [vmem:[%s5125_s29 + $0x90] sm:$0xff] }
   0xc   :  { %96 = vperm.xlu0 %3009, %v61_v1   ;;  %v3307_v5 = vld [vmem:[%s5125_s29 + $0x88] sm:$0xff]  ;;  %v3320_v8 = vld [vmem:[%s5125_s29 + $0xc0] sm:$0xff]  ;;  %v3336_v11 = vld [vmem:[%s5125_s29 + $0xd0] sm:$0xff] }
   0xd   :  { %v77_v9 = vld [vmem:[%s5125_s29 + $0x80] sm:$0xff]  ;;  %v71_v13 = vld [vmem:[%s5125_s29 + $0x50] sm:$0xff]  ;;  %v3353_v14 = vld [vmem:[%s5125_s29 + $0x68] sm:$0xff] }
   0xe   :  { %v3343_v12 = vld [vmem:[%s5125_s29 + $0x60] sm:$0xff]  ;;  %v86_v15 = vld [vmem:[%s5125_s29 + $0xc8] sm:$0xff]  ;;  %v3363_v16 = vld [vmem:[%s5125_s29 + $0x70] sm:$0xff] }
   0xf   :  { %141 = vperm.xlu1 %3010, %v70_v3  }
  0x10   :  { %101 = vperm.xlu0 %3009, %v3301_v4  }
  0x13   :  { %3011 = vset.pattern.permute.xlu1 %v5105_v7 }
  0x14   :  { %181 = vperm.xlu0 %3009, %v3307_v5   ;;  %296 = vperm.xlu1 %3011, %v3301_v4  }
  0x18   :  { %106 = vperm.xlu0 %3009, %v3312_v6   ;;  %324 = vperm.xlu1 %3011, %v69_v0  }
  0x1c   :  { %216 = vperm.xlu0 %3009, %v3320_v8   ;;  %3012 = vset.pattern.permute.xlu1 %v5103_v2 }
  0x1d   :  { %176 = vperm.xlu1 %3012, %v77_v9  }
  0x20   :  { %186 = vperm.xlu0 %3009, %v3329_v10  }
  0x21   :  { %3013 = vset.pattern.permute.xlu1 %v5105_v7 }
  0x22   :  { %356 = vperm.xlu1 %3013, %v77_v9  }
  0x24   :  { %226 = vperm.xlu0 %3009, %v3336_v11  }
  0x26   :  { %360 = vperm.xlu1 %3013, %v3307_v5  }
  0x28   :  { %156 = vperm.xlu0 %3009, %v3343_v12  }
  0x2a   :  { %3014 = vset.pattern.permute.xlu1 %v5103_v2 }
  0x2b   :  { %146 = vperm.xlu1 %3014, %v71_v13  }
  0x2c   :  { %161 = vperm.xlu0 %3009, %v3353_v14  }
  0x2d   :  { %23 = vsyncpa [#allocation3], 0  ;;  %v3370_v17 = vld [vmem:[%s5125_s29 + $0x78] sm:$0xff]  ;;  %v5101_v18 = vmov 2   ;;  %v3395_v21 = vld [vmem:[%s5125_s29 + $0xa0] sm:$0xff]  ;;  %vm3190_vm0 = vmmov 0  }
  0x2e   :  { %v3383_v19 = vld [vmem:[%s5125_s29 + $0x98] sm:$0xff]  ;;  %v3406_v23 = vld [vmem:[%s5125_s29 + $0xa8] sm:$0xff]  ;;  %v3414_v24 = vld [vmem:[%s5125_s29 + $0xb0] sm:$0xff]  ;;  %s5145_s23 = sld [smem:[#allocation43_spill]]  ;;  %vm840_vm1 = vcmask 1041409   ;;  %vm842_vm2 = vcmask 1042434  }
  0x2f   :  { %221 = vperm.xlu1 %3014, %v86_v15   ;;  %v64_v20 = vld [vmem:[%s5125_s29 + $0x18] sm:$0xff]  ;;  %v65_v27 = vld [vmem:[%s5125_s29 + $0x20] sm:$0xff]  ;;  %v66_v35 = vld [vmem:[%s5125_s29 + $0x28] sm:$0xff]  ;;  %s5164_s0 = sld [smem:[#allocation44_spill]]  ;;  %vm844_vm3 = vcmask 1043459   ;;  %vm936_vm4 = vcmask 1043456  }
  0x30   :  { %166 = vperm.xlu0 %3009, %v3363_v16   ;;  %v72_v22 = vld [vmem:[%s5125_s29 + $0x58] sm:$0xff]  ;;  %v89_v37 = vld [vmem:[%s5125_s29 + $0xe0] sm:$0xff]  ;;  %v67_v49 = vld [vmem:[%s5125_s29 + $0x30] sm:$0xff] }
  0x31   :  { %v3423_v25 = vld [vmem:[%s5125_s29 + $0xb8] sm:$0xff]  ;;  %v90_v52 = vld [vmem:[%s5125_s29 + $0xe8] sm:$0xff] }
  0x32   :  { %v3429_v26 = vld [vmem:[%s5125_s29 + $0xf8] sm:$0xff] }
  0x33   :  { %3015 = vset.pattern.permute.xlu1 %v5105_v7  ;;  %v88_v28 = vld [vmem:[%s5125_s29 + $0xd8] sm:$0xff] }
  0x34   :  { %171 = vperm.xlu0 %3009, %v3370_v17   ;;  %332 = vperm.xlu1 %3015, %v71_v13  }
  0x38   :  { %3040 = vset.pattern.permute.xlu0 %v5105_v7  ;;  %388 = vperm.xlu1 %3015, %v3320_v8  }
  0x39   :  { %292 = vperm.xlu0 %3040, %v61_v1  }
  0x3c   :  { %3016 = vset.pattern.permute.xlu1 %v5101_v18 }
  0x3d   :  { %328 = vperm.xlu0 %3040, %v70_v3   ;;  %489 = vperm.xlu1 %3016, %v61_v1  }
  0x41   :  { %300 = vperm.xlu0 %3040, %v3312_v6   ;;  %521 = vperm.xlu1 %3016, %v69_v0  }
  0x45   :  { %392 = vperm.xlu0 %3040, %v86_v15   ;;  %525 = vperm.xlu1 %3016, %v70_v3   ;;  %v68_v3 = vld [vmem:[%s5125_s29 + $0x38] sm:$0xff] }
  0x49   :  { %396 = vperm.xlu0 %3040, %v3336_v11   ;;  %3017 = vset.pattern.permute.xlu1 %v5105_v7 }
  0x4a   :  { %364 = vperm.xlu1 %3017, %v3329_v10  }
  0x4d   :  { %368 = vperm.xlu0 %3040, %v3383_v19  }
  0x4e   :  { %3018 = vset.pattern.permute.xlu1 %v5101_v18 }
  0x4f   :  { %553 = vperm.xlu1 %3018, %v77_v9  }
  0x51   :  { %340 = vperm.xlu0 %3040, %v3343_v12  }
  0x53   :  { %3019 = vset.pattern.permute.xlu1 %v5103_v2 }
  0x54   :  { %111 = vperm.xlu1 %3019, %v64_v20  }
  0x55   :  { %372 = vperm.xlu0 %3040, %v3395_v21  }
  0x58   :  { %151 = vperm.xlu1 %3019, %v72_v22  }
  0x59   :  { %344 = vperm.xlu0 %3040, %v3353_v14  }
  0x5c   :  { %3020 = vset.pattern.permute.xlu1 %v5105_v7 }
  0x5d   :  { %376 = vperm.xlu0 %3040, %v3406_v23   ;;  %304 = vperm.xlu1 %3020, %v64_v20  }
  0x61   :  { %348 = vperm.xlu0 %3040, %v3363_v16   ;;  %336 = vperm.xlu1 %3020, %v72_v22  }
  0x65   :  { %380 = vperm.xlu0 %3040, %v3414_v24   ;;  %3021 = vset.pattern.permute.xlu1 %v5101_v18 }
  0x66   :  { %497 = vperm.xlu1 %3021, %v3312_v6  }
  0x69   :  { %352 = vperm.xlu0 %3040, %v3370_v17  }
  0x6a   :  { %529 = vperm.xlu1 %3021, %v71_v13  }
  0x6d   :  { %384 = vperm.xlu0 %3040, %v3423_v25  }
  0x6e   :  { %589 = vperm.xlu1 %3021, %v86_v15  }
  0x71   :  { %416 = vperm.xlu0 %3040, %v3429_v26  }
  0x72   :  { %3022 = vset.pattern.permute.xlu1 %v5103_v2 }
  0x73   :  { %191 = vperm.xlu1 %3022, %v3383_v19  }
  0x75   :  { %3046 = vset.pattern.permute.xlu0 %v5101_v18 }
  0x76   :  { %493 = vperm.xlu0 %3046, %v3301_v4  }
  0x77   :  { %3023 = vset.pattern.permute.xlu1 %v5101_v18 }
  0x78   :  { %561 = vperm.xlu1 %3023, %v3329_v10  }
  0x7a   :  { %557 = vperm.xlu0 %3046, %v3307_v5   ;;  %v91_v5 = vld [vmem:[%s5125_s29 + $0xf0] sm:$0xff] }
  0x7c   :  { %3024 = vset.pattern.permute.xlu1 %v5103_v2 }
  0x7d   :  { %116 = vperm.xlu1 %3024, %v65_v27  }
  0x7e   :  { %585 = vperm.xlu0 %3046, %v3320_v8  }
  0x81   :  { %231 = vperm.xlu1 %3024, %v88_v28  }
  0x82   :  { %533 = vperm.xlu0 %3046, %v72_v22  }
  0x85   :  { %3025 = vset.pattern.permute.xlu1 %v5105_v7 }
  0x86   :  { %537 = vperm.xlu0 %3046, %v3343_v12   ;;  %v3449_v29 = vpop.permute.xlu1 %136  ;;  %308 = vperm.xlu1 %3025, %v65_v27  }
  0x87   :  { %v3486_v40 = vpop.permute.xlu0 %96 }
  0x8a   :  { %541 = vperm.xlu0 %3046, %v3353_v14   ;;  %v3452_v30 = vpop.permute.xlu1 %141  ;;  %400 = vperm.xlu1 %3025, %v88_v28  }
  0x8b   :  { %v3493_v43 = vpop.permute.xlu0 %101 }
  0x8e   :  { %545 = vperm.xlu0 %3046, %v3363_v16   ;;  %3026 = vset.pattern.permute.xlu1 %v5101_v18 }
  0x8f   :  { %v3456_v31 = vpop.permute.xlu1 %296  ;;  %501 = vperm.xlu1 %3026, %v64_v20   ;;  %v3497_v45 = vpop.permute.xlu0 %181 }
  0x92   :  { %549 = vperm.xlu0 %3046, %v3370_v17  }
  0x93   :  { %v3459_v32 = vpop.permute.xlu1 %324  ;;  %593 = vperm.xlu1 %3026, %v3336_v11   ;;  %v3503_v47 = vpop.permute.xlu0 %106 }
  0x96   :  { %613 = vperm.xlu0 %3046, %v3429_v26  }
  0x97   :  { %3027 = vset.pattern.permute.xlu1 %v5103_v2  ;;  %v3514_v51 = vpop.permute.xlu0 %216 }
  0x98   :  { %v3464_v33 = vpop.permute.xlu1 %176  ;;  %196 = vperm.xlu1 %3027, %v3395_v21  }
  0x9a   :  { %3049 = vset.pattern.permute.xlu0 %v5103_v2 }
  0x9b   :  { %v3522_v54 = vpop.permute.xlu0 %186 }
  0x9c   :  { %3028 = vset.pattern.permute.xlu1 %v5101_v18 }
  0x9d   :  { %v3469_v34 = vpop.permute.xlu1 %356  ;;  %565 = vperm.xlu1 %3028, %v3383_v19  }
  0x9f   :  { %v3527_v56 = vpop.permute.xlu0 %226 }
  0xa1   :  { %v3475_v36 = vpop.permute.xlu1 %360  ;;  %3029 = vset.pattern.permute.xlu1 %v5103_v2 }
  0xa2   :  { %121 = vperm.xlu1 %3029, %v66_v35  }
  0xa3   :  { %v3531_v58 = vpop.permute.xlu0 %156 }
  0xa6   :  { %v3481_v38 = vpop.permute.xlu1 %146  ;;  %236 = vperm.xlu1 %3029, %v89_v37  }
  0xa7   :  { %v3538_v61 = vpop.permute.xlu0 %161 }
  0xaa   :  { %v3483_v39 = vpop.permute.xlu1 %221  ;;  %3030 = vset.pattern.permute.xlu1 %v5105_v7 }
  0xab   :  { %312 = vperm.xlu1 %3030, %v66_v35   ;;  %v3544_v63 = vpop.permute.xlu0 %166 }
  0xaf   :  { %v3488_v41 = vpop.permute.xlu1 %332  ;;  %404 = vperm.xlu1 %3030, %v89_v37   ;;  %v3555_v4 = vpop.permute.xlu0 %171 }
  0xb3   :  { %v3490_v42 = vpop.permute.xlu1 %388  ;;  %3031 = vset.pattern.permute.xlu1 %v5101_v18 }
  0xb4   :  { %505 = vperm.xlu1 %3031, %v65_v27   ;;  %v3563_v8 = vpop.permute.xlu0 %292 }
  0xb8   :  { %597 = vperm.xlu1 %3031, %v88_v28   ;;  %v3495_v44 = vpop.permute.xlu1 %489  ;;  %v3568_v10 = vpop.permute.xlu0 %328 }
  0xbc   :  { %3032 = vset.pattern.permute.xlu1 %v5103_v2  ;;  %v3500_v46 = vpop.permute.xlu1 %521  ;;  %v3572_v12 = vpop.permute.xlu0 %300 }
  0xbd   :  { %201 = vperm.xlu1 %3032, %v3406_v23  }
  0xc0   :  { %v3505_v48 = vpop.permute.xlu1 %525  ;;  %v3579_v15 = vpop.permute.xlu0 %392 }
  0xc1   :  { %3033 = vset.pattern.permute.xlu1 %v5101_v18 }
  0xc2   :  { %569 = vperm.xlu1 %3033, %v3395_v21  }
  0xc4   :  { %v3585_v17 = vpop.permute.xlu0 %396 }
  0xc5   :  { %v3512_v50 = vpop.permute.xlu1 %364 }
  0xc6   :  { %3034 = vset.pattern.permute.xlu1 %v5103_v2 }
  0xc7   :  { %126 = vperm.xlu1 %3034, %v67_v49  }
  0xc8   :  { %v3591_v20 = vpop.permute.xlu0 %368 }
  0xca   :  { %v3520_v53 = vpop.permute.xlu1 %553 }
  0xcb   :  { %241 = vperm.xlu1 %3034, %v90_v52  }
  0xcf   :  { %3035 = vset.pattern.permute.xlu1 %v5105_v7  ;;  %v3525_v55 = vpop.permute.xlu1 %111 }
  0xd0   :  { %316 = vperm.xlu1 %3035, %v67_v49  }
  0xd3   :  { %v3529_v57 = vpop.permute.xlu1 %151 }
  0xd4   :  { %408 = vperm.xlu1 %3035, %v90_v52  }
  0xd8   :  { %3036 = vset.pattern.permute.xlu1 %v5101_v18  ;;  %v3534_v59 = vpop.permute.xlu1 %304 }
  0xd9   :  { %509 = vperm.xlu1 %3036, %v66_v35   ;;  %v5107_v35 = vmov 0.0  }
  0xda   :  { %2799 = vmatprep.subr.bf16.mxu0 %v5107_v35  ;;  %2819 = vmatprep.subr.bf16.mxu1 %v5107_v35 }
  0xdb   :  { %2815 = vmatprep.mubr.msk.bf16.mxu0 %vm3190_vm0, %v5107_v35  ;;  %2835 = vmatprep.mubr.msk.bf16.mxu1 %vm3190_vm0, %v5107_v35 }
  0xdc   :  { %v3536_v60 = vpop.permute.xlu1 %336 }
  0xdd   :  { %601 = vperm.xlu1 %3036, %v89_v37   ;;  %v3088_v37 = vld [vmem:[%s5083_s4 + $0x30] sm:$0xff]  }
  0xe1   :  { %3037 = vset.pattern.permute.xlu1 %v5103_v2  ;;  %v3541_v62 = vpop.permute.xlu1 %497 }
  0xe2   :  { %206 = vperm.xlu1 %3037, %v3414_v24  }
  0xe5   :  { %v3546_v0 = vpop.permute.xlu1 %529 }
  0xe6   :  { %3038 = vset.pattern.permute.xlu1 %v5101_v18 }
  0xe7   :  { %573 = vperm.xlu1 %3038, %v3406_v23   ;;  %v3599_v23 = vpop.permute.xlu0 %340 }
  0xe9   :  { %v3550_v1 = vpop.permute.xlu1 %589 }
  0xeb   :  { %3039 = vset.pattern.permute.xlu1 %v5103_v2  ;;  %v3607_v28 = vpop.permute.xlu0 %372 }
  0xec   :  { %131 = vperm.xlu1 %3039, %v68_v3  }
  0xee   :  { %v3561_v6 = vpop.permute.xlu1 %191 }
  0xef   :  { %5126 = vst [vmem:[#allocation5_spill] sm:$0xff] %v3561_v6  ;;  %v3756_v6 = vld [vmem:[%s5164_s0] ss:$0 sm:$0xff] }
  0xf0   :  { %246 = vperm.xlu1 %3039, %v91_v5  }
  0xf3   :  { %v3565_v9 = vpop.permute.xlu1 %561 }
  0xf4   :  { %5127 = vst [vmem:[#allocation6_spill] sm:$0xff] %v3565_v9  ;;  %3041 = vset.pattern.permute.xlu1 %v5105_v7 }
  0xf5   :  { %320 = vperm.xlu1 %3041, %v68_v3  }
  0xf8   :  { %v3570_v11 = vpop.permute.xlu1 %116 }
  0xf9   :  { %5128 = vst [vmem:[#allocation7_spill] sm:$0xff] %v3570_v11  ;;  %412 = vperm.xlu1 %3041, %v91_v5   ;;  %v5154_v11 = vmov 1  }
  0xfc   :  { %v3574_v13 = vpop.permute.xlu1 %231 }
  0xfd   :  { %5129 = vst [vmem:[#allocation8_spill] sm:$0xff] %v3574_v13  ;;  %3042 = vset.pattern.permute.xlu1 %v5101_v18 }
  0xfe   :  { %513 = vperm.xlu1 %3042, %v67_v49   ;;  %v3618_v49 = vpop.permute.xlu0 %344 }
 0x101   :  { %v3577_v14 = vpop.permute.xlu1 %308 }
 0x102   :  { %5130 = vst [vmem:[#allocation9_spill] sm:$0xff] %v3577_v14  ;;  %605 = vperm.xlu1 %3042, %v90_v52  }
 0x105   :  { %v3581_v16 = vpop.permute.xlu1 %400 }
 0x106   :  { %5131 = vst [vmem:[#allocation10_spill] sm:$0xff] %v3581_v16  ;;  %3043 = vset.pattern.permute.xlu1 %v5103_v2  ;;  %v3714_v16 = vld [vmem:[%s5145_s23 + $0xc0] sm:$0xff] }
 0x107   :  { %211 = vperm.xlu1 %3043, %v3423_v25  }
 0x10a   :  { %v3587_v19 = vpop.permute.xlu1 %501 }
 0x10b   :  { %5132 = vst [vmem:[#allocation11_spill] sm:$0xff] %v3587_v19  ;;  %3044 = vset.pattern.permute.xlu1 %v5101_v18 }
 0x10c   :  { %577 = vperm.xlu1 %3044, %v3414_v24   ;;  %v3087_v24 = vld [vmem:[%s5083_s4 + $0x38] sm:$0xff]  }
 0x10d   :  { %2800 = vmatpush3.bf16.msra.mxu0 %v3087_v24 }
 0x10e   :  { %v3593_v21 = vpop.permute.xlu1 %593  ;;  %2801 = vmatprep.subr.bf16.mxu0 %v5107_v35 }
 0x10f   :  { %5133 = vst [vmem:[#allocation12_spill] sm:$0xff] %v3593_v21 }
 0x110   :  { %3045 = vset.pattern.permute.xlu1 %v5103_v2 }
 0x111   :  { %251 = vperm.xlu1 %3045, %v3429_v26   ;;  %2802 = vmatpush3.bf16.msra.mxu0 %v3088_v37  ;;  %v3091_v37 = vld [vmem:[%s5083_s4 + $0x18] sm:$0xff]  }
 0x112   :  { %2803 = vmatprep.subr.bf16.mxu0 %v5107_v35 }
 0x113   :  { %v3597_v22 = vpop.permute.xlu1 %196 }
 0x114   :  { %5134 = vst [vmem:[#allocation13_spill] sm:$0xff] %v3597_v22  ;;  %v3673_v22 = vld [vmem:[%s5145_s23] sm:$0xff] }
 0x115   :  { %3047 = vset.pattern.permute.xlu1 %v5101_v18 }
 0x116   :  { %517 = vperm.xlu1 %3047, %v68_v3   ;;  %v3089_v3 = vld [vmem:[%s5083_s4 + $0x28] sm:$0xff]  }
 0x117   :  { %2804 = vmatpush3.bf16.msra.mxu0 %v3089_v3 }
 0x118   :  { %v3602_v27 = vpop.permute.xlu1 %565  ;;  %2805 = vmatprep.subr.bf16.mxu0 %v5107_v35 }
 0x119   :  { %5135 = vst [vmem:[#allocation14_spill] sm:$0xff] %v3602_v27 }
 0x11a   :  { %609 = vperm.xlu1 %3047, %v91_v5   ;;  %v3631_v5 = vpop.permute.xlu0 %376 }
 0x11b   :  { %5138 = vst [vmem:[#allocation17_spill] sm:$0xff] %v3631_v5  ;;  %v266_v5 = vmul.f32 %v3756_v6, %v3449_v29  ;;  %v3804_v29 = vld [vmem:[%s5145_s23 + $0xc8] sm:$0xff] }
 0x11c   :  { %5166 = vst [vmem:[#allocation41_spill] sm:$0xff] %v3804_v29 }
 0x11d   :  { %v3612_v26 = vpop.permute.xlu1 %121 }
 0x11e   :  { %5136 = vst [vmem:[#allocation15_spill] sm:$0xff] %v3612_v26  ;;  %581 = vperm.xlu1 %3047, %v3423_v25   ;;  %v3090_v25 = vld [vmem:[%s5083_s4 + $0x20] sm:$0xff]   ;;  %v3641_v3 = vpop.permute.xlu0 %348 }
 0x11f   :  { %2806 = vmatpush3.bf16.msra.mxu0 %v3090_v25 }
 0x120   :  { %2807 = vmatprep.subr.bf16.mxu0 %v5107_v35 }
 0x121   :  { %v3621_v52 = vpop.permute.xlu1 %236 }
 0x122   :  { %5137 = vst [vmem:[#allocation16_spill] sm:$0xff] %v3621_v52  ;;  %3048 = vset.pattern.permute.xlu1 %v5103_v2  ;;  %v3092_v2 = vld [vmem:[%s5083_s4 + $0x10] sm:$0xff]   ;;  %v3657_v7 = vpop.permute.xlu0 %380 }
 0x123   :  { %2808 = vmatpush3.bf16.msra.mxu0 %v3091_v37  ;;  %v3093_v37 = vld [vmem:[%s5083_s4 + $0x8] sm:$0xff]   ;;  %5142 = vst [vmem:[#allocation21_spill] sm:$0xff] %v3657_v7  ;;  %1562 = vperm.xlu1 %3048, %v3673_v22   ;;  %v3777_v7 = vld [vmem:[%s5145_s23 + $0x50] sm:$0xff] }
 0x124   :  { %2809 = vmatprep.subr.bf16.mxu0 %v5107_v35 }
 0x126   :  { %v3633_v24 = vpop.permute.xlu1 %312  ;;  %v3665_v26 = vpop.permute.xlu0 %352 }
 0x127   :  { %5139 = vst [vmem:[#allocation18_spill] sm:$0xff] %v3633_v24  ;;  %2810 = vmatpush3.bf16.msra.mxu0 %v3092_v2  ;;  %v3695_v24 = vld [vmem:[%s5145_s23 + $0x48] sm:$0xff] }
 0x128   :  { %2811 = vmatprep.subr.bf16.mxu0 %v5107_v35  ;;  %5149 = vst [vmem:[#allocation27_spill] sm:$0xff] %v3695_v24 }
 0x12a   :  { %v3639_v18 = vpop.permute.xlu1 %404 }
 0x12b   :  { %5140 = vst [vmem:[#allocation19_spill] sm:$0xff] %v3639_v18  ;;  %2812 = vmatpush3.bf16.msra.mxu0 %v3093_v37  ;;  %v3094_v18 = vld [vmem:[%s5083_s4] sm:$0xff]   ;;  %v1529_v37 = vld [vmem:[%s5145_s23 + $0x8] sm:$0xff] }
 0x12c   :  { %2813 = vmatprep.subr.bf16.mxu0 %v5107_v35  ;;  %1567 = vperm.xlu0 %3049, %v1529_v37  }
 0x12f   :  { %v3651_v25 = vpop.permute.xlu1 %505  ;;  %2814 = vmatpush3.bf16.msra.mxu0 %v3094_v18  ;;  %v3682_v18 = vld [vmem:[%s5145_s23 + $0x40] sm:$0xff] }
 0x130   :  { %5141 = vst [vmem:[#allocation20_spill] sm:$0xff] %v3651_v25  ;;  %2839 = vmatprep.subr.bf16.mxu0 %v5107_v35  ;;  %5146 = vst [vmem:[#allocation24_spill] sm:$0xff] %v3682_v18  ;;  %v3686_v35 = vpop.permute.xlu0 %384  ;;  %1602 = vperm.xlu1 %3048, %v3682_v18  }
 0x131   :  { %5148 = vst [vmem:[#allocation26_spill] sm:$0xff] %v3686_v35 }
 0x133   :  { %v3659_v52 = vpop.permute.xlu1 %597 }
 0x134   :  { %5143 = vst [vmem:[#allocation22_spill] sm:$0xff] %v3659_v52  ;;  %v1545_v52 = vld [vmem:[%s5145_s23 + $0x88] sm:$0xff]  ;;  %1607 = vperm.xlu1 %3048, %v3695_v24   ;;  %v3705_v25 = vpop.permute.xlu0 %416 }
 0x135   :  { %1647 = vperm.xlu0 %3049, %v1545_v52   ;;  %5152 = vst [vmem:[#allocation30_spill] sm:$0xff] %v3705_v25  ;;  %v5160_v25 = vmov 0  }
 0x138   :  { %v3667_v2 = vpop.permute.xlu1 %201  ;;  %3050 = vset.pattern.permute.xlu1 %v5154_v11 }
 0x139   :  { %5144 = vst [vmem:[#allocation23_spill] sm:$0xff] %v3667_v2  ;;  %1757 = vperm.xlu1 %3050, %v1529_v37  }
 0x13d   :  { %v3684_v2 = vpop.permute.xlu1 %569  ;;  %1785 = vperm.xlu1 %3050, %v3682_v18  }
 0x13e   :  { %5147 = vst [vmem:[#allocation25_spill] sm:$0xff] %v3684_v2  ;;  %v3703_v2 = vld [vmem:[%s5145_s23 + $0x10] sm:$0xff] }
 0x13f   :  { %5151 = vst [vmem:[#allocation29_spill] sm:$0xff] %v3703_v2  ;;  %1572 = vperm.xlu0 %3049, %v3703_v2   ;;  %v3724_v2 = vld [vmem:[%s5145_s23 + $0x90] sm:$0xff] }
 0x140   :  { %5156 = vst [vmem:[#allocation33_spill] sm:$0xff] %v3724_v2 }
 0x141   :  { %3051 = vset.pattern.permute.xlu1 %v5160_v25 }
 0x142   :  { %v3697_v27 = vpop.permute.xlu1 %126 }
 0x143   :  { %5150 = vst [vmem:[#allocation28_spill] sm:$0xff] %v3697_v27  ;;  %1682 = vperm.xlu0 %3049, %v3714_v16   ;;  %v3717_v27 = vpop.permute.xlu0 %493 }
 0x146   :  { %v3708_v13 = vpop.permute.xlu1 %241 }
 0x147   :  { %5153 = vst [vmem:[#allocation31_spill] sm:$0xff] %v3708_v13  ;;  %1652 = vperm.xlu0 %3049, %v3724_v2   ;;  %v3731_v13 = vld [vmem:[%s5145_s23 + $0x80] sm:$0xff]  ;;  %v3740_v21 = vpop.permute.xlu0 %557 }
 0x148   :  { %5157 = vst [vmem:[#allocation34_spill] sm:$0xff] %v3731_v13  ;;  %1642 = vperm.xlu1 %3051, %v3731_v13  }
 0x14b   :  { %v3719_v14 = vpop.permute.xlu1 %316  ;;  %v3748_v35 = vpop.permute.xlu0 %585 }
 0x14c   :  { %5155 = vst [vmem:[#allocation32_spill] sm:$0xff] %v3719_v14  ;;  %v3738_v14 = vld [vmem:[%s5145_s23 + $0xd0] sm:$0xff]  ;;  %3052 = vset.pattern.permute.xlu1 %v5154_v11  ;;  %5162 = vst [vmem:[#allocation38_spill] sm:$0xff] %v3748_v35  ;;  %v267_v35 = vmul.f32 %v3756_v6, %v3452_v30 }
 0x14d   :  { %5159 = vst [vmem:[#allocation36_spill] sm:$0xff] %v3738_v14  ;;  %1692 = vperm.xlu0 %3049, %v3738_v14   ;;  %1817 = vperm.xlu1 %3052, %v3731_v13   ;;  %v3761_v14 = vld [vmem:[%s5164_s0 + $0x1] ss:$0 sm:$0xff] }
 0x14e   :  { %v423_v24 = vmul.f32 %v3761_v14, %v3563_v8  ;;  %v431_v19 = vmul.f32 %v3761_v14, %v3459_v32  ;;  %v440_v9 = vmul.f32 %v3761_v14, %v3475_v36  ;;  %v276_v36 = vmul.f32 %v3756_v6, %v3522_v54 }
 0x14f   :  { %v3733_v37 = vpop.permute.xlu1 %408  ;;  %v3772_v13 = vpop.permute.xlu0 %533  ;;  %v425_v54 = vmul.f32 %v3761_v14, %v3572_v12  ;;  %v441_v12 = vmul.f32 %v3761_v14, %v3512_v50 }
 0x150   :  { %5158 = vst [vmem:[#allocation35_spill] sm:$0xff] %v3733_v37  ;;  %v463_v30 = vadd.f32 %v431_v19, %v266_v5  ;;  %v3821_v19 = vld [vmem:[%s5082_s3] ss:$0 sm:$0xff]  ;;  %v260_v5 = vmul.f32 %v3756_v6, %v3503_v47  ;;  %v447_v47 = vmul.f32 %v3761_v14, %v3490_v42  ;;  %v271_v42 = vmul.f32 %v3756_v6, %v3538_v61 }
 0x151   :  { %1821 = vperm.xlu1 %3052, %v1545_v52  }
 0x154   :  { %v3745_v2 = vpop.permute.xlu1 %509 }
 0x155   :  { %5161 = vst [vmem:[#allocation37_spill] sm:$0xff] %v3745_v2  ;;  %v258_v2 = vmul.f32 %v3756_v6, %v3486_v40  ;;  %v432_v40 = vmul.f32 %v3761_v14, %v3568_v10  ;;  %3053 = vset.pattern.permute.xlu1 %v5160_v25  ;;  %v3810_v25 = vpop.permute.xlu0 %537 }
 0x156   :  { %1612 = vperm.xlu1 %3053, %v3777_v7  }
 0x157   :  { %v455_v52 = vadd.f32 %v423_v24, %v258_v2  ;;  %v259_v24 = vmul.f32 %v3756_v6, %v3493_v43  ;;  %v464_v2 = vadd.f32 %v432_v40, %v267_v35  ;;  %v284_v40 = vmul.f32 %v3756_v6, %v3527_v56 }
 0x158   :  { %v3751_v37 = vpop.permute.xlu1 %601 }
 0x159   :  { %5163 = vst [vmem:[#allocation39_spill] sm:$0xff] %v3751_v37  ;;  %v3770_v37 = vld [vmem:[%s5164_s0 + $0x2] ss:$0 sm:$0xff] }
 0x15a   :  { %v620_v18 = vmul.f32 %v3770_v37, %v3495_v44  ;;  %v628_v32 = vmul.f32 %v3770_v37, %v3500_v46  ;;  %v629_v10 = vmul.f32 %v3770_v37, %v3505_v48  ;;  %v424_v44 = vmul.f32 %v3761_v14, %v3456_v31  ;;  %1687 = vperm.xlu1 %3053, %v3804_v29  }
 0x15b   :  { %v439_v46 = vmul.f32 %v3761_v14, %v3469_v34  ;;  %v275_v48 = vmul.f32 %v3756_v6, %v3497_v45  ;;  %v274_v31 = vmul.f32 %v3756_v6, %v3464_v33  ;;  %v282_v33 = vmul.f32 %v3756_v6, %v3514_v51 }
 0x15c   :  { %v660_v34 = vadd.f32 %v628_v32, %v463_v30  ;;  %v661_v35 = vadd.f32 %v629_v10, %v464_v2  ;;  %v3824_v45 = vadd.f32 %v424_v44, %v259_v24  ;;  %v636_v32 = vmul.f32 %v3770_v37, %v3520_v53 }
 0x15d   :  { %v3783_v8 = vpop.permute.xlu1 %206  ;;  %v433_v10 = vmul.f32 %v3761_v14, %v3488_v41  ;;  %v472_v24 = vadd.f32 %v440_v9, %v275_v48  ;;  %v268_v41 = vmul.f32 %v3756_v6, %v3481_v38  ;;  %v449_v9 = vmul.f32 %v3761_v14, %v3585_v17 }
 0x15e   :  { %5165 = vst [vmem:[#allocation40_spill] sm:$0xff] %v3783_v8  ;;  %v652_v8 = vadd.f32 %v620_v18, %v455_v52  ;;  %v471_v18 = vadd.f32 %v439_v46, %v274_v31  ;;  %v270_v52 = vmul.f32 %v3756_v6, %v3531_v58  ;;  %v699_v56 = vadd.f32 %v3821_v19, %v660_v34 }
 0x15f   :  { %v448_v58 = vmul.f32 %v3761_v14, %v3579_v15  ;;  %v700_v53 = vadd.f32 %v3821_v19, %v661_v35  ;;  %3054 = vset.pattern.permute.xlu1 %v5154_v11  ;;  %v283_v15 = vmul.f32 %v3756_v6, %v3483_v39  ;;  %v272_v30 = vmul.f32 %v3756_v6, %v3544_v63 }
 0x160   :  { %v3843_v51 = vadd.f32 %v3821_v19, %v652_v8  ;;  %v542_v8 = vpop.permute.xlu0 %541  ;;  %1793 = vperm.xlu1 %3054, %v3777_v7   ;;  %v3869_v38 = vmul.f32 %v3756_v6, %v3555_v4  ;;  %v668_v61 = vadd.f32 %v636_v32, %v471_v18  ;;  %v465_v46 = vadd.f32 %v433_v10, %v268_v41 }
 0x161   :  { %v479_v2 = vadd.f32 %v447_v47, %v282_v33  ;;  %v457_v48 = vadd.f32 %v425_v54, %v260_v5  ;;  %v731_v50 = vmax.f32 %v699_v56, 0.0  ;;  %v480_v31 = vadd.f32 %v448_v58, %v283_v15 }
 0x162   :  { %v3812_v43 = vpop.permute.xlu1 %573  ;;  %v723_v17 = vmax.f32 %v3843_v51, 0.0  ;;  %v732_v34 = vmax.f32 %v700_v53, 0.0  ;;  %v435_v35 = vmul.f32 %v3761_v14, %v3599_v23  ;;  %v3876_v29 = vadd.f32 %v449_v9, %v284_v40 }
 0x163   :  { %v473_v63 = vadd.f32 %v441_v12, %v276_v36  ;;  %v434_v4 = vmul.f32 %v3761_v14, %v3536_v60  ;;  %v630_v33 = vmul.f32 %v3770_v37, %v3546_v0  ;;  %v3885_v5 = vmul.f32 %v3761_v14, %v3591_v20  ;;  %v5168_v12 = vld [vmem:[#allocation6_spill] sm:$0xff] }
 0x164   :  { %1849 = vperm.xlu1 %3054, %v3714_v16   ;;  %v3888_v18 = vadd.f32 %v3821_v19, %v668_v61  ;;  %v622_v23 = vmul.f32 %v3770_v37, %v3541_v62  ;;  %v621_v36 = vmul.f32 %v3770_v37, %v3717_v27  ;;  %v269_v60 = vmul.f32 %v3756_v6, %v3529_v57  ;;  %v546_v40 = vpop.permute.xlu0 %545  ;;  %v5169_v61 = vld [vmem:[#allocation38_spill] sm:$0xff] }
 0x165   :  { %v436_v0 = vmul.f32 %v3761_v14, %v3618_v49  ;;  %v637_v16 = vmul.f32 %v3770_v37, %v3740_v21  ;;  %v631_v20 = vmul.f32 %v3770_v37, %v3772_v13  ;;  %v768_v32 = vadd.f32 %v732_v34, %v731_v50  ;;  %v5170_v50 = vld [vmem:[#allocation17_spill] sm:$0xff] }
 0x166   :  { %v467_v10 = vadd.f32 %v435_v35, %v270_v52  ;;  %v261_v62 = vmul.f32 %v3756_v6, %v3525_v55  ;;  %v3906_v27 = vmul.f32 %v3761_v14, %v3607_v28  ;;  %v466_v57 = vadd.f32 %v434_v4, %v269_v60  ;;  %v5171_v4 = vld [vmem:[#allocation24_spill] sm:$0xff] }
 0x167   :  { %v3851_v44 = vpop.permute.xlu1 %131  ;;  %v437_v49 = vmul.f32 %v3761_v14, %v3641_v3  ;;  %v662_v47 = vadd.f32 %v630_v33, %v465_v46  ;;  %v632_v21 = vmul.f32 %v3770_v37, %v3810_v25  ;;  %v5167_v13 = vmov 2  }
 0x168   :  { %3055 = vset.pattern.permute.xlu1 %v5167_v13  ;;  %v739_v52 = vmax.f32 %v3888_v18, 0.0  ;;  %v654_v56 = vadd.f32 %v622_v23, %v457_v48  ;;  %v645_v55 = vmul.f32 %v3770_v37, %v3550_v1  ;;  %v653_v28 = vadd.f32 %v621_v36, %v3824_v45  ;;  %v550_v48 = vpop.permute.xlu0 %549  ;;  %v5172_v23 = vld [vmem:[#allocation11_spill] sm:$0xff] }
 0x169   :  { %1945 = vperm.xlu1 %3055, %v3673_v22   ;;  %v468_v58 = vadd.f32 %v436_v0, %v271_v42  ;;  %v669_v3 = vadd.f32 %v637_v16, %v472_v24  ;;  %v663_v53 = vadd.f32 %v631_v20, %v466_v57  ;;  %v633_v41 = vmul.f32 %v3770_v37, %v542_v8 }
 0x16a   :  { %v426_v25 = vmul.f32 %v3761_v14, %v3534_v59  ;;  %v438_v9 = vmul.f32 %v3761_v14, %v3665_v26  ;;  %v638_v15 = vmul.f32 %v3770_v37, %v5168_v12  ;;  %v644_v1 = vmul.f32 %v3770_v37, %v5169_v61 }
 0x16b   :  { %v3874_v39 = vpop.permute.xlu1 %246  ;;  %v469_v45 = vadd.f32 %v437_v49, %v272_v30  ;;  %v701_v46 = vadd.f32 %v3821_v19, %v662_v47  ;;  %v664_v42 = vadd.f32 %v632_v21, %v467_v10  ;;  %v634_v24 = vmul.f32 %v3770_v37, %v546_v40  ;;  %v5173_v49 = vld [vmem:[#allocation21_spill] sm:$0xff] }
 0x16c   :  { %v3935_v59 = vmul.f32 %v3761_v14, %v5170_v50  ;;  %v693_v26 = vadd.f32 %v3821_v19, %v654_v56  ;;  %v677_v34 = vadd.f32 %v645_v55, %v480_v31  ;;  %v692_v35 = vadd.f32 %v3821_v19, %v653_v28  ;;  %v5178_v50 = vld [vmem:[#allocation12_spill] sm:$0xff] }
 0x16d   :  { %1977 = vperm.xlu1 %3055, %v5171_v4   ;;  %v708_v30 = vadd.f32 %v3821_v19, %v669_v3  ;;  %v702_v33 = vadd.f32 %v3821_v19, %v663_v53  ;;  %v665_v18 = vadd.f32 %v633_v41, %v468_v58  ;;  %v623_v36 = vmul.f32 %v3770_v37, %v5172_v23  ;;  %v5175_v3 = vld [vmem:[#allocation5_spill] sm:$0xff] }
 0x16e   :  { %v470_v60 = vadd.f32 %v438_v9, %v3869_v38  ;;  %v670_v0 = vadd.f32 %v638_v15, %v473_v63  ;;  %v676_v16 = vadd.f32 %v644_v1, %v479_v2  ;;  %v635_v20 = vmul.f32 %v3770_v37, %v550_v48  ;;  %v5174_v38 = vld [vmem:[#allocation27_spill] sm:$0xff]  ;;  %v5176_v15 = vld [vmem:[#allocation26_spill] sm:$0xff] }
 0x16f   :  { %v458_v40 = vadd.f32 %v426_v25, %v261_v62  ;;  %v733_v31 = vmax.f32 %v701_v46, 0.0  ;;  %v703_v10 = vadd.f32 %v3821_v19, %v664_v42  ;;  %v666_v57 = vadd.f32 %v634_v24, %v469_v45  ;;  %v5177_v42 = vld [vmem:[#allocation30_spill] sm:$0xff] }
 0x170   :  { %v3912_v54 = vpop.permute.xlu1 %320  ;;  %v3949_v47 = vmul.f32 %v3761_v14, %v5173_v49  ;;  %v725_v21 = vmax.f32 %v693_v26, 0.0  ;;  %v716_v56 = vadd.f32 %v3821_v19, %v677_v34  ;;  %v724_v55 = vmax.f32 %v692_v35, 0.0 }
 0x171   :  { %1981 = vperm.xlu1 %3055, %v5174_v38   ;;  %v740_v2 = vmax.f32 %v708_v30, 0.0  ;;  %v734_v63 = vmax.f32 %v702_v33, 0.0  ;;  %v704_v62 = vadd.f32 %v3821_v19, %v665_v18  ;;  %v655_v58 = vadd.f32 %v623_v36, %v458_v40  ;;  %v5179_v33 = vld [vmem:[#allocation33_spill] sm:$0xff] }
 0x172   :  { %v277_v53 = vmul.f32 %v3756_v6, %v5175_v3  ;;  %v709_v41 = vadd.f32 %v3821_v19, %v670_v0  ;;  %v715_v25 = vadd.f32 %v3821_v19, %v676_v16  ;;  %v667_v9 = vadd.f32 %v635_v20, %v470_v60  ;;  %v5180_v60 = vld [vmem:[#allocation9_spill] sm:$0xff]  ;;  %v5181_v16 = vld [vmem:[#allocation10_spill] sm:$0xff] }
 0x173   :  { %v769_v12 = vadd.f32 %v768_v32, %v733_v31  ;;  %v3962_v61 = vmul.f32 %v3761_v14, %v5176_v15  ;;  %v735_v1 = vmax.f32 %v703_v10, 0.0  ;;  %v705_v45 = vadd.f32 %v3821_v19, %v666_v57  ;;  %v5182_v31 = vld [vmem:[#allocation7_spill] sm:$0xff]  ;;  %v5183_v57 = vld [vmem:[#allocation8_spill] sm:$0xff] }
 0x174   :  { %v3931_v8 = vpop.permute.xlu1 %412  ;;  %v748_v46 = vmax.f32 %v716_v56, 0.0  ;;  %v3967_v24 = vmul.f32 %v3761_v14, %v5177_v42  ;;  %v755_v48 = vadd.f32 %v724_v55, %v723_v17  ;;  %v646_v26 = vmul.f32 %v3770_v37, %v5178_v50  ;;  %v614_v56 = vpop.permute.xlu0 %613  ;;  %v5188_v50 = vld [vmem:[#allocation13_spill] sm:$0xff] }
 0x175   :  { %3056 = vset.pattern.permute.xlu1 %v5154_v11  ;;  %v781_v32 = vadd.f32 %v740_v2, %v739_v52  ;;  %v770_v35 = vadd.f32 %v769_v12, %v734_v63  ;;  %v736_v4 = vmax.f32 %v704_v62, 0.0  ;;  %v694_v30 = vadd.f32 %v3821_v19, %v655_v58  ;;  %v5184_v62 = vld [vmem:[#allocation20_spill] sm:$0xff]  ;;  %v5187_v12 = vld [vmem:[#allocation34_spill] sm:$0xff] }
 0x176   :  { %1825 = vperm.xlu1 %3056, %v5179_v33   ;;  %v474_v18 = vadd.f32 %v3885_v5, %v277_v53  ;;  %v741_v23 = vmax.f32 %v709_v41, 0.0  ;;  %v747_v36 = vmax.f32 %v715_v25, 0.0  ;;  %v706_v51 = vadd.f32 %v3821_v19, %v667_v9  ;;  %v5185_v41 = vld [vmem:[#allocation14_spill] sm:$0xff] }
 0x177   :  { %v771_v17 = vadd.f32 %v770_v35, %v735_v1  ;;  %v427_v0 = vmul.f32 %v3761_v14, %v5180_v60  ;;  %v450_v20 = vmul.f32 %v3761_v14, %v5181_v16  ;;  %v737_v52 = vmax.f32 %v705_v45, 0.0  ;;  %v5186_v9 = vld [vmem:[#allocation18_spill] sm:$0xff]  ;;  %v5190_v35 = vld [vmem:[#allocation37_spill] sm:$0xff]  ;;  %v5192_v60 = vld [vmem:[#allocation32_spill] sm:$0xff] }
 0x178   :  { %v756_v40 = vadd.f32 %v755_v48, %v725_v21  ;;  %v262_v10 = vmul.f32 %v3756_v6, %v5182_v31  ;;  %v285_v49 = vmul.f32 %v3756_v6, %v5183_v57  ;;  %v678_v5 = vadd.f32 %v646_v26, %v3876_v29  ;;  %v5189_v26 = vld [vmem:[#allocation15_spill] sm:$0xff]  ;;  %v5193_v31 = vld [vmem:[#allocation22_spill] sm:$0xff] }
 0x179   :  { %v3952_v28 = vpop.permute.xlu1 %513  ;;  %v3989_v55 = vadd.f32 %v781_v32, %v741_v23  ;;  %v772_v2 = vadd.f32 %v771_v17, %v736_v4  ;;  %v726_v63 = vmax.f32 %v694_v30, 0.0  ;;  %v624_v58 = vmul.f32 %v3770_v37, %v5184_v62  ;;  %v4014_v30 = vld [vmem:[%s5145_s23 + $0x18] sm:$0xff] }
 0x17a   :  { %3057 = vset.pattern.permute.xlu1 %v5167_v13  ;;  %v794_v21 = vadd.f32 %v748_v46, %v747_v36  ;;  %v738_v53 = vmax.f32 %v706_v51, 0.0  ;;  %v639_v25 = vmul.f32 %v3770_v37, %v5185_v41  ;;  %v428_v29 = vmul.f32 %v3761_v14, %v5186_v9  ;;  %v5191_v36 = vld [vmem:[#allocation19_spill] sm:$0xff] }
 0x17b   :  { %2009 = vperm.xlu1 %3057, %v5187_v12   ;;  %v459_v15 = vadd.f32 %v427_v0, %v262_v10  ;;  %v482_v1 = vadd.f32 %v450_v20, %v285_v49  ;;  %v773_v45 = vadd.f32 %v772_v2, %v737_v52  ;;  %v4002_v42 = vmul.f32 %v3770_v37, %v614_v56  ;;  %v5196_v56 = vld [vmem:[#allocation28_spill] sm:$0xff] }
 0x17c   :  { %v717_v48 = vadd.f32 %v3821_v19, %v678_v5  ;;  %v278_v46 = vmul.f32 %v3756_v6, %v5188_v50  ;;  %v263_v32 = vmul.f32 %v3756_v6, %v5189_v26  ;;  %v625_v4 = vmul.f32 %v3770_v37, %v5190_v35  ;;  %v5195_v5 = vld [vmem:[#allocation16_spill] sm:$0xff] }
 0x17d   :  { %v3973_v34 = vpop.permute.xlu1 %605  ;;  %v757_v23 = vadd.f32 %v756_v40, %v726_v63  ;;  %v451_v51 = vmul.f32 %v3761_v14, %v5191_v36  ;;  %v656_v17 = vadd.f32 %v624_v58, %v459_v15  ;;  %v429_v0 = vmul.f32 %v3761_v14, %v5192_v60  ;;  %v5197_v63 = vld [vmem:[#allocation35_spill] sm:$0xff] }
 0x17e   :  { %v4020_v16 = vadd.f32 %v773_v45, %v738_v53  ;;  %v671_v20 = vadd.f32 %v639_v25, %v474_v18  ;;  %v460_v52 = vadd.f32 %v428_v29, %v263_v32  ;;  %v647_v10 = vmul.f32 %v3770_v37, %v5193_v31  ;;  %v5198_v25 = vld [vmem:[#allocation39_spill] sm:$0xff]  ;;  %v4040_v29 = vld [vmem:[%s5145_s23 + $0x58] sm:$0xff] }
 0x17f   :  { %v5194_v49 = vmov 0   ;;  %v286_v40 = vmul.f32 %v3756_v6, %v5195_v5  ;;  %v264_v2 = vmul.f32 %v3756_v6, %v5196_v56  ;;  %v452_v62 = vmul.f32 %v3761_v14, %v5197_v63  ;;  %v5199_v45 = vld [vmem:[#allocation31_spill] sm:$0xff] }
 0x180   :  { %3058 = vset.pattern.permute.xlu1 %v5194_v49  ;;  %v626_v58 = vmul.f32 %v3770_v37, %v3952_v28  ;;  %v749_v18 = vmax.f32 %v717_v48, 0.0  ;;  %v475_v53 = vadd.f32 %v3906_v27, %v278_v46  ;;  %v657_v41 = vadd.f32 %v625_v4, %v460_v52  ;;  %v5200_v48 = vld [vmem:[#allocation23_spill] sm:$0xff]  ;;  %v5201_v46 = vld [vmem:[#allocation25_spill] sm:$0xff]  ;;  %v5202_v52 = vld [vmem:[#allocation40_spill] sm:$0xff] }
 0x181   :  { %1577 = vperm.xlu1 %3058, %v4014_v30   ;;  %v648_v9 = vmul.f32 %v3770_v37, %v5198_v25  ;;  %v483_v12 = vadd.f32 %v451_v51, %v286_v40  ;;  %v695_v15 = vadd.f32 %v3821_v19, %v656_v17  ;;  %v287_v28 = vmul.f32 %v3756_v6, %v5199_v45 }
 0x182   :  { %v3993_v3 = vpop.permute.xlu1 %211  ;;  %v461_v50 = vadd.f32 %v429_v0, %v264_v2  ;;  %v679_v26 = vadd.f32 %v647_v10, %v482_v1  ;;  %v279_v27 = vmul.f32 %v3756_v6, %v5200_v48  ;;  %v640_v32 = vmul.f32 %v3770_v37, %v5201_v46 }
 0x183   :  { %v649_v35 = vmul.f32 %v3770_v37, %v3973_v34  ;;  %v775_v4 = vrot.slane %v4020_v16, 4  ;;  %v710_v36 = vadd.f32 %v3821_v19, %v671_v20  ;;  %v484_v51 = vadd.f32 %v452_v62, %v287_v28 }
 0x184   :  { %v658_v17 = vadd.f32 %v626_v58, %v461_v50  ;;  %v696_v1 = vadd.f32 %v3821_v19, %v657_v41  ;;  %v680_v0 = vadd.f32 %v648_v9, %v483_v12  ;;  %v280_v31 = vmul.f32 %v3756_v6, %v5202_v52 }
 0x185   :  { %1617 = vperm.xlu1 %3058, %v4040_v29   ;;  %v641_v10 = vmul.f32 %v3770_v37, %v3812_v43  ;;  %v795_v5 = vadd.f32 %v794_v21, %v749_v18  ;;  %v727_v34 = vmax.f32 %v695_v15, 0.0  ;;  %v430_v40 = vmul.f32 %v3761_v14, %v3912_v54 }
 0x186   :  { %v718_v56 = vadd.f32 %v3821_v19, %v679_v26  ;;  %v476_v2 = vadd.f32 %v3935_v59, %v279_v27  ;;  %v672_v63 = vadd.f32 %v640_v32, %v475_v53  ;;  %v681_v62 = vadd.f32 %v649_v35, %v484_v51 }
 0x187   :  { %v578_v57 = vpop.permute.xlu1 %577  ;;  %v742_v58 = vmax.f32 %v710_v36, 0.0  ;;  %v265_v41 = vmul.f32 %v3756_v6, %v3851_v44  ;;  %v697_v25 = vadd.f32 %v3821_v19, %v658_v17  ;;  %v728_v21 = vmax.f32 %v696_v1, 0.0 }
 0x188   :  { %v642_v43 = vmul.f32 %v3770_v37, %v578_v57  ;;  %v719_v54 = vadd.f32 %v3821_v19, %v680_v0  ;;  %v477_v18 = vadd.f32 %v3949_v47, %v280_v31  ;;  %v673_v9 = vadd.f32 %v641_v10, %v476_v2 }
 0x189   :  { %3059 = vset.pattern.permute.xlu1 %v5154_v11  ;;  %v462_v59 = vadd.f32 %v430_v40, %v265_v41  ;;  %v453_v53 = vmul.f32 %v3761_v14, %v3931_v8  ;;  %v758_v57 = vadd.f32 %v757_v23, %v727_v34  ;;  %v750_v45 = vmax.f32 %v718_v56, 0.0 }
 0x18a   :  { %1765 = vperm.xlu1 %3059, %v4014_v30   ;;  %v711_v28 = vadd.f32 %v3821_v19, %v672_v63  ;;  %v720_v50 = vadd.f32 %v3821_v19, %v681_v62  ;;  %v288_v47 = vmul.f32 %v3756_v6, %v3874_v39  ;;  %v729_v26 = vmax.f32 %v697_v25, 0.0  ;;  %v5203_v63 = vld [vmem:[#allocation29_spill] sm:$0xff] }
 0x18b   :  { %v674_v48 = vadd.f32 %v642_v43, %v477_v18  ;;  %v759_v46 = vadd.f32 %v758_v57, %v728_v21  ;;  %v751_v32 = vmax.f32 %v719_v54, 0.0  ;;  %v712_v8 = vadd.f32 %v3821_v19, %v673_v9 }
 0x18c   :  { %v252_v60 = vpop.permute.xlu1 %251  ;;  %v485_v23 = vadd.f32 %v453_v53, %v288_v47  ;;  %v776_v17 = vadd.f32 %v775_v4, %v4020_v16  ;;  %v743_v1 = vmax.f32 %v711_v28, 0.0  ;;  %v752_v0 = vmax.f32 %v720_v50, 0.0  ;;  %v5204_v47 = vld [vmem:[#allocation41_spill] sm:$0xff] }
 0x18d   :  { %v289_v20 = vmul.f32 %v3756_v6, %v252_v60  ;;  %v796_v60 = vadd.f32 %v795_v5, %v750_v45  ;;  %v760_v52 = vadd.f32 %v759_v46, %v729_v26  ;;  %v713_v31 = vadd.f32 %v3821_v19, %v674_v48 }
 0x18e   :  { %1797 = vperm.xlu1 %3059, %v4040_v29   ;;  %v783_v34 = vadd.f32 %v3989_v55, %v742_v58  ;;  %v777_v62 = vrot.slane %v776_v17, 2 }
 0x18f   :  { %v486_v44 = vadd.f32 %v3967_v24, %v289_v20  ;;  %v281_v24 = vmul.f32 %v3756_v6, %v3993_v3  ;;  %v797_v40 = vadd.f32 %v796_v60, %v751_v32  ;;  %v744_v20 = vmax.f32 %v712_v8, 0.0 }
 0x190   :  { %v784_v41 = vadd.f32 %v783_v34, %v743_v1  ;;  %v745_v55 = vmax.f32 %v713_v31, 0.0 }
 0x191   :  { %v518_v12 = vpop.permute.xlu1 %517  ;;  %v683_v36 = vadd.f32 %v4002_v42, %v486_v44  ;;  %v478_v42 = vadd.f32 %v3962_v61, %v281_v24  ;;  %v798_v25 = vadd.f32 %v797_v40, %v752_v0 }
 0x192   :  { %v627_v15 = vmul.f32 %v3770_v37, %v518_v12  ;;  %3060 = vset.pattern.permute.xlu1 %v5167_v13  ;;  %v785_v61 = vadd.f32 %v784_v41, %v744_v20 }
 0x193   :  { %v722_v2 = vadd.f32 %v3821_v19, %v683_v36  ;;  %1953 = vperm.xlu1 %3060, %v5203_v63  }
 0x194   :  { %v659_v27 = vadd.f32 %v627_v15, %v462_v59  ;;  %v778_v59 = vadd.f32 %v777_v62, %v776_v17  ;;  %v786_v53 = vadd.f32 %v785_v61, %v745_v55  ;;  %v5206_v55 = vld [vmem:[#allocation36_spill] sm:$0xff] }
 0x195   :  { %v610_v35 = vpop.permute.xlu1 %609  ;;  %v754_v54 = vmax.f32 %v722_v2, 0.0 }
 0x196   :  { %v698_v51 = vadd.f32 %v3821_v19, %v659_v27  ;;  %v650_v39 = vmul.f32 %v3770_v37, %v610_v35  ;;  %v779_v26 = vrot.slane %v778_v59, 1 }
 0x197   :  { %1985 = vperm.xlu1 %3060, %v3777_v7  }
 0x198   :  { %v730_v10 = vmax.f32 %v698_v51, 0.0  ;;  %v682_v3 = vadd.f32 %v650_v39, %v485_v23  ;;  %v780_v24 = vadd.f32 %v779_v26, %v778_v59  ;;  %v1549_v26 = vld [vmem:[%s5145_s23 + $0xa8] sm:$0xff] }
 0x199   :  { %v582_v56 = vpop.permute.xlu1 %581 }
 0x19a   :  { %v761_v16 = vadd.f32 %v760_v52, %v730_v10  ;;  %v721_v4 = vadd.f32 %v3821_v19, %v682_v3  ;;  %v643_v5 = vmul.f32 %v3770_v37, %v582_v56  ;;  %v809_v17 = vmul.f32 0.015625, %v780_v24  ;;  %v1532_v10 = vld [vmem:[%s5145_s23 + $0x20] sm:$0xff]  ;;  %v4230_v24 = vld [vmem:[%s5145_s23 + $0x30] sm:$0xff] }
 0x19b   :  { %2045 = vperm.xlu1 %3060, %v5204_v47  }
 0x19c   :  { %v762_v58 = vrot.slane %v761_v16, 4  ;;  %v753_v43 = vmax.f32 %v721_v4, 0.0  ;;  %v675_v21 = vadd.f32 %v643_v5, %v478_v42  ;;  %v813_v3 = vpack.c.bf16 %v809_v17, %v809_v17 }
 0x19e   :  { %v763_v18 = vadd.f32 %v762_v58, %v761_v16  ;;  %v799_v9 = vadd.f32 %v798_v25, %v753_v43  ;;  %v714_v12 = vadd.f32 %v3821_v19, %v675_v21  ;;  %v4102_v19 = vld [vmem:[%s5145_s23 + $0x98] sm:$0xff]  ;;  %v837_v56 = vunpack.c.l.b16 %v813_v3  ;;  %v4127_v58 = vld [vmem:[%s5145_s23 + $0xa0] sm:$0xff]  ;;  %v4140_v43 = vpop.permute.xlu1 %1562 }
 0x19f   :  { %3061 = vset.pattern.permute.xlu1 %v5194_v49  ;;  %v5205_v25 = vmov 0.0   ;;  %v4145_v21 = vld [vmem:[%s5145_s23 + $0xe0] sm:$0xff] }
 0x1a0   :  { %v764_v44 = vrot.slane %v763_v18, 2  ;;  %v800_v15 = vadd.f32 %v799_v9, %v754_v54  ;;  %v746_v57 = vmax.f32 %v714_v12, 0.0  ;;  %1657 = vperm.xlu1 %3061, %v4102_v19   ;;  %v3095_v54 = vld [vmem:[%s5086_s7 + $0x38] sm:$0xff]   ;;  %v3096_v9 = vld [vmem:[%s5086_s7 + $0x30] sm:$0xff]   ;;  %v4165_v12 = vld [vmem:[%s5145_s23 + $0x60] sm:$0xff] }
 0x1a1   :  { %2820 = vmatpush3.bf16.msra.mxu1 %v3095_v54  ;;  %1622 = vperm.xlu0 %3049, %v4165_v12   ;;  %v3152_v54 = vld [vmem:[%s5145_s23 + $0x88] sm:$0xff] }
 0x1a2   :  { %v765_v45 = vadd.f32 %v764_v44, %v763_v18  ;;  %v801_v28 = vrot.slane %v800_v15, 4  ;;  %v787_v50 = vadd.f32 %v786_v53, %v746_v57  ;;  %2821 = vmatprep.subr.bf16.mxu1 %v5205_v25  ;;  %v3097_v53 = vld [vmem:[%s5086_s7 + $0x28] sm:$0xff]   ;;  %v3098_v57 = vld [vmem:[%s5086_s7 + $0x20] sm:$0xff]  }
 0x1a3   :  { %v4178_v44 = vld [vmem:[%s5145_s23 + $0x68] sm:$0xff] }
 0x1a4   :  { %v766_v48 = vrot.slane %v765_v45, 1  ;;  %v802_v27 = vadd.f32 %v801_v28, %v800_v15  ;;  %v788_v46 = vrot.slane %v787_v50, 4  ;;  %3062 = vset.pattern.permute.xlu1 %v5167_v13 }
 0x1a5   :  { %2017 = vperm.xlu1 %3062, %v5179_v33   ;;  %v1555_v33 = vld [vmem:[%s5145_s23 + $0xd8] sm:$0xff]  ;;  %2822 = vmatpush3.bf16.msra.mxu1 %v3096_v9 }
 0x1a6   :  { %v767_v7 = vadd.f32 %v766_v48, %v765_v45  ;;  %v789_v32 = vadd.f32 %v788_v46, %v787_v50  ;;  %v803_v8 = vrot.slane %v802_v27, 2  ;;  %2823 = vmatprep.subr.bf16.mxu1 %v5205_v25  ;;  %1627 = vperm.xlu0 %3049, %v4178_v44   ;;  %v4190_v45 = vld [vmem:[%s5145_s23 + $0x70] sm:$0xff]  ;;  %v3099_v50 = vld [vmem:[%s5086_s7 + $0x18] sm:$0xff]  }
 0x1a7   :  { %v4206_v48 = vld [vmem:[%s5145_s23 + $0x78] sm:$0xff]  ;;  %v3100_v46 = vld [vmem:[%s5086_s7 + $0x10] sm:$0xff]  }
 0x1a8   :  { %v790_v35 = vrot.slane %v789_v32, 2  ;;  %v804_v23 = vadd.f32 %v803_v8, %v802_v27  ;;  %v808_v36 = vmul.f32 0.015625, %v767_v7 }
 0x1a9   :  { %3063 = vset.pattern.permute.xlu1 %v5194_v49  ;;  %2824 = vmatpush3.bf16.msra.mxu1 %v3097_v53 }
 0x1aa   :  { %v791_v51 = vadd.f32 %v790_v35, %v789_v32  ;;  %v805_v39 = vrot.slane %v804_v23, 1  ;;  %v812_v0 = vpack.c.bf16 %v808_v36, %v808_v36  ;;  %1582 = vperm.xlu1 %3063, %v1532_v10   ;;  %2825 = vmatprep.subr.bf16.mxu1 %v5205_v25  ;;  %v3101_v32 = vld [vmem:[%s5086_s7 + $0x8] sm:$0xff]   ;;  %v3102_v35 = vld [vmem:[%s5086_s7] sm:$0xff]  }
 0x1ab   :  { %v4148_v61 = vpop.permute.xlu1 %1602  ;;  %1632 = vperm.xlu0 %3049, %v4190_v45  }
 0x1ac   :  { %v792_v60 = vrot.slane %v791_v51, 1  ;;  %v806_v1 = vadd.f32 %v805_v39, %v804_v23  ;;  %v836_v20 = vunpack.c.l.b16 %v812_v0  ;;  %v4244_v23 = vld [vmem:[%s5145_s23 + $0xe8] sm:$0xff]  ;;  %v4273_v39 = vld [vmem:[%s5145_s23 + $0xb0] sm:$0xff]  ;;  %v4287_v0 = vpop.permute.xlu0 %1567 }
 0x1ad   :  { %2826 = vmatpush3.bf16.msra.mxu1 %v3098_v57  ;;  %v3153_v57 = vld [vmem:[%s5145_s23 + $0xc0] sm:$0xff] }
 0x1ae   :  { %v793_v52 = vadd.f32 %v792_v60, %v791_v51  ;;  %v811_v31 = vmul.f32 0.015625, %v806_v1  ;;  %v841_v4 = vsel %vm840_vm1, %v837_v56, %v836_v20  ;;  %1697 = vperm.xlu1 %3063, %v1555_v33   ;;  %2827 = vmatprep.subr.bf16.mxu1 %v5205_v25  ;;  %v4284_v1 = vld [vmem:[%s5145_s23 + $0x38] sm:$0xff] }
 0x1af   :  { %v4155_v18 = vpop.permute.xlu1 %1607  ;;  %1637 = vperm.xlu0 %3049, %v4206_v48  }
 0x1b0   :  { %v810_v34 = vmul.f32 0.015625, %v793_v52  ;;  %v815_v40 = vpack.c.bf16 %v811_v31, %v811_v31  ;;  %v4294_v31 = vld [vmem:[%s5145_s23 + $0xf0] sm:$0xff] }
 0x1b1   :  { %2828 = vmatpush3.bf16.msra.mxu1 %v3099_v50 }
 0x1b2   :  { %v814_v42 = vpack.c.bf16 %v810_v34, %v810_v34  ;;  %v839_v16 = vunpack.c.l.b16 %v815_v40  ;;  %3064 = vset.pattern.permute.xlu1 %v5154_v11  ;;  %2829 = vmatprep.subr.bf16.mxu1 %v5205_v25  ;;  %v4299_v34 = vpop.permute.xlu0 %1647 }
 0x1b3   :  { %1769 = vperm.xlu1 %3064, %v1532_v10   ;;  %3079 = vset.pattern.permute.xlu0 %v5154_v11 }
 0x1b4   :  { %v838_v2 = vunpack.c.l.b16 %v814_v42  ;;  %v4167_v59 = vpop.permute.xlu1 %1757  ;;  %1753 = vperm.xlu0 %3079, %v3673_v22  }
 0x1b5   :  { %2830 = vmatpush3.bf16.msra.mxu1 %v3100_v46 }
 0x1b6   :  { %v843_v5 = vsel %vm842_vm2, %v838_v2, %v841_v4  ;;  %2831 = vmatprep.subr.bf16.mxu1 %v5205_v25 }
 0x1b7   :  { %v845_v62 = vsel %vm844_vm3, %v839_v16, %v843_v5  ;;  %1861 = vperm.xlu1 %3064, %v1555_v33   ;;  %v4322_v5 = vld [vmem:[%s5145_s23 + $0xf8] sm:$0xff] }
 0x1b8   :  { %v846_v41 = vpack.c.b16 %v845_v62, %v845_v62  ;;  %v4180_v15 = vpop.permute.xlu1 %1785  ;;  %1789 = vperm.xlu0 %3079, %v5174_v38  }
 0x1b9   :  { %2832 = vmatpush3.bf16.msra.mxu1 %v3101_v32 }
 0x1ba   :  { %2816 = vmatmul.mubr.bf16.vlgmr.msra.gmra.mxu0 %v846_v41  ;;  %2833 = vmatprep.subr.bf16.mxu1 %v5205_v25  ;;  %v4315_v16 = vpop.permute.xlu0 %1572 }
 0x1bb   :  { %2855 = vmatprep.mubr.msk.bf16.mxu0 %vm3190_vm0, %v5205_v25  ;;  %3065 = vset.pattern.permute.xlu1 %v5167_v13 }
 0x1bc   :  { %1957 = vperm.xlu1 %3065, %v4014_v30   ;;  %v4137_v30 = vld [vmem:[%s5145_s23 + $0x28] sm:$0xff]  ;;  %1761 = vperm.xlu0 %3079, %v5203_v63  }
 0x1bd   :  { %2834 = vmatpush3.bf16.msra.mxu1 %v3102_v35 }
 0x1be   :  { %2859 = vmatprep.subr.bf16.mxu1 %v5205_v25  ;;  %v4330_v41 = vpop.permute.xlu0 %1682 }
 0x1c0   :  { %2049 = vperm.xlu1 %3065, %v5206_v55   ;;  %1853 = vperm.xlu0 %3079, %v5204_v47  }
 0x1c3   :  { %v4192_v28 = vpop.permute.xlu1 %1642 }
 0x1c4   :  { %3066 = vset.pattern.permute.xlu1 %v5194_v49  ;;  %1857 = vperm.xlu0 %3079, %v5206_v55   ;;  %v3151_v55 = vld [vmem:[%s5145_s23 + $0x8] sm:$0xff] }
 0x1c5   :  { %1662 = vperm.xlu1 %3066, %v4127_v58  }
 0x1c8   :  { %v4208_v27 = vpop.permute.xlu1 %1817  ;;  %1829 = vperm.xlu0 %3079, %v4102_v19  }
 0x1c9   :  { %3067 = vset.pattern.permute.xlu1 %v5167_v13 }
 0x1ca   :  { %2021 = vperm.xlu1 %3067, %v4102_v19  }
 0x1cc   :  { %v4216_v7 = vpop.permute.xlu1 %1821  ;;  %1801 = vperm.xlu0 %3079, %v4165_v12  }
 0x1ce   :  { %3068 = vset.pattern.permute.xlu1 %v5194_v49 }
 0x1cf   :  { %1587 = vperm.xlu1 %3068, %v4137_v30  }
 0x1d0   :  { %1833 = vperm.xlu0 %3079, %v4127_v58  }
 0x1d1   :  { %v4225_v8 = vpop.permute.xlu1 %1612 }
 0x1d3   :  { %1702 = vperm.xlu1 %3068, %v4145_v21  }
 0x1d4   :  { %1805 = vperm.xlu0 %3079, %v4178_v44  }
 0x1d5   :  { %v4239_v22 = vpop.permute.xlu1 %1687 }
 0x1d7   :  { %3069 = vset.pattern.permute.xlu1 %v5154_v11 }
 0x1d8   :  { %1773 = vperm.xlu1 %3069, %v4137_v30   ;;  %1837 = vperm.xlu0 %3079, %v1549_v26  }
 0x1db   :  { %v4249_v36 = vpop.permute.xlu1 %1793 }
 0x1dc   :  { %1865 = vperm.xlu1 %3069, %v4145_v21   ;;  %1809 = vperm.xlu0 %3079, %v4190_v45  }
 0x1df   :  { %v4254_v38 = vpop.permute.xlu1 %1849 }
 0x1e0   :  { %3070 = vset.pattern.permute.xlu1 %v5167_v13  ;;  %1841 = vperm.xlu0 %3079, %v4273_v39  }
 0x1e1   :  { %1961 = vperm.xlu1 %3070, %v1532_v10  }
 0x1e4   :  { %v4258_v51 = vpop.permute.xlu1 %1945  ;;  %1813 = vperm.xlu0 %3079, %v4206_v48  }
 0x1e5   :  { %2053 = vperm.xlu1 %3070, %v1555_v33   ;;  %v4309_v33 = vld [vmem:[%s5145_s23 + $0xb8] sm:$0xff] }
 0x1e8   :  { %v4262_v63 = vpop.permute.xlu1 %1977  ;;  %1845 = vperm.xlu0 %3079, %v4309_v33  }
 0x1e9   :  { %3071 = vset.pattern.permute.xlu1 %v5194_v49 }
 0x1ea   :  { %1667 = vperm.xlu1 %3071, %v1549_v26  }
 0x1ec   :  { %v4266_v47 = vpop.permute.xlu1 %1981  ;;  %1877 = vperm.xlu0 %3079, %v4322_v5  }
 0x1ee   :  { %3072 = vset.pattern.permute.xlu1 %v5167_v13 }
 0x1ef   :  { %2025 = vperm.xlu1 %3072, %v4127_v58  }
 0x1f0   :  { %3085 = vset.pattern.permute.xlu0 %v5167_v13 }
 0x1f1   :  { %v1826_v19 = vpop.permute.xlu1 %1825  ;;  %1949 = vperm.xlu0 %3085, %v3151_v55  }
 0x1f3   :  { %3073 = vset.pattern.permute.xlu1 %v5194_v49 }
 0x1f4   :  { %1592 = vperm.xlu1 %3073, %v4230_v24  }
 0x1f5   :  { %2013 = vperm.xlu0 %3085, %v3152_v54  }
 0x1f6   :  { %v4278_v17 = vpop.permute.xlu1 %2009 }
 0x1f8   :  { %1707 = vperm.xlu1 %3073, %v4244_v23  }
 0x1f9   :  { %2041 = vperm.xlu0 %3085, %v3153_v57  }
 0x1fc   :  { %3074 = vset.pattern.permute.xlu1 %v5154_v11  ;;  %v1578_v60 = vpop.permute.xlu1 %1577 }
 0x1fd   :  { %1777 = vperm.xlu1 %3074, %v4230_v24   ;;  %v1723_v10 = vmul.f32 %v3756_v6, %v1578_v60  ;;  %1989 = vperm.xlu0 %3085, %v4040_v29  }
 0x200   :  { %v1618_v52 = vpop.permute.xlu1 %1617 }
 0x201   :  { %1869 = vperm.xlu1 %3074, %v4244_v23   ;;  %v1731_v20 = vmul.f32 %v3756_v6, %v1618_v52  ;;  %1993 = vperm.xlu0 %3085, %v4165_v12   ;;  %v4373_v12 = vld [vmem:[%s5164_s0 + $0x1] ss:$0 sm:$0xff] }
 0x205   :  { %3075 = vset.pattern.permute.xlu1 %v5167_v13  ;;  %v1766_v3 = vpop.permute.xlu1 %1765  ;;  %1997 = vperm.xlu0 %3085, %v4178_v44  }
 0x206   :  { %1965 = vperm.xlu1 %3075, %v4137_v30   ;;  %v1883_v40 = vmul.f32 %v3761_v14, %v1766_v3  ;;  %v1653_v30 = vpop.permute.xlu0 %1652 }
 0x207   :  { %v1738_v9 = vmul.f32 %v3756_v6, %v1653_v30 }
 0x208   :  { %v4304_v42 = vadd.f32 %v1883_v40, %v1723_v10  ;;  %v4396_v40 = vld [vmem:[%s5164_s0 + $0x2] ss:$0 sm:$0xff] }
 0x209   :  { %v1798_v56 = vpop.permute.xlu1 %1797  ;;  %2001 = vperm.xlu0 %3085, %v4190_v45  }
 0x20a   :  { %2057 = vperm.xlu1 %3075, %v4145_v21   ;;  %v1891_v2 = vmul.f32 %v3761_v14, %v1798_v56  ;;  %v1898_v21 = vmul.f32 %v3761_v14, %v1826_v19 }
 0x20c   :  { %v4317_v4 = vadd.f32 %v1891_v2, %v1731_v20  ;;  %v1930_v50 = vadd.f32 %v1898_v21, %v1738_v9 }
 0x20d   :  { %2005 = vperm.xlu0 %3085, %v4206_v48  }
 0x20e   :  { %3076 = vset.pattern.permute.xlu1 %v5194_v49  ;;  %v4324_v62 = vpop.permute.xlu1 %1953 }
 0x20f   :  { %1672 = vperm.xlu1 %3076, %v4273_v39  }
 0x211   :  { %2069 = vperm.xlu0 %3085, %v4322_v5  }
 0x213   :  { %3077 = vset.pattern.permute.xlu1 %v5167_v13 }
 0x214   :  { %2029 = vperm.xlu1 %3077, %v1549_v26  }
 0x218   :  { %3078 = vset.pattern.permute.xlu1 %v5194_v49 }
 0x219   :  { %1597 = vperm.xlu1 %3078, %v4284_v1  }
 0x21d   :  { %1712 = vperm.xlu1 %3078, %v4294_v31  }
 0x221   :  { %3080 = vset.pattern.permute.xlu1 %v5154_v11  ;;  %v4328_v11 = vpop.permute.xlu1 %1985 }
 0x222   :  { %1781 = vperm.xlu1 %3080, %v4284_v1  }
 0x225   :  { %v4338_v58 = vpop.permute.xlu1 %2045 }
 0x226   :  { %1873 = vperm.xlu1 %3080, %v4294_v31  }
 0x229   :  { %v4346_v53 = vpop.permute.xlu1 %1657 }
 0x22a   :  { %3081 = vset.pattern.permute.xlu1 %v5167_v13 }
 0x22b   :  { %1969 = vperm.xlu1 %3081, %v4230_v24  }
 0x22d   :  { %v2018_v14 = vpop.permute.xlu1 %2017 }
 0x22e   :  { %v2090_v26 = vmul.f32 %v3770_v37, %v2018_v14  ;;  %v4365_v37 = vld [vmem:[%s5164_s0] ss:$0 sm:$0xff] }
 0x22f   :  { %2061 = vperm.xlu1 %3081, %v4244_v23  }
 0x230   :  { %v4356_v6 = vadd.f32 %v2090_v26, %v1930_v50 }
 0x231   :  { %v1583_v46 = vpop.permute.xlu1 %1582 }
 0x232   :  { %v1724_v24 = vmul.f32 %v4365_v37, %v1583_v46  ;;  %v4408_v46 = vpop.permute.xlu0 %1692 }
 0x233   :  { %3082 = vset.pattern.permute.xlu1 %v5194_v49 }
 0x234   :  { %1677 = vperm.xlu1 %3082, %v4309_v33  }
 0x235   :  { %v1698_v32 = vpop.permute.xlu1 %1697 }
 0x236   :  { %v1747_v35 = vmul.f32 %v4365_v37, %v1698_v32 }
 0x238   :  { %3083 = vset.pattern.permute.xlu1 %v5167_v13 }
 0x239   :  { %2033 = vperm.xlu1 %3083, %v4273_v39   ;;  %v1770_v29 = vpop.permute.xlu1 %1769 }
 0x23d   :  { %3084 = vset.pattern.permute.xlu1 %v5194_v49  ;;  %v1884_v49 = vmul.f32 %v4373_v12, %v1770_v29  ;;  %v1862_v44 = vpop.permute.xlu1 %1861 }
 0x23e   :  { %1717 = vperm.xlu1 %3084, %v4322_v5   ;;  %v1907_v39 = vmul.f32 %v4373_v12, %v1862_v44 }
 0x23f   :  { %v4378_v23 = vadd.f32 %v1884_v49, %v1724_v24 }
 0x241   :  { %v1958_v10 = vpop.permute.xlu1 %1957 }
 0x242   :  { %3086 = vset.pattern.permute.xlu1 %v5167_v13 }
 0x243   :  { %1973 = vperm.xlu1 %3086, %v4284_v1   ;;  %v4389_v1 = vadd.f32 %v1907_v39, %v1747_v35  ;;  %v4412_v35 = vpop.permute.xlu0 %1622 }
 0x245   :  { %v4404_v54 = vpop.permute.xlu1 %2049 }
 0x247   :  { %2065 = vperm.xlu1 %3086, %v4294_v31   ;;  %v2075_v31 = vmul.f32 %v4396_v40, %v1958_v10 }
 0x249   :  { %v4401_v55 = vadd.f32 %v2075_v31, %v4304_v42  ;;  %v4406_v26 = vpop.permute.xlu1 %1662 }
 0x24b   :  { %2037 = vperm.xlu1 %3086, %v4309_v33  }
 0x24d   :  { %v4410_v29 = vpop.permute.xlu1 %2021 }
 0x251   :  { %v1588_v39 = vpop.permute.xlu1 %1587 }
 0x252   :  { %v1725_v10 = vmul.f32 %v4365_v37, %v1588_v39 }
 0x27a   :  { %v4382_v13 = vpop.f32.mrf.mxu0 }
 0x27b   :  { %v937_v19 = vsel %vm936_vm4, %v4382_v13, 0.0  ;;  %v946_v60 = vmul.f32 %v4382_v13, %v4382_v13 }
 0x27c   :  { %v938_v52 = vrot.slane %v937_v19, 4  ;;  %v2817_v45 = vpop.f32.mrf.mxu0 }
 0x27d   :  { %v947_v3 = vsel %vm936_vm4, %v946_v60, 0.0  ;;  %v4414_v60 = vpop.permute.xlu0 %1627  ;;  %v1703_v45 = vpop.permute.xlu1 %1702 }
 0x27e   :  { %v939_v20 = vadd.f32 %v938_v52, %v937_v19  ;;  %v948_v56 = vrot.slane %v947_v3, 4  ;;  %v933_v2 = vpop.f32.mrf.mxu0 }
 0x280   :  { %v940_v48 = vrot.slane %v939_v20, 2  ;;  %v949_v30 = vadd.f32 %v948_v56, %v947_v3  ;;  %v2818_v21 = vpop.f32.mrf.mxu0  ;;  %v1748_v56 = vmul.f32 %v4365_v37, %v1703_v45  ;;  %v1729_v45 = vmul.f32 %v4365_v37, %v4155_v18 }
 0x281   :  { %v4417_v3 = vpop.permute.xlu0 %1632  ;;  %v1774_v31 = vpop.permute.xlu1 %1773  ;;  %v1888_v21 = vmul.f32 %v4373_v12, %v4180_v15 }
 0x282   :  { %v941_v9 = vadd.f32 %v940_v48, %v939_v20  ;;  %v950_v57 = vrot.slane %v949_v30, 2  ;;  %v1885_v20 = vmul.f32 %v4373_v12, %v1774_v31 }
 0x284   :  { %v942_v50 = vrot.slane %v941_v9, 1  ;;  %v951_v14 = vadd.f32 %v950_v57, %v949_v30  ;;  %v4421_v2 = vadd.f32 %v1885_v20, %v1725_v10  ;;  %v1728_v30 = vmul.f32 %v4365_v37, %v4148_v61 }
 0x285   :  { %v4423_v48 = vpop.permute.xlu0 %1637  ;;  %v2080_v61 = vmul.f32 %v4396_v40, %v4262_v63 }
 0x286   :  { %v943_v32 = vadd.f32 %v942_v50, %v941_v9  ;;  %v952_v33 = vrot.slane %v951_v14, 1  ;;  %v1866_v9 = vpop.permute.xlu1 %1865  ;;  %v1730_v50 = vmul.f32 %v4365_v37, %v4225_v8  ;;  %v2082_v8 = vmul.f32 %v4396_v40, %v4328_v11  ;;  %v2669_v11 = vld [vmem:[%s5085_s6] ss:$0 sm:$0xff] }
 0x287   :  { %v1908_v57 = vmul.f32 %v4373_v12, %v1866_v9 }
 0x288   :  { %v945_v24 = vmul.f32 0.25, %v943_v32  ;;  %v953_v42 = vadd.f32 %v952_v33, %v951_v14  ;;  %v1890_v14 = vmul.f32 %v4373_v12, %v4249_v36  ;;  %v1720_v33 = vmul.f32 %v4365_v37, %v4140_v43  ;;  %v2668_v43 = vld [vmem:[%s5084_s5] ss:$0 sm:$0xff] }
 0x289   :  { %v4434_v32 = vadd.f32 %v1908_v57, %v1748_v56  ;;  %v4468_v57 = vld [vmem:[%s5082_s3] ss:$0 sm:$0xff] }
 0x28a   :  { %v954_v5 = vmul.f32 0.25, %v953_v42  ;;  %v955_v49 = vmul.f32 %v945_v24, %v945_v24  ;;  %v1920_v42 = vadd.f32 %v1888_v21, %v1728_v30  ;;  %v1922_v39 = vadd.f32 %v1890_v14, %v1730_v50 }
 0x28b   :  { %v1722_v14 = vmul.f32 %v4365_v37, %v4315_v16 }
 0x28c   :  { %v956_v44 = vsub.f32 %v954_v5, %v955_v49  ;;  %v1962_v5 = vpop.permute.xlu1 %1961  ;;  %v1754_v49 = vpop.permute.xlu0 %1753  ;;  %v2112_v10 = vadd.f32 %v2080_v61, %v1920_v42  ;;  %v2114_v30 = vadd.f32 %v2082_v8, %v1922_v39 }
 0x28d   :  { %v2076_v15 = vmul.f32 %v4396_v40, %v1962_v5  ;;  %v1880_v36 = vmul.f32 %v4373_v12, %v1754_v49 }
 0x28e   :  { %v957_v19 = vmax.f32 %v956_v44, 0.0  ;;  %v958_v44 = vsub.f32 %v4382_v13, %v945_v24  ;;  %v2144_v50 = vadd.f32 %v4468_v57, %v2112_v10  ;;  %v2146_v5 = vadd.f32 %v4468_v57, %v2114_v30 }
 0x28f   :  { %v4453_v13 = vadd.f32 %v1880_v36, %v1720_v33 }
 0x290   :  { %v959_v52 = vadd.f32 1e-05, %v957_v19  ;;  %v2054_v24 = vpop.permute.xlu1 %2053  ;;  %v1790_v20 = vpop.permute.xlu0 %1789  ;;  %v2176_v8 = vmax.f32 %v2144_v50, 0.0 }
 0x291   :  { %v2099_v31 = vmul.f32 %v4396_v40, %v2054_v24  ;;  %v1889_v21 = vmul.f32 %v4373_v12, %v1790_v20 }
 0x292   :  { %3127 = vrsqrt.f32 %v959_v52  ;;  %v4449_v52 = vadd.f32 %v2076_v15, %v4378_v23  ;;  %v2081_v23 = vmul.f32 %v4396_v40, %v4266_v47  ;;  %v2074_v47 = vmul.f32 %v4396_v40, %v4324_v62 }
 0x293   :  { %v4463_v18 = vadd.f32 %v2099_v31, %v4389_v1  ;;  %v1921_v33 = vadd.f32 %v1889_v21, %v1729_v45 }
 0x294   :  { %v4473_v42 = vpop.permute.xlu1 %1667  ;;  %v1762_v61 = vpop.permute.xlu0 %1761 }
 0x295   :  { %v2113_v15 = vadd.f32 %v2081_v23, %v1921_v33  ;;  %v1882_v49 = vmul.f32 %v4373_v12, %v1762_v61  ;;  %v2091_v33 = vmul.f32 %v4396_v40, %v4410_v29 }
 0x297   :  { %v2145_v16 = vadd.f32 %v4468_v57, %v2113_v15  ;;  %v1914_v36 = vadd.f32 %v1882_v49, %v1722_v14 }
 0x298   :  { %v1854_v62 = vpop.permute.xlu0 %1853 }
 0x299   :  { %v2177_v45 = vmax.f32 %v2145_v16, 0.0  ;;  %v4484_v10 = vadd.f32 %v2074_v47, %v1914_v36  ;;  %v1905_v24 = vmul.f32 %v4373_v12, %v1854_v62 }
 0x29f   :  { %v3128_v19 = vpop.eup %3127 }
 0x2a0   :  { %v961_v63 = vmul.f32 %v3128_v19, %v958_v44  ;;  %v1745_v44 = vmul.f32 %v4365_v37, %v4239_v22  ;;  %v2026_v19 = vpop.permute.xlu1 %2025  ;;  %v1746_v22 = vmul.f32 %v4365_v37, %v4408_v46 }
 0x2a2   :  { %v969_v56 = vmul.f32 %v2668_v43, %v961_v63  ;;  %v2097_v43 = vmul.f32 %v4396_v40, %v4338_v58  ;;  %v2178_v63 = vmax.f32 %v2146_v5, 0.0  ;;  %v1937_v31 = vadd.f32 %v1905_v24, %v1745_v44 }
 0x2a3   :  { %v2098_v58 = vmul.f32 %v4396_v40, %v4404_v54 }
 0x2a4   :  { %v977_v9 = vadd.f32 %v2669_v11, %v969_v56  ;;  %v2213_v11 = vadd.f32 %v2177_v45, %v2176_v8  ;;  %v1593_v20 = vpop.permute.xlu1 %1592  ;;  %v1858_v56 = vpop.permute.xlu0 %1857  ;;  %v4493_v23 = vadd.f32 %v2097_v43, %v1937_v31 }
 0x2a5   :  { %v1906_v30 = vmul.f32 %v4373_v12, %v1858_v56 }
 0x2a6   :  { %v978_v1 = vmax.f32 %v977_v9, 0.0  ;;  %v4496_v21 = vadd.f32 %v2213_v11, %v2178_v63  ;;  %v1739_v9 = vmul.f32 %v4365_v37, %v4346_v53  ;;  %v1740_v53 = vmul.f32 %v4365_v37, %v4406_v26 }
 0x2a7   :  { %v1938_v50 = vadd.f32 %v1906_v30, %v1746_v22  ;;  %v1896_v11 = vmul.f32 %v4373_v12, %v4208_v27  ;;  %v2088_v30 = vmul.f32 %v4396_v40, %v4278_v17  ;;  %v1881_v27 = vmul.f32 %v4373_v12, %v4167_v59 }
 0x2a8   :  { %v979_v39 = vpack.c.bf16 %v978_v1, %v978_v1  ;;  %v4500_v14 = vpop.permute.xlu1 %1707  ;;  %v1830_v46 = vpop.permute.xlu0 %1829  ;;  %v1897_v17 = vmul.f32 %v4373_v12, %v4216_v7  ;;  %v4571_v7 = vadd.f32 %v4468_v57, %v4356_v6 }
 0x2a9   :  { %v4504_v47 = vadd.f32 %v2098_v58, %v1938_v50  ;;  %v1899_v54 = vmul.f32 %v4373_v12, %v1830_v46  ;;  %v2072_v46 = vmul.f32 %v4396_v40, %v4258_v51  ;;  %v1904_v51 = vmul.f32 %v4373_v12, %v4254_v38 }
 0x2aa   :  { %2836 = vmatmul.mubr.bf16.vlgmr.msra.gmra.mxu1 %v979_v39  ;;  %v2092_v39 = vmul.f32 %v4396_v40, %v2026_v19  ;;  %v1736_v19 = vmul.f32 %v4365_v37, %v4192_v28  ;;  %v1726_v38 = vmul.f32 %v4365_v37, %v1593_v20 }
 0x2ab   :  { %2875 = vmatprep.mubr.msk.bf16.mxu1 %vm3190_vm0, %v5205_v25  ;;  %v1931_v61 = vadd.f32 %v1899_v54, %v1739_v9  ;;  %v1721_v54 = vmul.f32 %v4365_v37, %v4287_v0  ;;  %v4567_v0 = vadd.f32 %v4468_v57, %v4401_v55 }
 0x2ac   :  { %v1778_v1 = vpop.permute.xlu1 %1777  ;;  %v4507_v5 = vpop.permute.xlu0 %1801  ;;  %v1928_v58 = vadd.f32 %v1896_v11, %v1736_v19 }
 0x2ad   :  { %v4509_v15 = vadd.f32 %v2091_v33, %v1931_v61  ;;  %v2171_v20 = vmax.f32 %v4567_v0, 0.0 }
 0x2ae   :  { %v2120_v33 = vadd.f32 %v2088_v30, %v1928_v58 }
 0x2b0   :  { %v4513_v49 = vpop.permute.xlu1 %1869  ;;  %v1834_v44 = vpop.permute.xlu0 %1833  ;;  %v4563_v59 = vadd.f32 %v4468_v57, %v2120_v33  ;;  %v2140_v33 = vadd.f32 %v4468_v57, %v4449_v52 }
 0x2b1   :  { %v1900_v29 = vmul.f32 %v4373_v12, %v1834_v44  ;;  %v1744_v44 = vmul.f32 %v4365_v37, %v4330_v41  ;;  %v1886_v41 = vmul.f32 %v4373_v12, %v1778_v1  ;;  %v2186_v1 = vmax.f32 %v4571_v7, 0.0 }
 0x2b2   :  { %v2172_v7 = vmax.f32 %v2140_v33, 0.0 }
 0x2b3   :  { %v1932_v8 = vadd.f32 %v1900_v29, %v1740_v53  ;;  %v1737_v53 = vmul.f32 %v4365_v37, %v4299_v34  ;;  %v1913_v29 = vadd.f32 %v1881_v27, %v1721_v54  ;;  %v1936_v55 = vadd.f32 %v1904_v51, %v1744_v44 }
 0x2b4   :  { %v1966_v16 = vpop.permute.xlu1 %1965  ;;  %v4517_v36 = vpop.permute.xlu0 %1805  ;;  %v1918_v27 = vadd.f32 %v1886_v41, %v1726_v38 }
 0x2b5   :  { %v4519_v43 = vadd.f32 %v2092_v39, %v1932_v8  ;;  %v2104_v39 = vadd.f32 %v2072_v46, %v4453_v13  ;;  %v1929_v8 = vadd.f32 %v1897_v17, %v1737_v53  ;;  %v1741_v13 = vmul.f32 %v4365_v37, %v4473_v42 }
 0x2b6   :  { %v2077_v6 = vmul.f32 %v4396_v40, %v1966_v16  ;;  %v2184_v46 = vmax.f32 %v4563_v59, 0.0  ;;  %v1732_v16 = vmul.f32 %v4365_v37, %v4412_v35  ;;  %v4595_v53 = vmul.f32 %v4365_v37, %v4414_v60 }
 0x2b7   :  { %v2136_v58 = vadd.f32 %v4468_v57, %v2104_v39  ;;  %v2161_v35 = vadd.f32 %v4468_v57, %v4493_v23  ;;  %v2162_v60 = vadd.f32 %v4468_v57, %v4504_v47  ;;  %v1909_v23 = vmul.f32 %v4373_v12, %v4513_v49 }
 0x2b8   :  { %v4521_v62 = vpop.permute.xlu1 %2057  ;;  %v1838_v63 = vpop.permute.xlu0 %1837  ;;  %v2109_v59 = vadd.f32 %v2077_v6, %v4421_v2 }
 0x2b9   :  { %v1901_v19 = vmul.f32 %v4373_v12, %v1838_v63  ;;  %v2138_v63 = vadd.f32 %v4468_v57, %v4484_v10  ;;  %v2168_v52 = vmax.f32 %v2136_v58, 0.0 }
 0x2ba   :  { %v2141_v47 = vadd.f32 %v4468_v57, %v2109_v59 }
 0x2bb   :  { %v1933_v51 = vadd.f32 %v1901_v19, %v1741_v13  ;;  %v2170_v38 = vmax.f32 %v2138_v63, 0.0  ;;  %v1749_v19 = vmul.f32 %v4365_v37, %v4500_v14  ;;  %v2194_v14 = vmax.f32 %v2162_v60, 0.0 }
 0x2bc   :  { %v4523_v45 = vpop.permute.xlu1 %1672  ;;  %v4525_v24 = vpop.permute.xlu0 %1809 }
 0x2bd   :  { %v1941_v59 = vadd.f32 %v1909_v23, %v1749_v19  ;;  %v2100_v19 = vmul.f32 %v4396_v40, %v4521_v62  ;;  %v1893_v23 = vmul.f32 %v4373_v12, %v4517_v36 }
 0x2c0   :  { %v2030_v26 = vpop.permute.xlu1 %2029  ;;  %v4527_v22 = vpop.permute.xlu0 %1841 }
 0x2c1   :  { %v2093_v44 = vmul.f32 %v4396_v40, %v2030_v26 }
 0x2c3   :  { %v2125_v58 = vadd.f32 %v2093_v44, %v1933_v51 }
 0x2c4   :  { %v4533_v31 = vpop.permute.xlu1 %1597  ;;  %v4535_v56 = vpop.permute.xlu0 %1813 }
 0x2c5   :  { %v2157_v44 = vadd.f32 %v4468_v57, %v2125_v58 }
 0x2c8   :  { %v4539_v9 = vpop.permute.xlu1 %1712  ;;  %v4541_v50 = vpop.permute.xlu0 %1845 }
 0x2cc   :  { %v4545_v28 = vpop.permute.xlu1 %1781  ;;  %v4551_v61 = vpop.permute.xlu0 %1877 }
 0x2d0   :  { %v4573_v34 = vpop.permute.xlu1 %1873  ;;  %v1950_v11 = vpop.permute.xlu0 %1949 }
 0x2d1   :  { %v2073_v30 = vmul.f32 %v4396_v40, %v1950_v11  ;;  %v2155_v11 = vadd.f32 %v4468_v57, %v4509_v15 }
 0x2d3   :  { %v2105_v54 = vadd.f32 %v2073_v30, %v1913_v29  ;;  %v4603_v29 = vadd.f32 %v4468_v57, %v4463_v18  ;;  %v1892_v18 = vmul.f32 %v4373_v12, %v4507_v5  ;;  %v2156_v5 = vadd.f32 %v4468_v57, %v4519_v43 }
 0x2d4   :  { %v1970_v42 = vpop.permute.xlu1 %1969  ;;  %v2014_v39 = vpop.permute.xlu0 %2013  ;;  %v1902_v43 = vmul.f32 %v4373_v12, %v4527_v22 }
 0x2d5   :  { %v2078_v17 = vmul.f32 %v4396_v40, %v1970_v42  ;;  %v2137_v10 = vadd.f32 %v4468_v57, %v2105_v54  ;;  %v2089_v0 = vmul.f32 %v4396_v40, %v2014_v39  ;;  %v2193_v42 = vmax.f32 %v2161_v35, 0.0 }
 0x2d6   :  { %v1924_v51 = vadd.f32 %v1892_v18, %v1732_v16  ;;  %v1742_v35 = vmul.f32 %v4365_v37, %v4523_v45  ;;  %v2188_v16 = vmax.f32 %v2156_v5, 0.0  ;;  %v2132_v5 = vadd.f32 %v2100_v19, %v4434_v32 }
 0x2d7   :  { %v2169_v41 = vmax.f32 %v2137_v10, 0.0  ;;  %v2110_v13 = vadd.f32 %v2078_v17, %v1918_v27  ;;  %v2121_v2 = vadd.f32 %v2089_v0, %v1929_v8  ;;  %v2195_v8 = vmax.f32 %v4603_v29, 0.0 }
 0x2d8   :  { %v2062_v26 = vpop.permute.xlu1 %2061  ;;  %v2042_v6 = vpop.permute.xlu0 %2041  ;;  %v2187_v17 = vmax.f32 %v2155_v11, 0.0  ;;  %v2173_v10 = vmax.f32 %v2141_v47, 0.0  ;;  %v1934_v47 = vadd.f32 %v1902_v43, %v1742_v35  ;;  %v1735_v32 = vmul.f32 %v4365_v37, %v4423_v48 }
 0x2d9   :  { %v2200_v30 = vadd.f32 %v2169_v41, %v2168_v52  ;;  %v2153_v33 = vadd.f32 %v4468_v57, %v2121_v2  ;;  %v2096_v63 = vmul.f32 %v4396_v40, %v2042_v6  ;;  %v2142_v54 = vadd.f32 %v4468_v57, %v2110_v13 }
 0x2da   :  { %v2101_v22 = vmul.f32 %v4396_v40, %v2062_v26  ;;  %v1750_v48 = vmul.f32 %v4365_v37, %v4539_v9  ;;  %v1911_v9 = vmul.f32 %v4373_v12, %v4551_v61 }
 0x2db   :  { %v2201_v27 = vadd.f32 %v2200_v30, %v2170_v38  ;;  %v2185_v49 = vmax.f32 %v2153_v33, 0.0  ;;  %v2128_v39 = vadd.f32 %v2096_v63, %v1936_v55  ;;  %v2174_v13 = vmax.f32 %v2142_v54, 0.0 }
 0x2dc   :  { %v4621_v15 = vpop.permute.xlu1 %1677  ;;  %v1990_v52 = vpop.permute.xlu0 %1989 }
 0x2dd   :  { %v2202_v0 = vadd.f32 %v2201_v27, %v2171_v20  ;;  %v2226_v29 = vadd.f32 %v2185_v49, %v2184_v46  ;;  %v2160_v60 = vadd.f32 %v4468_v57, %v2128_v39  ;;  %v2083_v38 = vmul.f32 %v4396_v40, %v1990_v52 }
 0x2de   :  { %v2189_v20 = vmax.f32 %v2157_v44, 0.0  ;;  %v2133_v49 = vadd.f32 %v2101_v22, %v1941_v59  ;;  %v1894_v44 = vmul.f32 %v4373_v12, %v4525_v24  ;;  %v1887_v24 = vmul.f32 %v4373_v12, %v4545_v28  ;;  %v4685_v22 = vld [vmem:[%s5089_s10 + $0x38] sm:$0xff]  }
 0x2df   :  { %v2203_v2 = vadd.f32 %v2202_v0, %v2172_v7  ;;  %v2227_v55 = vadd.f32 %v2226_v29, %v2186_v1  ;;  %v2192_v46 = vmax.f32 %v2160_v60, 0.0  ;;  %v2115_v11 = vadd.f32 %v2083_v38, %v4317_v4  ;;  %2840 = vmatpush3.bf16.msra.mxu0 %v4685_v22 }
 0x2e0   :  { %v2034_v41 = vpop.permute.xlu1 %2033  ;;  %v1994_v45 = vpop.permute.xlu0 %1993  ;;  %v2164_v0 = vadd.f32 %v4468_v57, %v2132_v5  ;;  %v1727_v29 = vmul.f32 %v4365_v37, %v4533_v31  ;;  %v1903_v31 = vmul.f32 %v4373_v12, %v4541_v50  ;;  %2841 = vmatprep.subr.bf16.mxu0 %v5205_v25 }
 0x2e1   :  { %v2204_v18 = vadd.f32 %v2203_v2, %v2173_v10  ;;  %v2228_v58 = vadd.f32 %v2227_v55, %v2187_v17  ;;  %v2084_v6 = vmul.f32 %v4396_v40, %v1994_v45  ;;  %v2239_v7 = vadd.f32 %v2193_v42, %v2192_v46 }
 0x2e2   :  { %v2147_v1 = vadd.f32 %v4468_v57, %v2115_v11  ;;  %v2094_v33 = vmul.f32 %v4396_v40, %v2034_v41  ;;  %v1734_v42 = vmul.f32 %v4365_v37, %v4417_v3  ;;  %v1895_v3 = vmul.f32 %v4373_v12, %v4535_v56 }
 0x2e3   :  { %v4641_v62 = vadd.f32 %v2204_v18, %v2174_v13  ;;  %v2229_v4 = vadd.f32 %v2228_v58, %v2188_v16  ;;  %v2116_v63 = vadd.f32 %v2084_v6, %v1924_v51  ;;  %v2240_v27 = vadd.f32 %v2239_v7, %v2194_v14 }
 0x2e4   :  { %v1718_v30 = vpop.permute.xlu1 %1717  ;;  %v2179_v26 = vmax.f32 %v2147_v1, 0.0  ;;  %v1998_v54 = vpop.permute.xlu0 %1997  ;;  %v1925_v14 = vadd.f32 %v1893_v23, %v4595_v53  ;;  %v2126_v51 = vadd.f32 %v2094_v33, %v1934_v47  ;;  %v1910_v53 = vmul.f32 %v4373_v12, %v4573_v34 }
 0x2e5   :  { %v4645_v17 = vadd.f32 %v2229_v4, %v2189_v20  ;;  %v2148_v36 = vadd.f32 %v4468_v57, %v2116_v63  ;;  %v2241_v39 = vadd.f32 %v2240_v27, %v2195_v8  ;;  %v2165_v8 = vadd.f32 %v4468_v57, %v2133_v49 }
 0x2e6   :  { %v2215_v52 = vadd.f32 %v4496_v21, %v2179_v26  ;;  %v1926_v43 = vadd.f32 %v1894_v44, %v1734_v42  ;;  %v2085_v60 = vmul.f32 %v4396_v40, %v1998_v54  ;;  %v1743_v56 = vmul.f32 %v4365_v37, %v4621_v15  ;;  %v4698_v44 = vld [vmem:[%s5089_s10 + $0x30] sm:$0xff]  }
 0x2e7   :  { %v2180_v59 = vmax.f32 %v2148_v36, 0.0  ;;  %v2158_v28 = vadd.f32 %v4468_v57, %v2126_v51  ;;  %v1919_v41 = vadd.f32 %v1887_v24, %v1727_v29  ;;  %v2196_v2 = vmax.f32 %v2164_v0, 0.0  ;;  %2842 = vmatpush3.bf16.msra.mxu0 %v4698_v44 }
 0x2e8   :  { %v1974_v10 = vpop.permute.xlu1 %1973  ;;  %v2002_v21 = vpop.permute.xlu0 %2001  ;;  %v2117_v34 = vadd.f32 %v2085_v60, %v1925_v14  ;;  %v1927_v55 = vadd.f32 %v1895_v3, %v1735_v32  ;;  %v1942_v19 = vadd.f32 %v1910_v53, %v1750_v48  ;;  %v2197_v20 = vmax.f32 %v2165_v8, 0.0  ;;  %2843 = vmatprep.subr.bf16.mxu0 %v5205_v25 }
 0x2e9   :  { %v2216_v35 = vadd.f32 %v2215_v52, %v2180_v59  ;;  %v2086_v16 = vmul.f32 %v4396_v40, %v2002_v21  ;;  %v1751_v50 = vmul.f32 %v4365_v37, %v1718_v30  ;;  %v2079_v15 = vmul.f32 %v4396_v40, %v1974_v10 }
 0x2ea   :  { %v2149_v46 = vadd.f32 %v4468_v57, %v2117_v34  ;;  %v1935_v45 = vadd.f32 %v1903_v31, %v1743_v56  ;;  %v2190_v18 = vmax.f32 %v2158_v28, 0.0  ;;  %v2242_v26 = vadd.f32 %v2241_v39, %v2196_v2  ;;  %v4716_v31 = vld [vmem:[%s5089_s10 + $0x20] sm:$0xff]   ;;  %v4723_v2 = vld [vmem:[%s5089_s10 + $0x18] sm:$0xff]  }
 0x2eb   :  { %v2118_v11 = vadd.f32 %v2086_v16, %v1926_v43  ;;  %v1943_v6 = vadd.f32 %v1911_v9, %v1751_v50  ;;  %v2111_v37 = vadd.f32 %v2079_v15, %v1919_v41 }
 0x2ec   :  { %v2066_v38 = vpop.permute.xlu1 %2065  ;;  %v2006_v13 = vpop.permute.xlu0 %2005  ;;  %v2181_v23 = vmax.f32 %v2149_v46, 0.0  ;;  %v2243_v14 = vadd.f32 %v2242_v26, %v2197_v20 }
 0x2ed   :  { %v2102_v58 = vmul.f32 %v4396_v40, %v2066_v38  ;;  %v2087_v12 = vmul.f32 %v4396_v40, %v2006_v13  ;;  %v2150_v47 = vadd.f32 %v4468_v57, %v2118_v11  ;;  %v2143_v5 = vadd.f32 %v4468_v57, %v2111_v37 }
 0x2ee   :  { %v2217_v63 = vadd.f32 %v2216_v35, %v2181_v23 }
 0x2ef   :  { %v2134_v1 = vadd.f32 %v2102_v58, %v1942_v19  ;;  %v2119_v30 = vadd.f32 %v2087_v12, %v1927_v55  ;;  %v2182_v27 = vmax.f32 %v2150_v47, 0.0  ;;  %v2175_v52 = vmax.f32 %v2143_v5, 0.0 }
 0x2f0   :  { %v2038_v61 = vpop.permute.xlu1 %2037  ;;  %v2070_v7 = vpop.permute.xlu0 %2069 }
 0x2f1   :  { %v2095_v33 = vmul.f32 %v4396_v40, %v2038_v61  ;;  %v2103_v4 = vmul.f32 %v4396_v40, %v2070_v7  ;;  %v2166_v54 = vadd.f32 %v4468_v57, %v2134_v1  ;;  %v2151_v49 = vadd.f32 %v4468_v57, %v2119_v30  ;;  %v4737_v7 = vld [vmem:[%s5089_s10 + $0x8] sm:$0xff]  }
 0x2f2   :  { %v2231_v40 = vadd.f32 %v4645_v17, %v2190_v18  ;;  %v2218_v32 = vadd.f32 %v2217_v63, %v2182_v27  ;;  %v2206_v0 = vadd.f32 %v4641_v62, %v2175_v52  ;;  %v4709_v17 = vld [vmem:[%s5089_s10 + $0x28] sm:$0xff]   ;;  %v4730_v18 = vld [vmem:[%s5089_s10 + $0x10] sm:$0xff]   ;;  %v4743_v63 = vld [vmem:[%s5089_s10] sm:$0xff]  }
 0x2f3   :  { %v2127_v36 = vadd.f32 %v2095_v33, %v1935_v45  ;;  %v2135_v42 = vadd.f32 %v2103_v4, %v1943_v6  ;;  %v2198_v51 = vmax.f32 %v2166_v54, 0.0  ;;  %v2183_v39 = vmax.f32 %v2151_v49, 0.0  ;;  %2844 = vmatpush3.bf16.msra.mxu0 %v4709_v17 }
 0x2f4   :  { %v2207_v48 = vrot.slane %v2206_v0, 4  ;;  %2845 = vmatprep.subr.bf16.mxu0 %v5205_v25 }
 0x2f5   :  { %v2159_v59 = vadd.f32 %v4468_v57, %v2127_v36  ;;  %v2167_v10 = vadd.f32 %v4468_v57, %v2135_v42  ;;  %v2244_v29 = vadd.f32 %v2243_v14, %v2198_v51  ;;  %v2219_v3 = vadd.f32 %v2218_v32, %v2183_v39 }
 0x2f6   :  { %v2208_v57 = vadd.f32 %v2207_v48, %v2206_v0 }
 0x2f7   :  { %v2191_v24 = vmax.f32 %v2159_v59, 0.0  ;;  %v2199_v21 = vmax.f32 %v2167_v10, 0.0  ;;  %v2220_v53 = vrot.slane %v2219_v3, 4  ;;  %2846 = vmatpush3.bf16.msra.mxu0 %v4716_v31 }
 0x2f8   :  { %v2209_v56 = vrot.slane %v2208_v57, 2  ;;  %2847 = vmatprep.subr.bf16.mxu0 %v5205_v25 }
 0x2f9   :  { %v2232_v8 = vadd.f32 %v2231_v40, %v2191_v24  ;;  %v2245_v35 = vadd.f32 %v2244_v29, %v2199_v21  ;;  %v2221_v62 = vadd.f32 %v2220_v53, %v2219_v3 }
 0x2fa   :  { %v2210_v9 = vadd.f32 %v2209_v56, %v2208_v57 }
 0x2fb   :  { %v2233_v43 = vrot.slane %v2232_v8, 4  ;;  %v2246_v60 = vrot.slane %v2245_v35, 4  ;;  %v2222_v28 = vrot.slane %v2221_v62, 2  ;;  %2848 = vmatpush3.bf16.msra.mxu0 %v4723_v2 }
 0x2fc   :  { %v2211_v55 = vrot.slane %v2210_v9, 1  ;;  %2849 = vmatprep.subr.bf16.mxu0 %v5205_v25 }
 0x2fd   :  { %v2234_v38 = vadd.f32 %v2233_v43, %v2232_v8  ;;  %v2247_v41 = vadd.f32 %v2246_v60, %v2245_v35  ;;  %v2223_v34 = vadd.f32 %v2222_v28, %v2221_v62 }
 0x2fe   :  { %v2212_v46 = vadd.f32 %v2211_v55, %v2210_v9 }
 0x2ff   :  { %v2235_v16 = vrot.slane %v2234_v38, 2  ;;  %v2248_v13 = vrot.slane %v2247_v41, 2  ;;  %v2224_v19 = vrot.slane %v2223_v34, 1  ;;  %2850 = vmatpush3.bf16.msra.mxu0 %v4730_v18 }
 0x300   :  { %v2252_v58 = vmul.f32 0.015625, %v2212_v46  ;;  %2851 = vmatprep.subr.bf16.mxu0 %v5205_v25  ;;  %v4772_v46 = vld [vmem:[%s5092_s13 + $0x38] sm:$0xff]  }
 0x301   :  { %v2236_v20 = vadd.f32 %v2235_v16, %v2234_v38  ;;  %v2249_v50 = vadd.f32 %v2248_v13, %v2247_v41  ;;  %v2225_v15 = vadd.f32 %v2224_v19, %v2223_v34  ;;  %v4758_v34 = vld [vmem:[%s5087_s8] ss:$0 sm:$0xff]  ;;  %2860 = vmatpush3.bf16.msra.mxu1 %v4772_v46 }
 0x302   :  { %v2256_v23 = vpack.c.bf16 %v2252_v58, %v2252_v58  ;;  %v4763_v13 = vld [vmem:[%s5088_s9] ss:$0 sm:$0xff]  ;;  %2861 = vmatprep.subr.bf16.mxu1 %v5205_v25  ;;  %v4800_v58 = vld [vmem:[%s5092_s13 + $0x18] sm:$0xff]  }
 0x303   :  { %v2237_v11 = vrot.slane %v2236_v20, 1  ;;  %v2250_v45 = vrot.slane %v2249_v50, 1  ;;  %v2253_v12 = vmul.f32 0.015625, %v2225_v15  ;;  %2852 = vmatpush3.bf16.msra.mxu0 %v4737_v7  ;;  %v4779_v15 = vld [vmem:[%s5092_s13 + $0x30] sm:$0xff]  }
 0x304   :  { %v2264_v30 = vunpack.c.l.b16 %v2256_v23  ;;  %2853 = vmatprep.subr.bf16.mxu0 %v5205_v25 }
 0x305   :  { %v2238_v61 = vadd.f32 %v2237_v11, %v2236_v20  ;;  %v2251_v6 = vadd.f32 %v2250_v45, %v2249_v50  ;;  %v2257_v37 = vpack.c.bf16 %v2253_v12, %v2253_v12  ;;  %2862 = vmatpush3.bf16.msra.mxu1 %v4779_v15  ;;  %v4786_v11 = vld [vmem:[%s5092_s13 + $0x28] sm:$0xff]   ;;  %v4793_v45 = vld [vmem:[%s5092_s13 + $0x20] sm:$0xff]   ;;  %v4807_v12 = vld [vmem:[%s5092_s13 + $0x10] sm:$0xff]  }
 0x306   :  { %2863 = vmatprep.subr.bf16.mxu1 %v5205_v25 }
 0x307   :  { %v2254_v47 = vmul.f32 0.015625, %v2238_v61  ;;  %v2255_v1 = vmul.f32 0.015625, %v2251_v6  ;;  %v2265_v33 = vunpack.c.l.b16 %v2257_v37  ;;  %2854 = vmatpush3.bf16.msra.mxu0 %v4743_v63  ;;  %v4814_v61 = vld [vmem:[%s5092_s13 + $0x8] sm:$0xff]   ;;  %v4821_v6 = vld [vmem:[%s5092_s13] sm:$0xff]  }
 0x308   :  { %2879 = vmatprep.subr.bf16.mxu0 %v5205_v25 }
 0x309   :  { %v2258_v4 = vpack.c.bf16 %v2254_v47, %v2254_v47  ;;  %v2259_v5 = vpack.c.bf16 %v2255_v1, %v2255_v1  ;;  %v2268_v54 = vsel %vm840_vm1, %v2265_v33, %v2264_v30  ;;  %2864 = vmatpush3.bf16.msra.mxu1 %v4786_v11 }
 0x30a   :  { %2865 = vmatprep.subr.bf16.mxu1 %v5205_v25 }
 0x30b   :  { %v2266_v27 = vunpack.c.l.b16 %v2258_v4  ;;  %v2267_v26 = vunpack.c.l.b16 %v2259_v5 }
 0x30d   :  { %v2269_v49 = vsel %vm842_vm2, %v2266_v27, %v2268_v54  ;;  %2866 = vmatpush3.bf16.msra.mxu1 %v4793_v45 }
 0x30e   :  { %v4750_v36 = vsel %vm844_vm3, %v2267_v26, %v2269_v49  ;;  %2867 = vmatprep.subr.bf16.mxu1 %v5205_v25 }
 0x311   :  { %2868 = vmatpush3.bf16.msra.mxu1 %v4800_v58 }
 0x312   :  { %2869 = vmatprep.subr.bf16.mxu1 %v5205_v25 }
 0x315   :  { %2870 = vmatpush3.bf16.msra.mxu1 %v4807_v12 }
 0x316   :  { %2871 = vmatprep.subr.bf16.mxu1 %v5205_v25 }
 0x319   :  { %2872 = vmatpush3.bf16.msra.mxu1 %v4814_v61 }
 0x31a   :  { %2873 = vmatprep.subr.bf16.mxu1 %v5205_v25 }
 0x31d   :  { %2874 = vmatpush3.bf16.msra.mxu1 %v4821_v6 }
 0x31e   :  { %2899 = vmatprep.subr.bf16.mxu1 %v5205_v25 }
 0x36a   :  { %v1078_v42 = vpop.f32.mrf.mxu1 }
 0x36b   :  { %v1084_v40 = vsel %vm936_vm4, %v1078_v42, 0.0  ;;  %v1092_v52 = vmul.f32 %v1078_v42, %v1078_v42 }
 0x36c   :  { %v1085_v32 = vrot.slane %v1084_v40, 4  ;;  %v2837_v14 = vpop.f32.mrf.mxu1 }
 0x36d   :  { %v1093_v51 = vsel %vm936_vm4, %v1092_v52, 0.0 }
 0x36e   :  { %v1086_v39 = vadd.f32 %v1085_v32, %v1084_v40  ;;  %v1094_v59 = vrot.slane %v1093_v51, 4  ;;  %v1081_v10 = vpop.f32.mrf.mxu1 }
 0x370   :  { %v1087_v0 = vrot.slane %v1086_v39, 2  ;;  %v1095_v29 = vadd.f32 %v1094_v59, %v1093_v51  ;;  %v2838_v3 = vpop.f32.mrf.mxu1 }
 0x372   :  { %v1088_v24 = vadd.f32 %v1087_v0, %v1086_v39  ;;  %v1096_v21 = vrot.slane %v1095_v29, 2 }
 0x374   :  { %v1089_v48 = vrot.slane %v1088_v24, 1  ;;  %v1097_v53 = vadd.f32 %v1096_v21, %v1095_v29 }
 0x376   :  { %v1090_v8 = vadd.f32 %v1089_v48, %v1088_v24  ;;  %v1098_v35 = vrot.slane %v1097_v53, 1 }
 0x378   :  { %v1091_v57 = vmul.f32 0.25, %v1090_v8  ;;  %v1099_v62 = vadd.f32 %v1098_v35, %v1097_v53  ;;  %v4830_v53 = vld [vmem:[%s5090_s11] ss:$0 sm:$0xff] }
 0x379   :  { %v4835_v35 = vld [vmem:[%s5091_s12] ss:$0 sm:$0xff] }
 0x37a   :  { %v1100_v43 = vmul.f32 0.25, %v1099_v62  ;;  %v1101_v60 = vmul.f32 %v1091_v57, %v1091_v57  ;;  %v1104_v41 = vsub.f32 %v1078_v42, %v1091_v57 }
 0x37c   :  { %v1102_v56 = vsub.f32 %v1100_v43, %v1101_v60  ;;  %v3158_v60 = vld [vmem:[%s5083_s4 + $0x38] sm:$0xff]  }
 0x37e   :  { %v1103_v28 = vmax.f32 %v1102_v56, 0.0  ;;  %v3159_v56 = vld [vmem:[%s5083_s4 + $0x30] sm:$0xff]  }
 0x380   :  { %v1105_v38 = vadd.f32 1e-05, %v1103_v28  ;;  %v3160_v28 = vld [vmem:[%s5083_s4 + $0x28] sm:$0xff]  }
 0x382   :  { %3129 = vrsqrt.f32 %v1105_v38  ;;  %v3161_v38 = vld [vmem:[%s5083_s4 + $0x20] sm:$0xff]  }
 0x38f   :  { %v3130_v9 = vpop.eup %3129 }
 0x390   :  { %v1107_v16 = vmul.f32 %v3130_v9, %v1104_v41  ;;  %v3162_v41 = vld [vmem:[%s5083_s4 + $0x18] sm:$0xff]   ;;  %v3163_v9 = vld [vmem:[%s5083_s4 + $0x10] sm:$0xff]  }
 0x392   :  { %v1115_v55 = vmul.f32 %v4758_v34, %v1107_v16  ;;  %v3164_v16 = vld [vmem:[%s5083_s4 + $0x8] sm:$0xff]  }
 0x394   :  { %v1123_v19 = vadd.f32 %v4763_v13, %v1115_v55  ;;  %v3165_v55 = vld [vmem:[%s5083_s4] sm:$0xff]  }
 0x396   :  { %v1124_v20 = vmax.f32 %v1123_v19, 0.0  ;;  %v2271_v19 = vpack.c.b16 %v4750_v36, %v4750_v36 }
 0x398   :  { %v1125_v50 = vpack.c.bf16 %v1124_v20, %v1124_v20 }
 0x39a   :  { %2856 = vmatmul.mubr.bf16.vlgmr.msra.gmra.mxu0 %v1125_v50 }
 0x39b   :  { %2895 = vmatprep.mubr.msk.bf16.mxu0 %vm3190_vm0, %v5205_v25 }
 0x45a   :  { %v1224_v23 = vpop.f32.mrf.mxu0 }
 0x45b   :  { %v1230_v37 = vsel %vm936_vm4, %v1224_v23, 0.0  ;;  %v1238_v47 = vmul.f32 %v1224_v23, %v1224_v23 }
 0x45c   :  { %v1231_v1 = vrot.slane %v1230_v37, 4  ;;  %v2857_v30 = vpop.f32.mrf.mxu0 }
 0x45d   :  { %v1239_v33 = vsel %vm936_vm4, %v1238_v47, 0.0 }
 0x45e   :  { %v1232_v4 = vadd.f32 %v1231_v1, %v1230_v37  ;;  %v1240_v5 = vrot.slane %v1239_v33, 4  ;;  %v1227_v27 = vpop.f32.mrf.mxu0 }
 0x460   :  { %v1233_v26 = vrot.slane %v1232_v4, 2  ;;  %v1241_v54 = vadd.f32 %v1240_v5, %v1239_v33  ;;  %v2858_v49 = vpop.f32.mrf.mxu0 }
 0x462   :  { %v1234_v42 = vadd.f32 %v1233_v26, %v1232_v4  ;;  %v1242_v40 = vrot.slane %v1241_v54, 2 }
 0x464   :  { %v1235_v52 = vrot.slane %v1234_v42, 1  ;;  %v1243_v32 = vadd.f32 %v1242_v40, %v1241_v54 }
 0x466   :  { %v1236_v14 = vadd.f32 %v1235_v52, %v1234_v42  ;;  %v1244_v51 = vrot.slane %v1243_v32, 1 }
 0x468   :  { %v1237_v39 = vmul.f32 0.25, %v1236_v14  ;;  %v1245_v59 = vadd.f32 %v1244_v51, %v1243_v32 }
 0x46a   :  { %v1246_v10 = vmul.f32 0.25, %v1245_v59  ;;  %v1247_v0 = vmul.f32 %v1237_v39, %v1237_v39  ;;  %v1250_v21 = vsub.f32 %v1224_v23, %v1237_v39 }
 0x46c   :  { %v1248_v29 = vsub.f32 %v1246_v10, %v1247_v0 }
 0x46e   :  { %v1249_v3 = vmax.f32 %v1248_v29, 0.0 }
 0x470   :  { %v1251_v24 = vadd.f32 1e-05, %v1249_v3 }
 0x472   :  { %3131 = vrsqrt.f32 %v1251_v24 }
 0x47f   :  { %v3132_v48 = vpop.eup %3131 }
 0x480   :  { %v1253_v8 = vmul.f32 %v3132_v48, %v1250_v21 }
 0x482   :  { %v1261_v57 = vmul.f32 %v4830_v53, %v1253_v8 }
 0x484   :  { %v4839_v62 = vadd.f32 %v4835_v35, %v1261_v57 }
 0x486   :  { %v1270_v43 = vpack.c.bf16 %v4839_v62, %v4839_v62 }
 0x488   :  { %2876 = vmatmul.mubr.bf16.vlgmr.msra.gmra.mxu1 %v1270_v43 }
 0x489   :  { %2900 = vmatpush3.bf16.msra.mxu1 %v3158_v60  ;;  %2915 = vmatprep.mubr.msk.bf16.mxu1 %vm3190_vm0, %v5205_v25 }
 0x48a   :  { %2901 = vmatprep.subr.bf16.mxu1 %v5205_v25 }
 0x48d   :  { %2902 = vmatpush3.bf16.msra.mxu1 %v3159_v56 }
 0x48e   :  { %2903 = vmatprep.subr.bf16.mxu1 %v5205_v25 }
 0x491   :  { %2904 = vmatpush3.bf16.msra.mxu1 %v3160_v28 }
 0x492   :  { %2905 = vmatprep.subr.bf16.mxu1 %v5205_v25 }
 0x495   :  { %2906 = vmatpush3.bf16.msra.mxu1 %v3161_v38  ;;  %v4960_v38 = vld [vmem:[%s5093_s14] ss:$0 sm:$0xff] }
 0x496   :  { %2907 = vmatprep.subr.bf16.mxu1 %v5205_v25 }
 0x499   :  { %2908 = vmatpush3.bf16.msra.mxu1 %v3162_v41 }
 0x49a   :  { %2909 = vmatprep.subr.bf16.mxu1 %v5205_v25 }
 0x49d   :  { %2910 = vmatpush3.bf16.msra.mxu1 %v3163_v9 }
 0x49e   :  { %2911 = vmatprep.subr.bf16.mxu1 %v5205_v25 }
 0x4a1   :  { %2912 = vmatpush3.bf16.msra.mxu1 %v3164_v16 }
 0x4a2   :  { %2913 = vmatprep.subr.bf16.mxu1 %v5205_v25 }
 0x4a5   :  { %2914 = vmatpush3.bf16.msra.mxu1 %v3165_v55 }
 0x4a6   :  { %2939 = vmatprep.subr.bf16.mxu1 %v5205_v25 }
 0x4a8   :  { %2916 = vmatmul.mubr.bf16.vlgmr.msra.gmra.mxu1 %v2271_v19  ;;  %v4965_v19 = vld [vmem:[%s5094_s15] ss:$0 sm:$0xff]  ;;  %s3191_s15 = smov [#allocation2]  }
 0x4a9   :  { %2940 = vmatpush3.bf16.msra.mxu1 %v4685_v22  ;;  %2955 = vmatprep.mubr.msk.bf16.mxu1 %vm3190_vm0, %v5205_v25  ;;  %v4900_v22 = vld [vmem:[%s5095_s16 + $0x38] sm:$0xff]  }
 0x4aa   :  { %2941 = vmatprep.subr.bf16.mxu1 %v5205_v25  ;;  %2880 = vmatpush3.bf16.msra.mxu0 %v4900_v22 }
 0x4ab   :  { %2881 = vmatprep.subr.bf16.mxu0 %v5205_v25 }
 0x4ad   :  { %2942 = vmatpush3.bf16.msra.mxu1 %v4698_v44  ;;  %v4907_v44 = vld [vmem:[%s5095_s16 + $0x30] sm:$0xff]  }
 0x4ae   :  { %2943 = vmatprep.subr.bf16.mxu1 %v5205_v25  ;;  %2882 = vmatpush3.bf16.msra.mxu0 %v4907_v44 }
 0x4af   :  { %2883 = vmatprep.subr.bf16.mxu0 %v5205_v25 }
 0x4b1   :  { %2944 = vmatpush3.bf16.msra.mxu1 %v4709_v17  ;;  %v4914_v17 = vld [vmem:[%s5095_s16 + $0x28] sm:$0xff]  }
 0x4b2   :  { %2945 = vmatprep.subr.bf16.mxu1 %v5205_v25  ;;  %2884 = vmatpush3.bf16.msra.mxu0 %v4914_v17 }
 0x4b3   :  { %2885 = vmatprep.subr.bf16.mxu0 %v5205_v25 }
 0x4b5   :  { %2946 = vmatpush3.bf16.msra.mxu1 %v4716_v31  ;;  %v4921_v31 = vld [vmem:[%s5095_s16 + $0x20] sm:$0xff]  }
 0x4b6   :  { %2947 = vmatprep.subr.bf16.mxu1 %v5205_v25  ;;  %2886 = vmatpush3.bf16.msra.mxu0 %v4921_v31 }
 0x4b7   :  { %2887 = vmatprep.subr.bf16.mxu0 %v5205_v25 }
 0x4b9   :  { %2948 = vmatpush3.bf16.msra.mxu1 %v4723_v2  ;;  %v4928_v2 = vld [vmem:[%s5095_s16 + $0x18] sm:$0xff]  }
 0x4ba   :  { %2949 = vmatprep.subr.bf16.mxu1 %v5205_v25  ;;  %2888 = vmatpush3.bf16.msra.mxu0 %v4928_v2 }
 0x4bb   :  { %2889 = vmatprep.subr.bf16.mxu0 %v5205_v25 }
 0x4bd   :  { %2950 = vmatpush3.bf16.msra.mxu1 %v4730_v18  ;;  %v4935_v18 = vld [vmem:[%s5095_s16 + $0x10] sm:$0xff]  }
 0x4be   :  { %2951 = vmatprep.subr.bf16.mxu1 %v5205_v25  ;;  %2890 = vmatpush3.bf16.msra.mxu0 %v4935_v18 }
 0x4bf   :  { %2891 = vmatprep.subr.bf16.mxu0 %v5205_v25 }
 0x4c1   :  { %2952 = vmatpush3.bf16.msra.mxu1 %v4737_v7  ;;  %v4942_v7 = vld [vmem:[%s5095_s16 + $0x8] sm:$0xff]  }
 0x4c2   :  { %2953 = vmatprep.subr.bf16.mxu1 %v5205_v25  ;;  %2892 = vmatpush3.bf16.msra.mxu0 %v4942_v7 }
 0x4c3   :  { %2893 = vmatprep.subr.bf16.mxu0 %v5205_v25 }
 0x4c5   :  { %2954 = vmatpush3.bf16.msra.mxu1 %v4743_v63  ;;  %v4949_v63 = vld [vmem:[%s5095_s16] sm:$0xff]  }
 0x4c6   :  { %2979 = vmatprep.subr.bf16.mxu1 %v5205_v25  ;;  %2894 = vmatpush3.bf16.msra.mxu0 %v4949_v63 }
 0x4c7   :  { %2919 = vmatprep.subr.bf16.mxu0 %v5205_v25 }
 0x548   :  { %v1369_v36 = vpop.f32.mrf.mxu1 }
 0x549   :  { %v1375_v20 = vsel %vm936_vm4, %v1369_v36, 0.0  ;;  %v1383_v50 = vmul.f32 %v1369_v36, %v1369_v36 }
 0x54a   :  { %v1376_v23 = vrot.slane %v1375_v20, 4  ;;  %v2877_v37 = vpop.f32.mrf.mxu1 }
 0x54b   :  { %v1384_v47 = vsel %vm936_vm4, %v1383_v50, 0.0 }
 0x54c   :  { %v1377_v1 = vadd.f32 %v1376_v23, %v1375_v20  ;;  %v1385_v30 = vrot.slane %v1384_v47, 4  ;;  %v1372_v33 = vpop.f32.mrf.mxu1 }
 0x54e   :  { %v1378_v4 = vrot.slane %v1377_v1, 2  ;;  %v1386_v5 = vadd.f32 %v1385_v30, %v1384_v47  ;;  %v2878_v27 = vpop.f32.mrf.mxu1 }
 0x550   :  { %v1379_v26 = vadd.f32 %v1378_v4, %v1377_v1  ;;  %v1387_v54 = vrot.slane %v1386_v5, 2 }
 0x552   :  { %v1380_v49 = vrot.slane %v1379_v26, 1  ;;  %v1388_v42 = vadd.f32 %v1387_v54, %v1386_v5 }
 0x554   :  { %v1381_v40 = vadd.f32 %v1380_v49, %v1379_v26  ;;  %v1389_v52 = vrot.slane %v1388_v42, 1  ;;  %v3166_v49 = vld [vmem:[%s5086_s7 + $0x38] sm:$0xff]  }
 0x556   :  { %v1382_v32 = vmul.f32 0.25, %v1381_v40  ;;  %v1390_v14 = vadd.f32 %v1389_v52, %v1388_v42  ;;  %v3167_v52 = vld [vmem:[%s5086_s7 + $0x30] sm:$0xff]  }
 0x558   :  { %v1391_v51 = vmul.f32 0.25, %v1390_v14  ;;  %v1392_v39 = vmul.f32 %v1382_v32, %v1382_v32  ;;  %v1395_v57 = vsub.f32 %v1369_v36, %v1382_v32  ;;  %v3168_v14 = vld [vmem:[%s5086_s7 + $0x28] sm:$0xff]  }
 0x55a   :  { %v1393_v59 = vsub.f32 %v1391_v51, %v1392_v39  ;;  %v3169_v51 = vld [vmem:[%s5086_s7 + $0x20] sm:$0xff]   ;;  %v3170_v39 = vld [vmem:[%s5086_s7 + $0x18] sm:$0xff]  }
 0x55c   :  { %v1394_v10 = vmax.f32 %v1393_v59, 0.0 }
 0x55e   :  { %v1396_v0 = vadd.f32 1e-05, %v1394_v10 }
 0x560   :  { %3133 = vrsqrt.f32 %v1396_v0  ;;  %v3171_v0 = vld [vmem:[%s5086_s7 + $0x10] sm:$0xff]  }
 0x568   :  { %v2307_v29 = vpop.f32.mrf.mxu1 }
 0x569   :  { %v2313_v3 = vsel %vm936_vm4, %v2307_v29, 0.0  ;;  %v2321_v24 = vmul.f32 %v2307_v29, %v2307_v29 }
 0x56a   :  { %v2314_v21 = vrot.slane %v2313_v3, 4  ;;  %v2917_v48 = vpop.f32.mrf.mxu1 }
 0x56b   :  { %v2322_v8 = vsel %vm936_vm4, %v2321_v24, 0.0  ;;  %v3172_v24 = vld [vmem:[%s5084_s5] ss:$0 sm:$0xff]  ;;  %v3173_v48 = vld [vmem:[%s5086_s7 + $0x8] sm:$0xff]  }
 0x56c   :  { %v2315_v43 = vadd.f32 %v2314_v21, %v2313_v3  ;;  %v2323_v60 = vrot.slane %v2322_v8, 4  ;;  %v2310_v56 = vpop.f32.mrf.mxu1 }
 0x56d   :  { %v3134_v28 = vpop.eup %3133  ;;  %v2619_v56 = vmul.f32 %v4839_v62, %v4839_v62 }
 0x56e   :  { %v1398_v41 = vmul.f32 %v3134_v28, %v1395_v57  ;;  %v2316_v9 = vrot.slane %v2315_v43, 2  ;;  %v2324_v16 = vadd.f32 %v2323_v60, %v2322_v8  ;;  %v2918_v55 = vpop.f32.mrf.mxu1 }
 0x56f   :  { %v2620_v28 = vsel %vm936_vm4, %v2619_v56, 0.0 }
 0x570   :  { %v1406_v36 = vmul.f32 %v4960_v38, %v1398_v41  ;;  %v2317_v20 = vadd.f32 %v2316_v9, %v2315_v43  ;;  %v2325_v50 = vrot.slane %v2324_v16, 2  ;;  %v3175_v43 = vld [vmem:[%s5086_s7] sm:$0xff]  }
 0x572   :  { %v2318_v23 = vrot.slane %v2317_v20, 1  ;;  %v2326_v37 = vadd.f32 %v2325_v50, %v2324_v16  ;;  %v1414_v47 = vadd.f32 %v4965_v19, %v1406_v36 }
 0x574   :  { %v2319_v1 = vadd.f32 %v2318_v23, %v2317_v20  ;;  %v2327_v30 = vrot.slane %v2326_v37, 1  ;;  %v1415_v33 = vmax.f32 %v1414_v47, 0.0 }
 0x576   :  { %v2320_v4 = vmul.f32 0.25, %v2319_v1  ;;  %v2328_v5 = vadd.f32 %v2327_v30, %v2326_v37  ;;  %v1416_v27 = vpack.c.bf16 %v1415_v33, %v1415_v33 }
 0x578   :  { %v2329_v26 = vmul.f32 0.25, %v2328_v5  ;;  %v2330_v54 = vmul.f32 %v2320_v4, %v2320_v4  ;;  %2896 = vmatmul.mubr.bf16.vlgmr.msra.gmra.mxu0 %v1416_v27  ;;  %v2333_v59 = vsub.f32 %v2307_v29, %v2320_v4  ;;  %v3174_v29 = vld [vmem:[%s5085_s6] ss:$0 sm:$0xff] }
 0x579   :  { %2920 = vmatpush3.bf16.msra.mxu0 %v3166_v49  ;;  %2935 = vmatprep.mubr.msk.bf16.mxu0 %vm3190_vm0, %v5205_v25 }
 0x57a   :  { %v2331_v42 = vsub.f32 %v2329_v26, %v2330_v54  ;;  %2921 = vmatprep.subr.bf16.mxu0 %v5205_v25 }
 0x57c   :  { %v2332_v40 = vmax.f32 %v2331_v42, 0.0 }
 0x57d   :  { %2922 = vmatpush3.bf16.msra.mxu0 %v3167_v52 }
 0x57e   :  { %v2334_v32 = vadd.f32 1e-05, %v2332_v40  ;;  %2923 = vmatprep.subr.bf16.mxu0 %v5205_v25 }
 0x580   :  { %3135 = vrsqrt.f32 %v2334_v32 }
 0x581   :  { %2924 = vmatpush3.bf16.msra.mxu0 %v3168_v14 }
 0x582   :  { %2925 = vmatprep.subr.bf16.mxu0 %v5205_v25 }
 0x585   :  { %2926 = vmatpush3.bf16.msra.mxu0 %v3169_v51 }
 0x586   :  { %2927 = vmatprep.subr.bf16.mxu0 %v5205_v25 }
 0x589   :  { %2928 = vmatpush3.bf16.msra.mxu0 %v3170_v39 }
 0x58a   :  { %2929 = vmatprep.subr.bf16.mxu0 %v5205_v25 }
 0x58d   :  { %v3136_v10 = vpop.eup %3135  ;;  %2930 = vmatpush3.bf16.msra.mxu0 %v3171_v0 }
 0x58e   :  { %v2336_v3 = vmul.f32 %v3136_v10, %v2333_v59  ;;  %2931 = vmatprep.subr.bf16.mxu0 %v5205_v25 }
 0x590   :  { %v2337_v21 = vmul.f32 %v3172_v24, %v2336_v3 }
 0x591   :  { %2932 = vmatpush3.bf16.msra.mxu0 %v3173_v48 }
 0x592   :  { %2933 = vmatprep.subr.bf16.mxu0 %v5205_v25  ;;  %v2338_v8 = vadd.f32 %v3174_v29, %v2337_v21 }
 0x594   :  { %v2339_v57 = vmax.f32 %v2338_v8, 0.0 }
 0x595   :  { %2934 = vmatpush3.bf16.msra.mxu0 %v3175_v43 }
 0x596   :  { %v2340_v60 = vpack.c.bf16 %v2339_v57, %v2339_v57  ;;  %2959 = vmatprep.subr.bf16.mxu0 %v5205_v25 }
 0x598   :  { %2936 = vmatmul.mubr.bf16.vlgmr.msra.gmra.mxu0 %v2340_v60 }
 0x599   :  { %2960 = vmatpush3.bf16.msra.mxu0 %v4772_v46  ;;  %2975 = vmatprep.mubr.msk.bf16.mxu0 %vm3190_vm0, %v5205_v25  ;;  %v5029_v46 = vld [vmem:[%s5096_s17] ss:$0 sm:$0xff] }
 0x59a   :  { %2961 = vmatprep.subr.bf16.mxu0 %v5205_v25 }
 0x59d   :  { %2962 = vmatpush3.bf16.msra.mxu0 %v4779_v15 }
 0x59e   :  { %2963 = vmatprep.subr.bf16.mxu0 %v5205_v25 }
 0x5a1   :  { %2964 = vmatpush3.bf16.msra.mxu0 %v4786_v11 }
 0x5a2   :  { %2965 = vmatprep.subr.bf16.mxu0 %v5205_v25 }
 0x5a5   :  { %2966 = vmatpush3.bf16.msra.mxu0 %v4793_v45 }
 0x5a6   :  { %2967 = vmatprep.subr.bf16.mxu0 %v5205_v25 }
 0x5a9   :  { %2968 = vmatpush3.bf16.msra.mxu0 %v4800_v58 }
 0x5aa   :  { %2969 = vmatprep.subr.bf16.mxu0 %v5205_v25 }
 0x5ad   :  { %2970 = vmatpush3.bf16.msra.mxu0 %v4807_v12 }
 0x5ae   :  { %2971 = vmatprep.subr.bf16.mxu0 %v5205_v25 }
 0x5b1   :  { %2972 = vmatpush3.bf16.msra.mxu0 %v4814_v61 }
 0x5b2   :  { %2973 = vmatprep.subr.bf16.mxu0 %v5205_v25 }
 0x5b5   :  { %2974 = vmatpush3.bf16.msra.mxu0 %v4821_v6 }
 0x638   :  { %v1522_v15 = vpop.f32.mrf.mxu0 }
 0x639   :  { %v5032_v11 = vadd.f32 %v5029_v46, %v1522_v15 }
 0x63a   :  { %v2897_v45 = vpop.f32.mrf.mxu0 }
 0x63b   :  { %v2584_v58 = vmul.f32 %v5032_v11, %v5032_v11 }
 0x63c   :  { %v1525_v12 = vpop.f32.mrf.mxu0 }
 0x63d   :  { %v2585_v61 = vsel %vm936_vm4, %v2584_v58, 0.0 }
 0x63e   :  { %2586 = vadd.xlane.f32.xlu1 %v2585_v61  ;;  %v2898_v6 = vpop.f32.mrf.mxu0 }
 0x642   :  { %2621 = vadd.xlane.f32.xlu1 %v2620_v28 }
 0x658   :  { %v2375_v41 = vpop.f32.mrf.mxu0 }
 0x659   :  { %v2381_v9 = vsel %vm936_vm4, %v2375_v41, 0.0  ;;  %v2389_v16 = vmul.f32 %v2375_v41, %v2375_v41 }
 0x65a   :  { %v2382_v55 = vrot.slane %v2381_v9, 4  ;;  %v2937_v36 = vpop.f32.mrf.mxu0 }
 0x65b   :  { %v2390_v20 = vsel %vm936_vm4, %v2389_v16, 0.0 }
 0x65c   :  { %v2383_v50 = vadd.f32 %v2382_v55, %v2381_v9  ;;  %v2391_v23 = vrot.slane %v2390_v20, 4  ;;  %v2378_v37 = vpop.f32.mrf.mxu0 }
 0x65e   :  { %v2384_v47 = vrot.slane %v2383_v50, 2  ;;  %v2392_v1 = vadd.f32 %v2391_v23, %v2390_v20  ;;  %v2938_v30 = vpop.f32.mrf.mxu0 }
 0x660   :  { %v2385_v33 = vadd.f32 %v2384_v47, %v2383_v50  ;;  %v2393_v4 = vrot.slane %v2392_v1, 2 }
 0x662   :  { %v2386_v5 = vrot.slane %v2385_v33, 1  ;;  %v2394_v27 = vadd.f32 %v2393_v4, %v2392_v1 }
 0x664   :  { %v2387_v26 = vadd.f32 %v2386_v5, %v2385_v33  ;;  %v2395_v54 = vrot.slane %v2394_v27, 1 }
 0x666   :  { %v2388_v49 = vmul.f32 0.25, %v2387_v26  ;;  %v2396_v42 = vadd.f32 %v2395_v54, %v2394_v27 }
 0x668   :  { %v2397_v40 = vmul.f32 0.25, %v2396_v42  ;;  %v2398_v52 = vmul.f32 %v2388_v49, %v2388_v49  ;;  %v2401_v39 = vsub.f32 %v2375_v41, %v2388_v49 }
 0x66a   :  { %v2399_v32 = vsub.f32 %v2397_v40, %v2398_v52 }
 0x66c   :  { %v2400_v14 = vmax.f32 %v2399_v32, 0.0 }
 0x66e   :  { %v2402_v51 = vadd.f32 1e-05, %v2400_v14 }
 0x670   :  { %3137 = vrsqrt.f32 %v2402_v51 }
 0x67d   :  { %v3138_v59 = vpop.eup %3137 }
 0x67e   :  { %v2404_v10 = vmul.f32 %v3138_v59, %v2401_v39 }
 0x680   :  { %v2405_v0 = vmul.f32 %v4758_v34, %v2404_v10 }
 0x682   :  { %v2406_v3 = vadd.f32 %v4763_v13, %v2405_v0 }
 0x684   :  { %v2407_v24 = vmax.f32 %v2406_v3, 0.0 }
 0x686   :  { %v2408_v21 = vpack.c.bf16 %v2407_v24, %v2407_v24 }
 0x688   :  { %2956 = vmatmul.mubr.bf16.vlgmr.msra.gmra.mxu1 %v2408_v21 }
 0x689   :  { %2980 = vmatpush3.bf16.msra.mxu1 %v4900_v22  ;;  %2995 = vmatprep.mubr.msk.bf16.mxu1 %vm3190_vm0, %v5205_v25 }
 0x68a   :  { %2981 = vmatprep.subr.bf16.mxu1 %v5205_v25 }
 0x68d   :  { %2982 = vmatpush3.bf16.msra.mxu1 %v4907_v44 }
 0x68e   :  { %2983 = vmatprep.subr.bf16.mxu1 %v5205_v25 }
 0x691   :  { %2984 = vmatpush3.bf16.msra.mxu1 %v4914_v17 }
 0x692   :  { %2985 = vmatprep.subr.bf16.mxu1 %v5205_v25 }
 0x695   :  { %2986 = vmatpush3.bf16.msra.mxu1 %v4921_v31 }
 0x696   :  { %2987 = vmatprep.subr.bf16.mxu1 %v5205_v25 }
 0x699   :  { %2988 = vmatpush3.bf16.msra.mxu1 %v4928_v2 }
 0x69a   :  { %2989 = vmatprep.subr.bf16.mxu1 %v5205_v25 }
 0x69d   :  { %2990 = vmatpush3.bf16.msra.mxu1 %v4935_v18 }
 0x69e   :  { %2991 = vmatprep.subr.bf16.mxu1 %v5205_v25 }
 0x6a1   :  { %2992 = vmatpush3.bf16.msra.mxu1 %v4942_v7 }
 0x6a2   :  { %2993 = vmatprep.subr.bf16.mxu1 %v5205_v25 }
 0x6a5   :  { %2994 = vmatpush3.bf16.msra.mxu1 %v4949_v63 }
 0x748   :  { %v2443_v34 = vpop.f32.mrf.mxu1 }
 0x749   :  { %v2449_v13 = vsel %vm936_vm4, %v2443_v34, 0.0  ;;  %v2457_v22 = vmul.f32 %v2443_v34, %v2443_v34 }
 0x74a   :  { %v2450_v44 = vrot.slane %v2449_v13, 4  ;;  %v2957_v17 = vpop.f32.mrf.mxu1 }
 0x74b   :  { %v2458_v31 = vsel %vm936_vm4, %v2457_v22, 0.0 }
 0x74c   :  { %v2451_v2 = vadd.f32 %v2450_v44, %v2449_v13  ;;  %v2459_v48 = vrot.slane %v2458_v31, 4  ;;  %v2446_v29 = vpop.f32.mrf.mxu1 }
 0x74e   :  { %v2452_v18 = vrot.slane %v2451_v2, 2  ;;  %v2460_v8 = vadd.f32 %v2459_v48, %v2458_v31  ;;  %v2958_v57 = vpop.f32.mrf.mxu1  ;;  %v2587_v48 = vpop.xlane.xlu1 %2586 }
 0x750   :  { %v2453_v43 = vadd.f32 %v2452_v18, %v2451_v2  ;;  %v2461_v7 = vrot.slane %v2460_v8, 2  ;;  %v2588_v18 = vmax.f32 %v2587_v48, 1e-24 }
 0x752   :  { %v2454_v60 = vrot.slane %v2453_v43, 1  ;;  %v2462_v25 = vadd.f32 %v2461_v7, %v2460_v8 }
 0x754   :  { %v2455_v15 = vadd.f32 %v2454_v60, %v2453_v43  ;;  %v2463_v63 = vrot.slane %v2462_v25, 1 }
 0x756   :  { %v2456_v45 = vmul.f32 0.25, %v2455_v15  ;;  %v2464_v58 = vadd.f32 %v2463_v63, %v2462_v25 }
 0x758   :  { %v2465_v12 = vmul.f32 0.25, %v2464_v58  ;;  %v2466_v61 = vmul.f32 %v2456_v45, %v2456_v45  ;;  %v2469_v41 = vsub.f32 %v2443_v34, %v2456_v45 }
 0x75a   :  { %v2467_v56 = vsub.f32 %v2465_v12, %v2466_v61  ;;  %v2622_v61 = vpop.xlane.xlu1 %2621 }
 0x75c   :  { %v2468_v6 = vmax.f32 %v2467_v56, 0.0  ;;  %v2623_v56 = vmax.f32 %v2622_v61, 1e-24 }
 0x75e   :  { %v2470_v28 = vadd.f32 1e-05, %v2468_v6 }
 0x760   :  { %3139 = vrsqrt.f32 %v2470_v28 }
 0x76d   :  { %v3140_v9 = vpop.eup %3139 }
 0x76e   :  { %v2472_v16 = vmul.f32 %v3140_v9, %v2469_v41 }
 0x770   :  { %v2473_v55 = vmul.f32 %v4830_v53, %v2472_v16 }
 0x772   :  { %v2474_v36 = vadd.f32 %v4835_v35, %v2473_v55 }
 0x774   :  { %v2475_v20 = vpack.c.bf16 %v2474_v36, %v2474_v36  ;;  %v2591_v50 = vmul.f32 %v2474_v36, %v2474_v36 }
 0x776   :  { %2976 = vmatmul.mubr.bf16.vlgmr.msra.gmra.mxu0 %v2475_v20  ;;  %v2592_v23 = vsel %vm936_vm4, %v2591_v50, 0.0 }
 0x777   :  { %2593 = vadd.xlane.f32.xlu0 %v2592_v23 }
 0x800   :  { %v2594_v2 = vpop.xlane.xlu0 %2593 }
 0x801   :  { %v2595_v29 = vmax.f32 %v2594_v2, 1e-24 }
 0x836   :  { %v2510_v37 = vpop.f32.mrf.mxu0 }
 0x837   :  { %v2516_v47 = vsel %vm936_vm4, %v2510_v37, 0.0  ;;  %v2524_v1 = vmul.f32 %v2510_v37, %v2510_v37 }
 0x838   :  { %v2517_v30 = vrot.slane %v2516_v47, 4  ;;  %v2977_v33 = vpop.f32.mrf.mxu0 }
 0x839   :  { %v2525_v4 = vsel %vm936_vm4, %v2524_v1, 0.0 }
 0x83a   :  { %v2518_v5 = vadd.f32 %v2517_v30, %v2516_v47  ;;  %v2526_v27 = vrot.slane %v2525_v4, 4  ;;  %v2513_v26 = vpop.f32.mrf.mxu0 }
 0x83c   :  { %v2519_v53 = vrot.slane %v2518_v5, 2  ;;  %v2527_v54 = vadd.f32 %v2526_v27, %v2525_v4  ;;  %v2978_v35 = vpop.f32.mrf.mxu0 }
 0x83e   :  { %v2520_v49 = vadd.f32 %v2519_v53, %v2518_v5  ;;  %v2528_v42 = vrot.slane %v2527_v54, 2 }
 0x840   :  { %v2521_v40 = vrot.slane %v2520_v49, 1  ;;  %v2529_v52 = vadd.f32 %v2528_v42, %v2527_v54 }
 0x842   :  { %v2522_v32 = vadd.f32 %v2521_v40, %v2520_v49  ;;  %v2530_v14 = vrot.slane %v2529_v52, 1 }
 0x844   :  { %v2523_v51 = vmul.f32 0.25, %v2522_v32  ;;  %v2531_v39 = vadd.f32 %v2530_v14, %v2529_v52 }
 0x846   :  { %v2532_v59 = vmul.f32 0.25, %v2531_v39  ;;  %v2533_v10 = vmul.f32 %v2523_v51, %v2523_v51  ;;  %v2536_v21 = vsub.f32 %v2510_v37, %v2523_v51 }
 0x848   :  { %v2534_v0 = vsub.f32 %v2532_v59, %v2533_v10 }
 0x84a   :  { %v2535_v3 = vmax.f32 %v2534_v0, 0.0 }
 0x84c   :  { %v2537_v24 = vadd.f32 1e-05, %v2535_v3 }
 0x84e   :  { %3141 = vrsqrt.f32 %v2537_v24 }
 0x84f   :  { %3143 = vrsqrt.f32 %v2595_v29 }
 0x850   :  { %3145 = vrsqrt.f32 %v2588_v18 }
 0x851   :  { %3147 = vrsqrt.f32 %v2623_v56 }
 0x85b   :  { %v3142_v34 = vpop.eup %3141 }
 0x85c   :  { %v2539_v13 = vmul.f32 %v3142_v34, %v2536_v21  ;;  %v3144_v8 = vpop.eup %3143 }
 0x85d   :  { %v3146_v57 = vpop.eup %3145  ;;  %v2597_v60 = vmul.f32 %v3144_v8, %v2474_v36 }
 0x85e   :  { %v2540_v22 = vmul.f32 %v4960_v38, %v2539_v13  ;;  %v2590_v38 = vmul.f32 %v3146_v57, %v5032_v11  ;;  %v3148_v36 = vpop.eup %3147 }
 0x85f   :  { %v2625_v37 = vmul.f32 %v3148_v36, %v4839_v62 }
 0x860   :  { %v2541_v44 = vadd.f32 %v4965_v19, %v2540_v22  ;;  %v2598_v45 = vmul.f32 %v2597_v60, %v2590_v38 }
 0x862   :  { %v2542_v17 = vmax.f32 %v2541_v44, 0.0  ;;  %v2599_v12 = vsel %vm936_vm4, %v2598_v45, 0.0 }
 0x864   :  { %v2543_v31 = vpack.c.bf16 %v2542_v17, %v2542_v17 }
 0x866   :  { %2996 = vmatmul.mubr.bf16.vlgmr.msra.gmra.mxu1 %v2543_v31 }
 0x926   :  { %v2578_v43 = vpop.f32.mrf.mxu1 }
 0x927   :  { %v2579_v7 = vadd.f32 %v5029_v46, %v2578_v43 }
 0x928   :  { %v2997_v25 = vpop.f32.mrf.mxu1 }
 0x929   :  { %v2612_v15 = vmul.f32 %v2579_v7, %v2579_v7 }
 0x92a   :  { %v2581_v19 = vpop.f32.mrf.mxu1 }
 0x92b   :  { %v2613_v63 = vsel %vm936_vm4, %v2612_v15, 0.0 }
 0x92c   :  { %2614 = vadd.xlane.f32.xlu0 %v2613_v63  ;;  %v2998_v58 = vpop.f32.mrf.mxu1 }
 0x930   :  { %2600 = vadd.xlane.f32.xlu0 %v2599_v12 }
 0x9b5   :  { %v2615_v6 = vpop.xlane.xlu0 %2614 }
 0x9b6   :  { %v2616_v28 = vmax.f32 %v2615_v6, 1e-24 }
 0x9b8   :  { %3149 = vrsqrt.f32 %v2616_v28 }
 0x9b9   :  { %v2601_v46 = vpop.xlane.xlu0 %2600 }
 0x9ba   :  { %v2602_v41 = vrot.slane %v2601_v46, 4 }
 0x9bc   :  { %v2603_v9 = vadd.f32 %v2602_v41, %v2601_v46 }
 0x9be   :  { %v2604_v16 = vrot.slane %v2603_v9, 2 }
 0x9c0   :  { %v2605_v11 = vadd.f32 %v2604_v16, %v2603_v9 }
 0x9c2   :  { %v2606_v55 = vrot.slane %v2605_v11, 1 }
 0x9c4   :  { %v2607_v20 = vadd.f32 %v2606_v55, %v2605_v11 }
 0x9c5   :  { %v3150_v50 = vpop.eup %3149 }
 0x9c6   :  { %2999 = vpush %v2607_v20  ;;  %v2618_v23 = vmul.f32 %v3150_v50, %v2579_v7 }
 0x9c8   :  { %v2626_v47 = vmul.f32 %v2625_v37, %v2618_v23 }
 0x9ca   :  { %v2627_v1 = vsel %vm936_vm4, %v2626_v47, 0.0 }
 0x9cb   :  { %2628 = vadd.xlane.f32.xlu1 %v2627_v1 }
 0x9f7   :  { %s3000_s7 = spop %2999 }
 0x9f8   :  { %s2609_s17 = ssub.f32 0.0, %s3000_s7 }
 0x9fa   :  { %s2610_s25 = smul.f32 0.25, %s2609_s17 }
 0x9fc   :  { %s2611_s28 = smul.f32 0.5, %s2610_s25 }
 0xa54   :  { %v2629_v30 = vpop.xlane.xlu1 %2628 }
 0xa55   :  { %v2630_v33 = vrot.slane %v2629_v30, 4 }
 0xa57   :  { %v2631_v4 = vadd.f32 %v2630_v33, %v2629_v30 }
 0xa59   :  { %v2632_v5 = vrot.slane %v2631_v4, 2 }
 0xa5b   :  { %v2633_v27 = vadd.f32 %v2632_v5, %v2631_v4 }
 0xa5d   :  { %v2634_v26 = vrot.slane %v2633_v27, 1 }
 0xa5f   :  { %v2635_v53 = vadd.f32 %v2634_v26, %v2633_v27 }
 0xa61   :  { %3001 = vpush %v2635_v53 }
 0xa92   :  { %s3002_s26 = spop %3001 }
 0xa93   :  { %s2637_s16 = ssub.f32 0.0, %s3002_s26 }
 0xa95   :  { %s2638_s27 = smul.f32 0.25, %s2637_s16 }
 0xa97   :  { %s2639_s0 = smul.f32 0.5, %s2638_s27 }
 0xa99   :  { %s2640_s14 = sadd.f32 %s2639_s0, %s2611_s28 }
 0xa9b   :  { %2642 = sst [smem:[#allocation2]] %s2640_s14 }
 0xa9c   :  { %2650 = dma.smem_to_hbm %s3191_s15, 16, %s5097_s18, [#allocation3]  }
 0xa9d   :  { %3184 = dma.done.wait [#allocation3], 16  }
 0xa9e   :  { %3185 = vsyncadd [#allocation3], 4294967280 }
 0xa9f   :  { %2654 = sfence }
 0xaa0   :  { %2655 = vsyncpa [#allocation3], 1 }

</bundles_post_ra>
